<compile_context>
chip_gen: v5e
topology: v5e:2x2
jax: 0.10.0
libtpu: 0.0.40
codegen_flags: <defaults>
</compile_context>

<pallas_src>
import functools

import jax
import jax.numpy as jnp
import numpy as np
from jax import lax
from jax.experimental import pallas as pl
from jax.experimental.pallas import tpu as pltpu

EPS = 1e-5          # nn.BatchNorm2d default
LANE = 128
SUBLANE = 8


def _round_up(v, m):
    return ((v + m - 1) // m) * m


def _conv_tile(a_ref, b_ref, w_ref, slab_ref, *, tm, wp, kh_taps, krow):
    """Compute one (tm, Cpad) f32 conv tile: gather the kH vertical taps from the haloed row
    window and accumulate kH (tm, krow) x (krow, Cpad) bf16 matmuls (f32 accumulation)."""
    # Haloed window of flat rows [m0, m0 + 2*tm): block i ("A") and block i+1 ("B").
    slab_ref[0:tm, :] = a_ref[...]
    slab_ref[tm:2 * tm, :] = b_ref[...]
    cpad = w_ref.shape[1]
    acc = jnp.zeros((tm, cpad), jnp.float32)
    for kh in range(kh_taps):                                  # static unroll (4 taps)
        off = kh * wp                                          # vertical tap == flat-row shift
        lhs = slab_ref[off:off + tm, :].astype(jnp.bfloat16)   # (tm, krow)
        rhs = w_ref[kh * krow:(kh + 1) * krow, :]              # (krow, Cpad) bf16
        acc = acc + jnp.dot(lhs, rhs, preferred_element_type=jnp.float32)
    return acc


def _stats_kernel(a_ref, b_ref, w_ref, mask_ref, part_ref, slab_ref,
                  *, tm, wp, kh_taps, krow):
    """Pass 1: conv tile + masked per-tile (sum, sumsq) partials for global BatchNorm stats."""
    acc = _conv_tile(a_ref, b_ref, w_ref, slab_ref, tm=tm, wp=wp, kh_taps=kh_taps, krow=krow)
    m = mask_ref[...]                                          # (tm, 1): 1.0 on real output rows
    accm = acc * m
    psum = jnp.sum(accm, axis=0, keepdims=True)                # (1, Cpad)
    psq = jnp.sum(acc * accm, axis=0, keepdims=True)           # (1, Cpad)
    fill = jnp.zeros((SUBLANE - 2, acc.shape[1]), jnp.float32)
    part_ref[0] = jnp.concatenate([psum, psq, fill], axis=0)   # (8, Cpad) block; rows 0/1 used


def _apply_kernel(a_ref, b_ref, w_ref, scale_ref, shift_ref, o_ref, slab_ref,
                  *, tm, wp, kh_taps, krow):
    """Pass 2: recompute conv tile, apply folded BatchNorm affine + ReLU, lane-dense store."""
    acc = _conv_tile(a_ref, b_ref, w_ref, slab_ref, tm=tm, wp=wp, kh_taps=kh_taps, krow=krow)
    y = acc * scale_ref[...] + shift_ref[...]
    o_ref[...] = jnp.maximum(y, 0.0).astype(o_ref.dtype)


def decnr2d_forward(x, w_deconv, gamma, beta, *, kernel_size=4, stride=1,
                    padding=1, output_padding=0, tile_m=512):
    """x: (N, Cin, H, W) f32; w_deconv: (Cin, Cout, kH, kW) (nn.ConvTranspose2d layout).
    Returns (N, Cout, Ho, Wo) f32 = ReLU(BatchNorm2d(ConvTranspose2d(x)))."""
    assert stride == 1 and output_padding == 0, "only the DECNR2d defaults are supported"
    N, Cin, H, W = x.shape
    Cout, kH, kW = w_deconv.shape[1], w_deconv.shape[2], w_deconv.shape[3]
    assert kernel_size == kH == kW

    pad = kH - 1 - padding                                     # = 2 for k=4, p=1
    Ho = (H - 1) * stride - 2 * padding + kH + output_padding  # = H + 1
    Wo = (W - 1) * stride - 2 * padding + kW + output_padding  # = W + 1
    Hp, Wp = H + 2 * pad, W + 2 * pad

    # Equivalent-conv weight matrix, rows ordered (kh, kw, cin); Cout zero-padded to 128 lanes.
    cpad = _round_up(Cout, LANE)
    krow = kW * Cin
    w_conv = jnp.flip(w_deconv, axis=(2, 3))                                   # (Cin,Cout,kH,kW)
    w_mat = jnp.transpose(w_conv, (2, 3, 0, 1)).reshape(kH * krow, Cout)       # (kH*kW*Cin, Cout)
    w_mat = jnp.pad(w_mat, ((0, 0), (0, cpad - Cout))).astype(jnp.bfloat16)

    # Channels-last padded input with the kW horizontal taps folded into the lane dim.
    x_nhwc = jnp.transpose(x, (0, 2, 3, 1))
    xp = jnp.pad(x_nhwc, ((0, 0), (pad, pad), (pad, pad + kW - 1), (0, 0)))    # (N,Hp,Wp+kW-1,Cin)
    xrow = jnp.concatenate([xp[:, :, kw:kw + Wp, :] for kw in range(kW)], axis=-1)  # (N,Hp,Wp,krow)
    M = N * Hp * Wp
    xrow = xrow.reshape(M, krow).astype(jnp.float32)

    # Tiling over flat rows. The vertical halo (kH-1)*Wp is covered by also handing the kernel
    # the *next* tile (index map i+1), so the tile must be at least as tall as the halo.
    halo = (kH - 1) * Wp
    tm = max(_round_up(tile_m, SUBLANE), _round_up(halo, SUBLANE))
    num_tiles = pl.cdiv(M, tm)
    m_work = num_tiles * tm
    xrow = jnp.pad(xrow, ((0, (num_tiles + 1) * tm - M), (0, 0)))  # +1 tile so block i+1 exists

    # 1.0 on real output rows (oh < Ho, ow < Wo, row < M); junk halo / pad rows are excluded
    # from the BatchNorm statistics and sliced off the output.
    rows = jnp.arange(m_work, dtype=jnp.int32)
    valid = (rows < M) & (rows % Wp < Wo) & ((rows // Wp) % Hp < Ho)
    mask = valid.astype(jnp.float32).reshape(m_work, 1)

    kern_kw = dict(tm=tm, wp=Wp, kh_taps=kH, krow=krow)
    flops = 2 * m_work * (kH * krow) * cpad
    cparams = pltpu.CompilerParams(
        dimension_semantics=("parallel",),            # independent tiles -> megacore splits M
        vmem_limit_bytes=32 * 1024 * 1024)            # ample headroom incl. v7x (64 MiB physical)

    # ---- pass 1: conv tiles + masked per-tile (sum, sumsq) partials ----
    part = pl.pallas_call(
        functools.partial(_stats_kernel, **kern_kw),
        out_shape=jax.ShapeDtypeStruct((num_tiles, SUBLANE, cpad), jnp.float32),
        grid=(num_tiles,),
        in_specs=[
            pl.BlockSpec((tm, krow), lambda i: (i, 0)),        # rows [m0, m0+tm)
            pl.BlockSpec((tm, krow), lambda i: (i + 1, 0)),    # rows [m0+tm, m0+2tm)  (halo)
            pl.BlockSpec((kH * krow, cpad), lambda i: (0, 0)),
            pl.BlockSpec((tm, 1), lambda i: (i, 0)),
        ],
        out_specs=pl.BlockSpec((1, SUBLANE, cpad), lambda i: (i, 0, 0)),
        scratch_shapes=[pltpu.VMEM((2 * tm, krow), jnp.float32)],
        compiler_params=cparams,
        cost_estimate=pl.CostEstimate(
            flops=flops, transcendentals=0,
            bytes_accessed=2 * xrow.size * 4 + mask.size * 4 + w_mat.size * 2
                           + num_tiles * SUBLANE * cpad * 4),
    )(xrow, xrow, w_mat, mask)

    # ---- global BatchNorm stats (training mode: biased var over N*Ho*Wo); fold gamma/beta ----
    m_true = float(N * Ho * Wo)
    mean = jnp.sum(part[:, 0, :], axis=0) / m_true
    var = jnp.maximum(jnp.sum(part[:, 1, :], axis=0) / m_true - mean * mean, 0.0)
    inv = lax.rsqrt(var + EPS)
    gamma_p = jnp.pad(gamma.astype(jnp.float32), (0, cpad - Cout))
    beta_p = jnp.pad(beta.astype(jnp.float32), (0, cpad - Cout))
    scale = (gamma_p * inv).reshape(1, cpad)
    shift = (beta_p - mean * gamma_p * inv).reshape(1, cpad)

    # ---- pass 2: recompute conv tiles, apply scale/shift + ReLU ----
    out_flat = pl.pallas_call(
        functools.partial(_apply_kernel, **kern_kw),
        out_shape=jax.ShapeDtypeStruct((m_work, cpad), jnp.float32),
        grid=(num_tiles,),
        in_specs=[
            pl.BlockSpec((tm, krow), lambda i: (i, 0)),
            pl.BlockSpec((tm, krow), lambda i: (i + 1, 0)),
            pl.BlockSpec((kH * krow, cpad), lambda i: (0, 0)),
            pl.BlockSpec((1, cpad), lambda i: (0, 0)),         # scale
            pl.BlockSpec((1, cpad), lambda i: (0, 0)),         # shift
        ],
        out_specs=pl.BlockSpec((tm, cpad), lambda i: (i, 0)),
        scratch_shapes=[pltpu.VMEM((2 * tm, krow), jnp.float32)],
        compiler_params=cparams,
        cost_estimate=pl.CostEstimate(
            flops=flops, transcendentals=0,
            bytes_accessed=2 * xrow.size * 4 + w_mat.size * 2 + 2 * cpad * 4
                           + m_work * cpad * 4),
    )(xrow, xrow, w_mat, scale, shift)

    # Crop the junk halo rows / padded channels and return PyTorch NCHW.
    y = out_flat[:M, :Cout].reshape(N, Hp, Wp, Cout)[:, :Ho, :Wo, :]
    # TODO(synk): a channels-last consumer could take `y` (NHWC) directly and skip this transpose.
    return jnp.transpose(y, (0, 3, 1, 2))


def decnr2d_reference(x, w_deconv, gamma, beta, *, kernel_size=4, padding=1):
    """Pure-JAX f32 reference for validation."""
    kH = kW = kernel_size
    pad = kH - 1 - padding
    w_conv = jnp.transpose(jnp.flip(w_deconv, axis=(2, 3)), (1, 0, 2, 3))   # (Cout,Cin,kH,kW)
    conv = lax.conv_general_dilated(
        x, w_conv, window_strides=(1, 1), padding=((pad, pad), (pad, pad)),
        dimension_numbers=('NCHW', 'OIHW', 'NCHW'))
    mean = jnp.mean(conv, axis=(0, 2, 3), keepdims=True)
    var = jnp.mean((conv - mean) ** 2, axis=(0, 2, 3), keepdims=True)
    y = (conv - mean) * lax.rsqrt(var + EPS)
    y = y * gamma.reshape(1, -1, 1, 1) + beta.reshape(1, -1, 1, 1)
    return jnp.maximum(y, 0.0)


if __name__ == "__main__":
    key = jax.random.PRNGKey(0)
    k_x, k_w, k_g, k_b = jax.random.split(key, 4)

    N, Cin, Cout, H, W = 2, 4, 8, 16, 16
    x = jax.random.normal(k_x, (N, Cin, H, W), dtype=jnp.float32)
    # nn.ConvTranspose2d weight layout: (in_channels, out_channels, kH, kW); bias=False (bnorm).
    w_deconv = 0.1 * jax.random.normal(k_w, (Cin, Cout, 4, 4), dtype=jnp.float32)
    gamma = 1.0 + 0.1 * jax.random.normal(k_g, (Cout,), dtype=jnp.float32)
    beta = 0.1 * jax.random.normal(k_b, (Cout,), dtype=jnp.float32)
    # TODO(synk): nn.Dropout2d is skipped (drop=[] default => layer not instantiated) and the
    # BatchNorm running_mean/var buffer update is not modeled (only the forward output matters).

    y = jax.block_until_ready(jax.jit(decnr2d_forward)(x, w_deconv, gamma, beta))
    assert y.shape == (N, Cout, H + 1, W + 1)

    y_ref = decnr2d_reference(x, w_deconv, gamma, beta)
    # bf16 MXU operands (f32 accumulation) vs. the f32 reference conv -> loosened tolerance.
    np.testing.assert_allclose(np.asarray(y), np.asarray(y_ref), rtol=3e-2, atol=3e-2)

    print("KERNEL_OK")
</pallas_src>

<mosaic_0001>
module attributes {stable_mosaic.version = 11 : i64} {
  func.func @_stats_kernel(%arg0: i32, %arg1: memref<512x16xf32, #tpu.memory_space<vmem>>, %arg2: memref<512x16xf32, #tpu.memory_space<vmem>>, %arg3: memref<64x128xbf16, #tpu.memory_space<vmem>>, %arg4: memref<512x1xf32, #tpu.memory_space<vmem>>, %arg5: memref<1x8x128xf32, #tpu.memory_space<vmem>>, %arg6: memref<1024x16xf32, #tpu.memory_space<vmem>>) attributes {dimension_semantics = [#tpu.dimension_semantics<parallel>], iteration_bounds = array<i64: 2>, scalar_prefetch = 0 : i64, scratch_operands = 1 : i64, tpu.core_type = #tpu.core_type<tc>, window_params = [{transform_indices = @transform_0, window_bounds = array<i64: 512, 16>}, {transform_indices = @transform_1, window_bounds = array<i64: 512, 16>}, {pipeline_mode = #tpu.pipeline_mode<synchronous>, transform_indices = @transform_2, window_bounds = array<i64: 64, 128>}, {transform_indices = @transform_3, window_bounds = array<i64: 512, 1>}, {transform_indices = @transform_4, window_bounds = array<i64: 1, 8, 128>}]} {
    %c0 = arith.constant 0 : index
    %c0_0 = arith.constant 0 : index
    %0 = vector.load %arg1[%c0, %c0_0] : memref<512x16xf32, #tpu.memory_space<vmem>>, vector<512x16xf32>
    %c0_1 = arith.constant 0 : index
    %c0_2 = arith.constant 0 : index
    %1 = vector.load %arg6[%c0_1, %c0_2] : memref<1024x16xf32, #tpu.memory_space<vmem>>, vector<512x16xf32>
    tpu.vector_store %arg6[%c0_1, %c0_2], %0 {strides = array<i32>} : memref<1024x16xf32, #tpu.memory_space<vmem>>, vector<512x16xf32>,
    %c0_3 = arith.constant 0 : index
    %c0_4 = arith.constant 0 : index
    %2 = vector.load %arg2[%c0_3, %c0_4] : memref<512x16xf32, #tpu.memory_space<vmem>>, vector<512x16xf32>
    %c512 = arith.constant 512 : index
    %c0_5 = arith.constant 0 : index
    %3 = vector.load %arg6[%c512, %c0_5] : memref<1024x16xf32, #tpu.memory_space<vmem>>, vector<512x16xf32>
    tpu.vector_store %arg6[%c512, %c0_5], %2 {strides = array<i32>} : memref<1024x16xf32, #tpu.memory_space<vmem>>, vector<512x16xf32>,
    %cst = arith.constant 0.000000e+00 : f32
    %4 = vector.broadcast %cst : f32 to vector<512x128xf32>
    %c0_6 = arith.constant 0 : index
    %c0_7 = arith.constant 0 : index
    %5 = vector.load %arg6[%c0_6, %c0_7] : memref<1024x16xf32, #tpu.memory_space<vmem>>, vector<512x16xf32>
    %6 = arith.truncf %5 : vector<512x16xf32> to vector<512x16xbf16>
    %c0_8 = arith.constant 0 : index
    %c0_9 = arith.constant 0 : index
    %7 = vector.load %arg3[%c0_8, %c0_9] : memref<64x128xbf16, #tpu.memory_space<vmem>>, vector<16x128xbf16>
    %cst_10 = arith.constant dense<0.000000e+00> : vector<512x128xf32>
    %8 = tpu.matmul %6, %7, %cst_10 {dimension_numbers = #tpu.dot_dimension_numbers<[1], [0], [0], [1], [0, 0, 1, 1], [], []>} : vector<512x16xbf16>, vector<16x128xbf16>, vector<512x128xf32> -> vector<512x128xf32>
    %9 = arith.addf %4, %8 : vector<512x128xf32>
    %c20 = arith.constant 20 : index
    %c0_11 = arith.constant 0 : index
    %10 = vector.load %arg6[%c20, %c0_11] : memref<1024x16xf32, #tpu.memory_space<vmem>>, vector<512x16xf32>
    %11 = arith.truncf %10 : vector<512x16xf32> to vector<512x16xbf16>
    %c16 = arith.constant 16 : index
    %c0_12 = arith.constant 0 : index
    %12 = vector.load %arg3[%c16, %c0_12] : memref<64x128xbf16, #tpu.memory_space<vmem>>, vector<16x128xbf16>
    %cst_13 = arith.constant dense<0.000000e+00> : vector<512x128xf32>
    %13 = tpu.matmul %11, %12, %cst_13 {dimension_numbers = #tpu.dot_dimension_numbers<[1], [0], [0], [1], [0, 0, 1, 1], [], []>} : vector<512x16xbf16>, vector<16x128xbf16>, vector<512x128xf32> -> vector<512x128xf32>
    %14 = arith.addf %9, %13 : vector<512x128xf32>
    %c40 = arith.constant 40 : index
    %c0_14 = arith.constant 0 : index
    %15 = vector.load %arg6[%c40, %c0_14] : memref<1024x16xf32, #tpu.memory_space<vmem>>, vector<512x16xf32>
    %16 = arith.truncf %15 : vector<512x16xf32> to vector<512x16xbf16>
    %c32 = arith.constant 32 : index
    %c0_15 = arith.constant 0 : index
    %17 = vector.load %arg3[%c32, %c0_15] : memref<64x128xbf16, #tpu.memory_space<vmem>>, vector<16x128xbf16>
    %cst_16 = arith.constant dense<0.000000e+00> : vector<512x128xf32>
    %18 = tpu.matmul %16, %17, %cst_16 {dimension_numbers = #tpu.dot_dimension_numbers<[1], [0], [0], [1], [0, 0, 1, 1], [], []>} : vector<512x16xbf16>, vector<16x128xbf16>, vector<512x128xf32> -> vector<512x128xf32>
    %19 = arith.addf %14, %18 : vector<512x128xf32>
    %c60 = arith.constant 60 : index
    %c0_17 = arith.constant 0 : index
    %20 = vector.load %arg6[%c60, %c0_17] : memref<1024x16xf32, #tpu.memory_space<vmem>>, vector<512x16xf32>
    %21 = arith.truncf %20 : vector<512x16xf32> to vector<512x16xbf16>
    %c48 = arith.constant 48 : index
    %c0_18 = arith.constant 0 : index
    %22 = vector.load %arg3[%c48, %c0_18] : memref<64x128xbf16, #tpu.memory_space<vmem>>, vector<16x128xbf16>
    %cst_19 = arith.constant dense<0.000000e+00> : vector<512x128xf32>
    %23 = tpu.matmul %21, %22, %cst_19 {dimension_numbers = #tpu.dot_dimension_numbers<[1], [0], [0], [1], [0, 0, 1, 1], [], []>} : vector<512x16xbf16>, vector<16x128xbf16>, vector<512x128xf32> -> vector<512x128xf32>
    %24 = arith.addf %19, %23 : vector<512x128xf32>
    %c0_20 = arith.constant 0 : index
    %c0_21 = arith.constant 0 : index
    %25 = vector.load %arg4[%c0_20, %c0_21] : memref<512x1xf32, #tpu.memory_space<vmem>>, vector<512x1xf32>
    %26 = vector.broadcast %25 : vector<512x1xf32> to vector<512x128xf32>
    %27 = arith.mulf %24, %26 : vector<512x128xf32>
    %cst_22 = arith.constant dense<0.000000e+00> : vector<128xf32>
    %28 = vector.multi_reduction <add>, %27, %cst_22 [0] : vector<512x128xf32> to vector<128xf32>
    %29 = vector.shape_cast %28 : vector<128xf32> to vector<1x128xf32>
    %30 = arith.mulf %24, %27 : vector<512x128xf32>
    %cst_23 = arith.constant dense<0.000000e+00> : vector<128xf32>
    %31 = vector.multi_reduction <add>, %30, %cst_23 [0] : vector<512x128xf32> to vector<128xf32>
    %32 = vector.shape_cast %31 : vector<128xf32> to vector<1x128xf32>
    %cst_24 = arith.constant 0.000000e+00 : f32
    %33 = vector.broadcast %cst_24 : f32 to vector<6x128xf32>
    %34 = tpu.concatenate %29, %32, %33 in 0 : vector<1x128xf32>, vector<1x128xf32>, vector<6x128xf32> -> vector<8x128xf32>
    %c0_25 = arith.constant 0 : index
    %c0_26 = arith.constant 0 : index
    %c0_27 = arith.constant 0 : index
    %35 = vector.load %arg5[%c0_25, %c0_26, %c0_27] : memref<1x8x128xf32, #tpu.memory_space<vmem>>, vector<1x8x128xf32>
    %36 = vector.shape_cast %35 : vector<1x8x128xf32> to vector<8x128xf32>
    %37 = vector.shape_cast %34 : vector<8x128xf32> to vector<1x8x128xf32>
    tpu.vector_store %arg5[%c0_25, %c0_26, %c0_27], %37 {strides = array<i32>} : memref<1x8x128xf32, #tpu.memory_space<vmem>>, vector<1x8x128xf32>,
    return
  }
  func.func @transform_0(%arg0: i32) -> (i32, i32) {
    %c0_i32 = arith.constant 0 : i32
    %c0_i32_0 = arith.constant 0 : i32
    return %arg0, %c0_i32 : i32, i32
  }
  func.func @transform_1(%arg0: i32) -> (i32, i32) {
    %c1_i32 = arith.constant 1 : i32
    %0 = arith.addi %arg0, %c1_i32 : i32
    %c0_i32 = arith.constant 0 : i32
    %c0_i32_0 = arith.constant 0 : i32
    return %0, %c0_i32 : i32, i32
  }
  func.func @transform_2(%arg0: i32) -> (i32, i32) {
    %c0_i32 = arith.constant 0 : i32
    %c0_i32_0 = arith.constant 0 : i32
    %c0_i32_1 = arith.constant 0 : i32
    return %c0_i32, %c0_i32_0 : i32, i32
  }
  func.func @transform_3(%arg0: i32) -> (i32, i32) {
    %c0_i32 = arith.constant 0 : i32
    %c0_i32_0 = arith.constant 0 : i32
    return %arg0, %c0_i32 : i32, i32
  }
  func.func @transform_4(%arg0: i32) -> (i32, i32, i32) {
    %c0_i32 = arith.constant 0 : i32
    %c0_i32_0 = arith.constant 0 : i32
    %c0_i32_1 = arith.constant 0 : i32
    return %arg0, %c0_i32, %c0_i32_0 : i32, i32, i32
  }
}

module attributes {stable_mosaic.version = 11 : i64} {
  func.func @_apply_kernel(%arg0: i32, %arg1: memref<512x16xf32, #tpu.memory_space<vmem>>, %arg2: memref<512x16xf32, #tpu.memory_space<vmem>>, %arg3: memref<64x128xbf16, #tpu.memory_space<vmem>>, %arg4: memref<1x128xf32, #tpu.memory_space<vmem>>, %arg5: memref<1x128xf32, #tpu.memory_space<vmem>>, %arg6: memref<512x128xf32, #tpu.memory_space<vmem>>, %arg7: memref<1024x16xf32, #tpu.memory_space<vmem>>) attributes {dimension_semantics = [#tpu.dimension_semantics<parallel>], iteration_bounds = array<i64: 2>, scalar_prefetch = 0 : i64, scratch_operands = 1 : i64, tpu.core_type = #tpu.core_type<tc>, window_params = [{transform_indices = @transform_0, window_bounds = array<i64: 512, 16>}, {transform_indices = @transform_1, window_bounds = array<i64: 512, 16>}, {pipeline_mode = #tpu.pipeline_mode<synchronous>, transform_indices = @transform_2, window_bounds = array<i64: 64, 128>}, {pipeline_mode = #tpu.pipeline_mode<synchronous>, transform_indices = @transform_3, window_bounds = array<i64: 1, 128>}, {pipeline_mode = #tpu.pipeline_mode<synchronous>, transform_indices = @transform_4, window_bounds = array<i64: 1, 128>}, {transform_indices = @transform_5, window_bounds = array<i64: 512, 128>}]} {
    %c0 = arith.constant 0 : index
    %c0_0 = arith.constant 0 : index
    %0 = vector.load %arg1[%c0, %c0_0] : memref<512x16xf32, #tpu.memory_space<vmem>>, vector<512x16xf32>
    %c0_1 = arith.constant 0 : index
    %c0_2 = arith.constant 0 : index
    %1 = vector.load %arg7[%c0_1, %c0_2] : memref<1024x16xf32, #tpu.memory_space<vmem>>, vector<512x16xf32>
    tpu.vector_store %arg7[%c0_1, %c0_2], %0 {strides = array<i32>} : memref<1024x16xf32, #tpu.memory_space<vmem>>, vector<512x16xf32>,
    %c0_3 = arith.constant 0 : index
    %c0_4 = arith.constant 0 : index
    %2 = vector.load %arg2[%c0_3, %c0_4] : memref<512x16xf32, #tpu.memory_space<vmem>>, vector<512x16xf32>
    %c512 = arith.constant 512 : index
    %c0_5 = arith.constant 0 : index
    %3 = vector.load %arg7[%c512, %c0_5] : memref<1024x16xf32, #tpu.memory_space<vmem>>, vector<512x16xf32>
    tpu.vector_store %arg7[%c512, %c0_5], %2 {strides = array<i32>} : memref<1024x16xf32, #tpu.memory_space<vmem>>, vector<512x16xf32>,
    %cst = arith.constant 0.000000e+00 : f32
    %4 = vector.broadcast %cst : f32 to vector<512x128xf32>
    %c0_6 = arith.constant 0 : index
    %c0_7 = arith.constant 0 : index
    %5 = vector.load %arg7[%c0_6, %c0_7] : memref<1024x16xf32, #tpu.memory_space<vmem>>, vector<512x16xf32>
    %6 = arith.truncf %5 : vector<512x16xf32> to vector<512x16xbf16>
    %c0_8 = arith.constant 0 : index
    %c0_9 = arith.constant 0 : index
    %7 = vector.load %arg3[%c0_8, %c0_9] : memref<64x128xbf16, #tpu.memory_space<vmem>>, vector<16x128xbf16>
    %cst_10 = arith.constant dense<0.000000e+00> : vector<512x128xf32>
    %8 = tpu.matmul %6, %7, %cst_10 {dimension_numbers = #tpu.dot_dimension_numbers<[1], [0], [0], [1], [0, 0, 1, 1], [], []>} : vector<512x16xbf16>, vector<16x128xbf16>, vector<512x128xf32> -> vector<512x128xf32>
    %9 = arith.addf %4, %8 : vector<512x128xf32>
    %c20 = arith.constant 20 : index
    %c0_11 = arith.constant 0 : index
    %10 = vector.load %arg7[%c20, %c0_11] : memref<1024x16xf32, #tpu.memory_space<vmem>>, vector<512x16xf32>
    %11 = arith.truncf %10 : vector<512x16xf32> to vector<512x16xbf16>
    %c16 = arith.constant 16 : index
    %c0_12 = arith.constant 0 : index
    %12 = vector.load %arg3[%c16, %c0_12] : memref<64x128xbf16, #tpu.memory_space<vmem>>, vector<16x128xbf16>
    %cst_13 = arith.constant dense<0.000000e+00> : vector<512x128xf32>
    %13 = tpu.matmul %11, %12, %cst_13 {dimension_numbers = #tpu.dot_dimension_numbers<[1], [0], [0], [1], [0, 0, 1, 1], [], []>} : vector<512x16xbf16>, vector<16x128xbf16>, vector<512x128xf32> -> vector<512x128xf32>
    %14 = arith.addf %9, %13 : vector<512x128xf32>
    %c40 = arith.constant 40 : index
    %c0_14 = arith.constant 0 : index
    %15 = vector.load %arg7[%c40, %c0_14] : memref<1024x16xf32, #tpu.memory_space<vmem>>, vector<512x16xf32>
    %16 = arith.truncf %15 : vector<512x16xf32> to vector<512x16xbf16>
    %c32 = arith.constant 32 : index
    %c0_15 = arith.constant 0 : index
    %17 = vector.load %arg3[%c32, %c0_15] : memref<64x128xbf16, #tpu.memory_space<vmem>>, vector<16x128xbf16>
    %cst_16 = arith.constant dense<0.000000e+00> : vector<512x128xf32>
    %18 = tpu.matmul %16, %17, %cst_16 {dimension_numbers = #tpu.dot_dimension_numbers<[1], [0], [0], [1], [0, 0, 1, 1], [], []>} : vector<512x16xbf16>, vector<16x128xbf16>, vector<512x128xf32> -> vector<512x128xf32>
    %19 = arith.addf %14, %18 : vector<512x128xf32>
    %c60 = arith.constant 60 : index
    %c0_17 = arith.constant 0 : index
    %20 = vector.load %arg7[%c60, %c0_17] : memref<1024x16xf32, #tpu.memory_space<vmem>>, vector<512x16xf32>
    %21 = arith.truncf %20 : vector<512x16xf32> to vector<512x16xbf16>
    %c48 = arith.constant 48 : index
    %c0_18 = arith.constant 0 : index
    %22 = vector.load %arg3[%c48, %c0_18] : memref<64x128xbf16, #tpu.memory_space<vmem>>, vector<16x128xbf16>
    %cst_19 = arith.constant dense<0.000000e+00> : vector<512x128xf32>
    %23 = tpu.matmul %21, %22, %cst_19 {dimension_numbers = #tpu.dot_dimension_numbers<[1], [0], [0], [1], [0, 0, 1, 1], [], []>} : vector<512x16xbf16>, vector<16x128xbf16>, vector<512x128xf32> -> vector<512x128xf32>
    %24 = arith.addf %19, %23 : vector<512x128xf32>
    %c0_20 = arith.constant 0 : index
    %c0_21 = arith.constant 0 : index
    %25 = vector.load %arg4[%c0_20, %c0_21] : memref<1x128xf32, #tpu.memory_space<vmem>>, vector<1x128xf32>
    %26 = vector.broadcast %25 : vector<1x128xf32> to vector<512x128xf32>
    %27 = arith.mulf %24, %26 : vector<512x128xf32>
    %c0_22 = arith.constant 0 : index
    %c0_23 = arith.constant 0 : index
    %28 = vector.load %arg5[%c0_22, %c0_23] : memref<1x128xf32, #tpu.memory_space<vmem>>, vector<1x128xf32>
    %29 = vector.broadcast %28 : vector<1x128xf32> to vector<512x128xf32>
    %30 = arith.addf %27, %29 : vector<512x128xf32>
    %cst_24 = arith.constant 0.000000e+00 : f32
    %31 = vector.broadcast %cst_24 : f32 to vector<512x128xf32>
    %32 = arith.maximumf %30, %31 : vector<512x128xf32>
    %c0_25 = arith.constant 0 : index
    %c0_26 = arith.constant 0 : index
    %33 = vector.load %arg6[%c0_25, %c0_26] : memref<512x128xf32, #tpu.memory_space<vmem>>, vector<512x128xf32>
    tpu.vector_store %arg6[%c0_25, %c0_26], %32 {strides = array<i32>} : memref<512x128xf32, #tpu.memory_space<vmem>>, vector<512x128xf32>,
    return
  }
  func.func @transform_0(%arg0: i32) -> (i32, i32) {
    %c0_i32 = arith.constant 0 : i32
    %c0_i32_0 = arith.constant 0 : i32
    return %arg0, %c0_i32 : i32, i32
  }
  func.func @transform_1(%arg0: i32) -> (i32, i32) {
    %c1_i32 = arith.constant 1 : i32
    %0 = arith.addi %arg0, %c1_i32 : i32
    %c0_i32 = arith.constant 0 : i32
    %c0_i32_0 = arith.constant 0 : i32
    return %0, %c0_i32 : i32, i32
  }
  func.func @transform_2(%arg0: i32) -> (i32, i32) {
    %c0_i32 = arith.constant 0 : i32
    %c0_i32_0 = arith.constant 0 : i32
    %c0_i32_1 = arith.constant 0 : i32
    return %c0_i32, %c0_i32_0 : i32, i32
  }
  func.func @transform_3(%arg0: i32) -> (i32, i32) {
    %c0_i32 = arith.constant 0 : i32
    %c0_i32_0 = arith.constant 0 : i32
    %c0_i32_1 = arith.constant 0 : i32
    return %c0_i32, %c0_i32_0 : i32, i32
  }
  func.func @transform_4(%arg0: i32) -> (i32, i32) {
    %c0_i32 = arith.constant 0 : i32
    %c0_i32_0 = arith.constant 0 : i32
    %c0_i32_1 = arith.constant 0 : i32
    return %c0_i32, %c0_i32_0 : i32, i32
  }
  func.func @transform_5(%arg0: i32) -> (i32, i32) {
    %c0_i32 = arith.constant 0 : i32
    %c0_i32_0 = arith.constant 0 : i32
    return %arg0, %c0_i32 : i32, i32
  }
}

</mosaic_0001>

<bundles_post_ra>
// kernel: decnr2d_forward.3
= control target key start
LH: loop header
LB: loop body
LE: loop exit
PB: predicated region body
PF: predicated region fallthrough
CT: control target
= control target key end

     0   :  { %s2666_s18 = smov 0   ;;  %s3557_s0 = inlined_call_operand.vmem [shape: f32[1536,16], index: 0, kind: input, shape index: {}, may-alias: {0,1}]   ;;  %s3558_s1 = inlined_call_operand.vmem [shape: f32[1536,16], index: 1, kind: input, shape index: {}, may-alias: {0,1}]   ;;  %s3559_s2 = inlined_call_operand.vmem [shape: bf16[64,128], index: 2, kind: input, shape index: {}]   ;;  %s3560_s3 = inlined_call_operand.vmem [shape: f32[1,128], index: 3, kind: input, shape index: {}]   ;;  %s3561_s4 = inlined_call_operand.vmem [shape: f32[1,128], index: 4, kind: input, shape index: {}]   ;;  %s3562_s5 = inlined_call_operand.vmem [shape: f32[1024,128], index: 5, kind: output, shape index: {}]  }
   0x1 LB: > { %s2451_s19 = sadd.s32 4294967295, %s2634_s18   ;;  %p2455_p0 = scmp.ge.s32.totalorder %s2634_s18, 1  ;;  %s2634_s18 = sphi %s2666_s18, %s15_s18  }
   0x2   : > { %p203_p1 = scmp.lt.s32.totalorder %s2634_s18, 3 }
   0x4   : > { %p204_p2 = pnand %p2455_p0, %p203_p1 }
   0x5   : > { %s2683_s26 = sshll.u32 (!%p204_p2), %s2451_s19, 6 }
   0x6   : > { %207 = sbr.rel (%p204_p2) target bundleno = 680 (0x2a8), region = 40  ;;  %p238_p3 = scmp.lt.s32.totalorder (!%p204_p2), %s2683_s26, 191 }
   0x7   : > { %p252_p4 = scmp.lt.s32.totalorder (!%p204_p2), %s2683_s26, 127  ;;  %s2609_s23 = sadd.s32 (!%p204_p2), 64, %s2683_s26 }
   0x8   : > { %p245_p5 = scmp.lt.s32.totalorder (!%p204_p2), %s2609_s23, 191 }
   0xb   : > { %v2611_v0 = vld [vmem:[%s3559_s2 + $0x8] sm:$0xff]  ;;  %v2610_v1 = vld [vmem:[%s3559_s2] sm:$0xff]  ;;  %v2612_v2 = vld [vmem:[%s3559_s2 + $0x10] sm:$0xff]  ;;  %s239_s29 = scalar_select %p238_p3, %s2683_s26, 191  ;;  %vm322_vm0 = vcmask 130048  }
   0xc   : > { %v2613_v3 = vld [vmem:[%s3559_s2 + $0x18] sm:$0xff]  ;;  %820 = vmatpush.bf16.msra.mxu0 %v2611_v0  ;;  %1091 = vmatpush.bf16.msra.mxu1 %v2610_v1  ;;  %s253_s9 = scalar_select %p252_p4, %s2683_s26, 127 }
   0xd   : > { %1460 = vmatpush.bf16.msra.mxu2 %v2612_v2  ;;  %1893 = vmatpush.bf16.msra.mxu3 %v2613_v3  ;;  %s2457_s30 = sshll.u32 %s239_s29, 3  ;;  %s3564_s23 = smov (!%p245_p5, %s2609_s23), 191 }
   0xe   : > { %s2693_s8 = scalar_lea.vmem %s3557_s0, %s2457_s30  ;;  %s2461_s14 = sshll.u32 %s253_s9, 3 }
   0xf   : > { %v260_v4 = vld [vmem:[%s2693_s8 + $0x10] sm:$0xff]  ;;  %v261_v5 = vld [vmem:[%s2693_s8 + $0x18] sm:$0xff]  ;;  %v262_v6 = vld [vmem:[%s2693_s8 + $0x20] sm:$0xff]  ;;  %s2846_s17 = scalar_lea.vmem %s3562_s5, %s2461_s14  ;;  %s2459_s24 = sshll.u32 %s3564_s23, 3 }
  0x10   : > { %325 = vst.msk [vmem:[#allocation2 + $0x10] sm:$0xff] %vm322_vm0, %v260_v4  ;;  %v258_v7 = vld [vmem:[%s2693_s8] sm:$0xff]  ;;  %v259_v8 = vld [vmem:[%s2693_s8 + $0x8] sm:$0xff]  ;;  %v264_v10 = vld [vmem:[%s2693_s8 + $0x30] sm:$0xff]  ;;  %s3357_s27 = scalar_lea.vmem %s3558_s1, %s2459_s24 }
  0x11   : > { %326 = vst.msk [vmem:[#allocation2 + $0x18] sm:$0xff] %vm322_vm0, %v261_v5  ;;  %v263_v9 = vld [vmem:[%s2693_s8 + $0x28] sm:$0xff]  ;;  %v265_v11 = vld [vmem:[%s2693_s8 + $0x38] sm:$0xff]  ;;  %v266_v12 = vld [vmem:[%s2693_s8 + $0x40] sm:$0xff] }
  0x12   : > { %327 = vst.msk [vmem:[#allocation2 + $0x20] sm:$0xff] %vm322_vm0, %v262_v6  ;;  %v267_v13 = vld [vmem:[%s2693_s8 + $0x48] sm:$0xff]  ;;  %v268_v14 = vld [vmem:[%s2693_s8 + $0x50] sm:$0xff]  ;;  %v269_v16 = vld [vmem:[%s2693_s8 + $0x58] sm:$0xff] }
  0x13   : > { %323 = vst.msk [vmem:[#allocation2] sm:$0xff] %vm322_vm0, %v258_v7  ;;  %v270_v18 = vld [vmem:[%s2693_s8 + $0x60] sm:$0xff]  ;;  %v271_v21 = vld [vmem:[%s2693_s8 + $0x68] sm:$0xff]  ;;  %v272_v35 = vld [vmem:[%s2693_s8 + $0x70] sm:$0xff] }
  0x14   : > { %324 = vst.msk [vmem:[#allocation2 + $0x8] sm:$0xff] %vm322_vm0, %v259_v8  ;;  %v273_v36 = vld [vmem:[%s2693_s8 + $0x78] sm:$0xff]  ;;  %v274_v47 = vld [vmem:[%s2693_s8 + $0x80] sm:$0xff]  ;;  %v275_v48 = vld [vmem:[%s2693_s8 + $0x88] sm:$0xff] }
  0x15   : > { %328 = vst.msk [vmem:[#allocation2 + $0x28] sm:$0xff] %vm322_vm0, %v263_v9  ;;  %v276_v57 = vld [vmem:[%s2693_s8 + $0x90] sm:$0xff]  ;;  %v277_v58 = vld [vmem:[%s2693_s8 + $0x98] sm:$0xff]  ;;  %v278_v3 = vld [vmem:[%s2693_s8 + $0xa0] sm:$0xff] }
  0x16   : > { %329 = vst.msk [vmem:[#allocation2 + $0x30] sm:$0xff] %vm322_vm0, %v264_v10  ;;  %v279_v4 = vld [vmem:[%s2693_s8 + $0xa8] sm:$0xff] }
  0x17   : > { %330 = vst.msk [vmem:[#allocation2 + $0x38] sm:$0xff] %vm322_vm0, %v265_v11  ;;  %v517_v32 = vld [vmem:[#allocation2 + $0x10] sm:$0xff] }
  0x18   : > { %v613_v15 = vld [vmem:[#allocation2 + $0x14] sm:$0xff]  ;;  %331 = vst.msk [vmem:[#allocation2 + $0x40] sm:$0xff] %vm322_vm0, %v266_v12 }
  0x19   : > { %v614_v17 = vld [vmem:[#allocation2 + $0x1c] sm:$0xff]  ;;  %332 = vst.msk [vmem:[#allocation2 + $0x48] sm:$0xff] %vm322_vm0, %v267_v13  ;;  %v280_v13 = vld [vmem:[%s2693_s8 + $0xb0] sm:$0xff] }
  0x1a   : > { %v677_v19 = vpack.c.bf16 %v614_v17, %v613_v15  ;;  %v515_v20 = vld [vmem:[#allocation2] sm:$0xff]  ;;  %333 = vst.msk [vmem:[#allocation2 + $0x50] sm:$0xff] %vm322_vm0, %v268_v14  ;;  %v518_v33 = vld [vmem:[#allocation2 + $0x18] sm:$0xff] }
  0x1b   : > { %v516_v22 = vld [vmem:[#allocation2 + $0x8] sm:$0xff]  ;;  %334 = vst.msk [vmem:[#allocation2 + $0x58] sm:$0xff] %vm322_vm0, %v269_v16  ;;  %v580_v39 = vpack.c.bf16 %v518_v33, %v517_v32  ;;  %v519_v45 = vld [vmem:[#allocation2 + $0x20] sm:$0xff]  ;;  %v281_v14 = vld [vmem:[%s2693_s8 + $0xb8] sm:$0xff] }
  0x1c   : > { %2466 = vmatmul.msk.bf16.vlgmr.msra.gmra.mxu0 %vm322_vm0, %v677_v19  ;;  %v579_v23 = vpack.c.bf16 %v516_v22, %v515_v20  ;;  %v1253_v24 = vld [vmem:[#allocation2 + $0x28] sm:$0xff]  ;;  %335 = vst.msk [vmem:[#allocation2 + $0x60] sm:$0xff] %vm322_vm0, %v270_v18  ;;  %v284_v33 = vld [vmem:[%s2693_s8 + $0xd0] sm:$0xff] }
  0x1d   : > { %v1254_v25 = vld [vmem:[#allocation2 + $0x30] sm:$0xff]  ;;  %336 = vst.msk [vmem:[#allocation2 + $0x68] sm:$0xff] %vm322_vm0, %v271_v21  ;;  %v615_v30 = vld [vmem:[#allocation2 + $0x24] sm:$0xff]  ;;  %v581_v51 = vpack.c.bf16 %v1253_v24, %v519_v45 }
  0x1e   : > { %2502 = vmatmul.msk.bf16.vlgmr.msra.gmra.mxu1 %vm322_vm0, %v579_v23  ;;  %v1317_v26 = vpack.c.bf16 %v1254_v25, %v1253_v24  ;;  %v616_v31 = vld [vmem:[#allocation2 + $0x2c] sm:$0xff]  ;;  %v1255_v37 = vld [vmem:[#allocation2 + $0x38] sm:$0xff]  ;;  %337 = vst.msk [vmem:[#allocation2 + $0x70] sm:$0xff] %vm322_vm0, %v272_v35  ;;  %v282_v23 = vld [vmem:[%s2693_s8 + $0xc0] sm:$0xff] }
  0x1f   : > { %v1686_v27 = vld [vmem:[#allocation2 + $0x3c] sm:$0xff]  ;;  %v678_v34 = vpack.c.bf16 %v616_v31, %v615_v30  ;;  %338 = vst.msk [vmem:[#allocation2 + $0x78] sm:$0xff] %vm322_vm0, %v273_v36  ;;  %v617_v44 = vld [vmem:[#allocation2 + $0x34] sm:$0xff]  ;;  %v582_v61 = vpack.c.bf16 %v1255_v37, %v1254_v25  ;;  %v283_v24 = vld [vmem:[%s2693_s8 + $0xc8] sm:$0xff] }
  0x20   : > { %2538 = vmatmul.msk.bf16.vlgmr.msra.gmra.mxu2 %vm322_vm0, %v1317_v26  ;;  %v1687_v28 = vld [vmem:[#allocation2 + $0x44] sm:$0xff]  ;;  %v679_v46 = vpack.c.bf16 %v1686_v27, %v617_v44  ;;  %339 = vst.msk [vmem:[#allocation2 + $0x80] sm:$0xff] %vm322_vm0, %v274_v47 }
  0x21   : > { %v1750_v29 = vpack.c.bf16 %v1687_v28, %v1686_v27  ;;  %v1256_v38 = vld [vmem:[#allocation2 + $0x40] sm:$0xff]  ;;  %v1688_v41 = vld [vmem:[#allocation2 + $0x4c] sm:$0xff]  ;;  %340 = vst.msk [vmem:[#allocation2 + $0x88] sm:$0xff] %vm322_vm0, %v275_v48 }
  0x22   : > { %v1318_v40 = vpack.c.bf16 %v1256_v38, %v1255_v37  ;;  %v1689_v42 = vld [vmem:[#allocation2 + $0x54] sm:$0xff]  ;;  %v1257_v49 = vld [vmem:[#allocation2 + $0x48] sm:$0xff]  ;;  %v680_v56 = vpack.c.bf16 %v1688_v41, %v1687_v28  ;;  %341 = vst.msk [vmem:[#allocation2 + $0x90] sm:$0xff] %vm322_vm0, %v276_v57 }
  0x23   : > { %2574 = vmatmul.msk.bf16.vlgmr.msra.gmra.mxu3 %vm322_vm0, %v1750_v29  ;;  %v1751_v43 = vpack.c.bf16 %v1689_v42, %v1688_v41  ;;  %v1258_v50 = vld [vmem:[#allocation2 + $0x50] sm:$0xff]  ;;  %v1690_v53 = vld [vmem:[#allocation2 + $0x5c] sm:$0xff]  ;;  %342 = vst.msk [vmem:[#allocation2 + $0x98] sm:$0xff] %vm322_vm0, %v277_v58  ;;  %v583_v7 = vpack.c.bf16 %v1257_v49, %v1256_v38  ;;  %v287_v44 = vld [vmem:[%s2693_s8 + $0xe8] sm:$0xff] }
  0x24   : > { %v1319_v52 = vpack.c.bf16 %v1258_v50, %v1257_v49  ;;  %v1691_v54 = vld [vmem:[#allocation2 + $0x64] sm:$0xff]  ;;  %v1259_v59 = vld [vmem:[#allocation2 + $0x58] sm:$0xff]  ;;  %v681_v2 = vpack.c.bf16 %v1690_v53, %v1689_v42  ;;  %343 = vst.msk [vmem:[#allocation2 + $0xa0] sm:$0xff] %vm322_vm0, %v278_v3 }
  0x25   : > { %v1752_v55 = vpack.c.bf16 %v1691_v54, %v1690_v53  ;;  %v1260_v60 = vld [vmem:[#allocation2 + $0x60] sm:$0xff]  ;;  %v1692_v63 = vld [vmem:[#allocation2 + $0x6c] sm:$0xff]  ;;  %344 = vst.msk [vmem:[#allocation2 + $0xa8] sm:$0xff] %vm322_vm0, %v279_v4  ;;  %v584_v17 = vpack.c.bf16 %v1259_v59, %v1258_v50 }
  0x26   : > { %v1320_v62 = vpack.c.bf16 %v1260_v60, %v1259_v59  ;;  %v1693_v0 = vld [vmem:[#allocation2 + $0x74] sm:$0xff]  ;;  %v1261_v5 = vld [vmem:[#allocation2 + $0x68] sm:$0xff]  ;;  %v682_v12 = vpack.c.bf16 %v1692_v63, %v1691_v54  ;;  %345 = vst.msk [vmem:[#allocation2 + $0xb0] sm:$0xff] %vm322_vm0, %v280_v13  ;;  %v2823_v59 = vld [vmem:[%s3560_s3] ss:$0 sm:$0xff] }
  0x27   : > { %v1753_v1 = vpack.c.bf16 %v1693_v0, %v1692_v63  ;;  %v1262_v6 = vld [vmem:[#allocation2 + $0x70] sm:$0xff]  ;;  %v1694_v9 = vld [vmem:[#allocation2 + $0x7c] sm:$0xff]  ;;  %346 = vst.msk [vmem:[#allocation2 + $0xb8] sm:$0xff] %vm322_vm0, %v281_v14  ;;  %v585_v27 = vpack.c.bf16 %v1261_v5, %v1260_v60 }
  0x28   : > { %v1321_v8 = vpack.c.bf16 %v1262_v6, %v1261_v5  ;;  %v1695_v10 = vld [vmem:[#allocation2 + $0x84] sm:$0xff]  ;;  %v1263_v15 = vld [vmem:[#allocation2 + $0x78] sm:$0xff]  ;;  %v683_v22 = vpack.c.bf16 %v1694_v9, %v1693_v0  ;;  %347 = vst.msk [vmem:[#allocation2 + $0xc0] sm:$0xff] %vm322_vm0, %v282_v23  ;;  %v288_v0 = vld [vmem:[%s2693_s8 + $0xf0] sm:$0xff] }
  0x29   : > { %v1754_v11 = vpack.c.bf16 %v1695_v10, %v1694_v9  ;;  %v1264_v16 = vld [vmem:[#allocation2 + $0x80] sm:$0xff]  ;;  %v1696_v19 = vld [vmem:[#allocation2 + $0x8c] sm:$0xff]  ;;  %348 = vst.msk [vmem:[#allocation2 + $0xc8] sm:$0xff] %vm322_vm0, %v283_v24  ;;  %v586_v37 = vpack.c.bf16 %v1263_v15, %v1262_v6 }
  0x2a   : > { %v1322_v18 = vpack.c.bf16 %v1264_v16, %v1263_v15  ;;  %v1697_v20 = vld [vmem:[#allocation2 + $0x94] sm:$0xff]  ;;  %v1265_v25 = vld [vmem:[#allocation2 + $0x88] sm:$0xff]  ;;  %v684_v32 = vpack.c.bf16 %v1696_v19, %v1695_v10  ;;  %349 = vst.msk [vmem:[#allocation2 + $0xd0] sm:$0xff] %vm322_vm0, %v284_v33 }
  0x2b   : > { %v1755_v21 = vpack.c.bf16 %v1697_v20, %v1696_v19  ;;  %v2769_v26 = vld [vmem:[#allocation2 + $0x90] sm:$0xff]  ;;  %v1698_v29 = vld [vmem:[#allocation2 + $0x9c] sm:$0xff]  ;;  %v587_v48 = vpack.c.bf16 %v1265_v25, %v1264_v16  ;;  %352 = vst.msk [vmem:[#allocation2 + $0xe8] sm:$0xff] %vm322_vm0, %v287_v44 }
  0x2c   : > { %2467 = vmatmul.msk.bf16.gmra.mxu0 %vm322_vm0, %v678_v34  ;;  %v1323_v28 = vpack.c.bf16 %v2769_v26, %v1265_v25  ;;  %v2775_v30 = vld [vmem:[#allocation2 + $0xa4] sm:$0xff]  ;;  %v285_v34 = vld [vmem:[%s2693_s8 + $0xd8] sm:$0xff]  ;;  %v685_v42 = vpack.c.bf16 %v1698_v29, %v1697_v20  ;;  %353 = vst.msk [vmem:[#allocation2 + $0xf0] sm:$0xff] %vm322_vm0, %v288_v0  ;;  %v292_v0 = vld [vmem:[%s2693_s8 + $0x110] sm:$0xff] }
  0x2d   : > { %v1756_v31 = vpack.c.bf16 %v2775_v30, %v1698_v29  ;;  %v2783_v35 = vld [vmem:[#allocation2 + $0x98] sm:$0xff]  ;;  %v2785_v36 = vld [vmem:[#allocation2 + $0xa0] sm:$0xff]  ;;  %350 = vst.msk [vmem:[#allocation2 + $0xd8] sm:$0xff] %vm322_vm0, %v285_v34  ;;  %v2802_v47 = vld [vmem:[#allocation2 + $0xb0] sm:$0xff] }
  0x2e   : > { %2503 = vmatmul.msk.bf16.gmra.mxu1 %vm322_vm0, %v580_v39  ;;  %v1324_v38 = vpack.c.bf16 %v2785_v36, %v2783_v35  ;;  %v1700_v39 = vld [vmem:[#allocation2 + $0xac] sm:$0xff]  ;;  %v2834_v4 = vld [vmem:[#allocation2 + $0xb8] sm:$0xff]  ;;  %357 = vst.msk [vmem:[#allocation2 + $0x110] sm:$0xff] %vm322_vm0, %v292_v0 }
  0x2f   : > { %v686_v63 = vpack.c.bf16 %v1700_v39, %v2775_v30  ;;  %v2836_v5 = vld [vmem:[#allocation2 + $0xc0] sm:$0xff]  ;;  %v296_v0 = vld [vmem:[%s2693_s8 + $0x130] sm:$0xff] }
  0x30   : > { %2539 = vmatmul.msk.bf16.gmra.mxu2 %vm322_vm0, %v1318_v40  ;;  %v2792_v40 = vld [vmem:[#allocation2 + $0xb4] sm:$0xff]  ;;  %v290_v30 = vld [vmem:[%s2693_s8 + $0x100] sm:$0xff]  ;;  %v2869_v34 = vld [vmem:[#allocation2 + $0xc8] sm:$0xff]  ;;  %361 = vst.msk [vmem:[#allocation2 + $0x130] sm:$0xff] %vm322_vm0, %v296_v0 }
  0x31   : > { %v1757_v41 = vpack.c.bf16 %v2792_v40, %v1700_v39  ;;  %v2851_v13 = vld [vmem:[#allocation2 + $0xcc] sm:$0xff]  ;;  %355 = vst.msk [vmem:[#allocation2 + $0x100] sm:$0xff] %vm322_vm0, %v290_v30  ;;  %v294_v30 = vld [vmem:[%s2693_s8 + $0x120] sm:$0xff] }
  0x32   : > { %359 = vst.msk [vmem:[#allocation2 + $0x120] sm:$0xff] %vm322_vm0, %v294_v30  ;;  %v298_v30 = vld [vmem:[%s2693_s8 + $0x140] sm:$0xff]  ;;  %v300_v0 = vld [vmem:[%s2693_s8 + $0x150] sm:$0xff] }
  0x33   : > { %2575 = vmatmul.msk.bf16.gmra.mxu3 %vm322_vm0, %v1751_v43  ;;  %v286_v43 = vld [vmem:[%s2693_s8 + $0xe0] sm:$0xff]  ;;  %363 = vst.msk [vmem:[#allocation2 + $0x140] sm:$0xff] %vm322_vm0, %v298_v30 }
  0x34   : > { %351 = vst.msk [vmem:[#allocation2 + $0xe0] sm:$0xff] %vm322_vm0, %v286_v43  ;;  %v2853_v14 = vld [vmem:[#allocation2 + $0xd4] sm:$0xff]  ;;  %v302_v30 = vld [vmem:[%s2693_s8 + $0x160] sm:$0xff] }
  0x35   : > { %365 = vst.msk [vmem:[#allocation2 + $0x150] sm:$0xff] %vm322_vm0, %v300_v0  ;;  %v304_v0 = vld [vmem:[%s2693_s8 + $0x170] sm:$0xff] }
  0x36   : > { %367 = vst.msk [vmem:[#allocation2 + $0x160] sm:$0xff] %vm322_vm0, %v302_v30  ;;  %v306_v30 = vld [vmem:[%s2693_s8 + $0x180] sm:$0xff] }
  0x37   : > { %369 = vst.msk [vmem:[#allocation2 + $0x170] sm:$0xff] %vm322_vm0, %v304_v0  ;;  %v308_v0 = vld [vmem:[%s2693_s8 + $0x190] sm:$0xff] }
  0x38   : > { %371 = vst.msk [vmem:[#allocation2 + $0x180] sm:$0xff] %vm322_vm0, %v306_v30  ;;  %v310_v30 = vld [vmem:[%s2693_s8 + $0x1a0] sm:$0xff] }
  0x39   : > { %373 = vst.msk [vmem:[#allocation2 + $0x190] sm:$0xff] %vm322_vm0, %v308_v0  ;;  %v312_v0 = vld [vmem:[%s2693_s8 + $0x1b0] sm:$0xff] }
  0x3a   : > { %375 = vst.msk [vmem:[#allocation2 + $0x1a0] sm:$0xff] %vm322_vm0, %v310_v30  ;;  %v314_v30 = vld [vmem:[%s2693_s8 + $0x1c0] sm:$0xff] }
  0x3b   : > { %v2881_v44 = vld [vmem:[#allocation2 + $0xdc] sm:$0xff]  ;;  %377 = vst.msk [vmem:[#allocation2 + $0x1b0] sm:$0xff] %vm322_vm0, %v312_v0  ;;  %v316_v0 = vld [vmem:[%s2693_s8 + $0x1d0] sm:$0xff] }
  0x3c   : > { %2468 = vmatmul.msk.bf16.gmra.mxu0 %vm322_vm0, %v679_v46  ;;  %v2800_v46 = vld [vmem:[#allocation2 + $0xa8] sm:$0xff]  ;;  %379 = vst.msk [vmem:[#allocation2 + $0x1c0] sm:$0xff] %vm322_vm0, %v314_v30  ;;  %v318_v30 = vld [vmem:[%s2693_s8 + $0x1e0] sm:$0xff] }
  0x3d   : > { %v1325_v50 = vpack.c.bf16 %v2802_v47, %v2800_v46  ;;  %381 = vst.msk [vmem:[#allocation2 + $0x1d0] sm:$0xff] %vm322_vm0, %v316_v0  ;;  %v320_v0 = vld [vmem:[%s2693_s8 + $0x1f0] sm:$0xff] }
  0x3e   : > { %2504 = vmatmul.msk.bf16.gmra.mxu1 %vm322_vm0, %v581_v51  ;;  %v2809_v51 = vld [vmem:[#allocation2 + $0xbc] sm:$0xff]  ;;  %383 = vst.msk [vmem:[#allocation2 + $0x1e0] sm:$0xff] %vm322_vm0, %v318_v30 }
  0x3f   : > { %v687_v29 = vpack.c.bf16 %v2809_v51, %v2792_v40  ;;  %385 = vst.msk [vmem:[#allocation2 + $0x1f0] sm:$0xff] %vm322_vm0, %v320_v0  ;;  %v387_v30 = vld [vmem:[%s3357_s27] sm:$0xff] }
  0x40   : > { %2540 = vmatmul.msk.bf16.gmra.mxu2 %vm322_vm0, %v1319_v52  ;;  %v2811_v52 = vld [vmem:[#allocation2 + $0xc4] sm:$0xff]  ;;  %451 = vst.msk [vmem:[#allocation2 + $0x200] sm:$0xff] %vm322_vm0, %v387_v30 }
  0x41   : > { %v1758_v53 = vpack.c.bf16 %v2811_v52, %v2809_v51 }
  0x43   : > { %2576 = vmatmul.msk.bf16.gmra.mxu3 %vm322_vm0, %v1752_v55 }
  0x4c   : > { %2469 = vmatmul.msk.bf16.gmra.mxu0 %vm322_vm0, %v680_v56 }
  0x4e   : > { %2505 = vmatmul.msk.bf16.gmra.mxu1 %vm322_vm0, %v582_v61 }
  0x50   : > { %2541 = vmatmul.msk.bf16.gmra.mxu2 %vm322_vm0, %v1320_v62  ;;  %v2828_v62 = vld [vmem:[%s3561_s4] ss:$0 sm:$0xff] }
  0x53   : > { %2577 = vmatmul.msk.bf16.gmra.mxu3 %vm322_vm0, %v1753_v1  ;;  %v289_v1 = vld [vmem:[%s2693_s8 + $0xf8] sm:$0xff] }
  0x54   : > { %354 = vst.msk [vmem:[#allocation2 + $0xf8] sm:$0xff] %vm322_vm0, %v289_v1  ;;  %v293_v1 = vld [vmem:[%s2693_s8 + $0x118] sm:$0xff] }
  0x55   : > { %358 = vst.msk [vmem:[#allocation2 + $0x118] sm:$0xff] %vm322_vm0, %v293_v1  ;;  %v297_v1 = vld [vmem:[%s2693_s8 + $0x138] sm:$0xff] }
  0x56   : > { %362 = vst.msk [vmem:[#allocation2 + $0x138] sm:$0xff] %vm322_vm0, %v297_v1  ;;  %v301_v1 = vld [vmem:[%s2693_s8 + $0x158] sm:$0xff] }
  0x57   : > { %366 = vst.msk [vmem:[#allocation2 + $0x158] sm:$0xff] %vm322_vm0, %v301_v1  ;;  %v305_v1 = vld [vmem:[%s2693_s8 + $0x178] sm:$0xff] }
  0x58   : > { %370 = vst.msk [vmem:[#allocation2 + $0x178] sm:$0xff] %vm322_vm0, %v305_v1  ;;  %v309_v1 = vld [vmem:[%s2693_s8 + $0x198] sm:$0xff] }
  0x59   : > { %374 = vst.msk [vmem:[#allocation2 + $0x198] sm:$0xff] %vm322_vm0, %v309_v1  ;;  %v313_v1 = vld [vmem:[%s2693_s8 + $0x1b8] sm:$0xff] }
  0x5a   : > { %378 = vst.msk [vmem:[#allocation2 + $0x1b8] sm:$0xff] %vm322_vm0, %v313_v1  ;;  %v317_v1 = vld [vmem:[%s2693_s8 + $0x1d8] sm:$0xff] }
  0x5b   : > { %382 = vst.msk [vmem:[#allocation2 + $0x1d8] sm:$0xff] %vm322_vm0, %v317_v1  ;;  %v321_v1 = vld [vmem:[%s2693_s8 + $0x1f8] sm:$0xff] }
  0x5c   : > { %2470 = vmatmul.msk.bf16.gmra.mxu0 %vm322_vm0, %v681_v2  ;;  %386 = vst.msk [vmem:[#allocation2 + $0x1f8] sm:$0xff] %vm322_vm0, %v321_v1 }
  0x5e   : > { %2506 = vmatmul.msk.bf16.gmra.mxu1 %vm322_vm0, %v583_v7  ;;  %v588_v7 = vpack.c.bf16 %v2783_v35, %v2769_v26  ;;  %v2871_v35 = vld [vmem:[#allocation2 + $0xd0] sm:$0xff] }
  0x5f   : > { %v1327_v43 = vpack.c.bf16 %v2871_v35, %v2869_v34 }
  0x60   : > { %2542 = vmatmul.msk.bf16.gmra.mxu2 %vm322_vm0, %v1321_v8 }
  0x63   : > { %2578 = vmatmul.msk.bf16.gmra.mxu3 %vm322_vm0, %v1754_v11 }
  0x6c   : > { %2471 = vmatmul.msk.bf16.gmra.mxu0 %vm322_vm0, %v682_v12  ;;  %v1326_v12 = vpack.c.bf16 %v2836_v5, %v2834_v4 }
  0x6e   : > { %2507 = vmatmul.msk.bf16.gmra.mxu1 %vm322_vm0, %v584_v17 }
  0x70   : > { %2543 = vmatmul.msk.bf16.gmra.mxu2 %vm322_vm0, %v1322_v18  ;;  %v1759_v18 = vpack.c.bf16 %v2853_v14, %v2851_v13 }
  0x73   : > { %2579 = vmatmul.msk.bf16.gmra.mxu3 %vm322_vm0, %v1755_v21 }
  0x7c   : > { %2472 = vmatmul.msk.bf16.gmra.mxu0 %vm322_vm0, %v683_v22 }
  0x7e   : > { %2508 = vmatmul.msk.bf16.gmra.mxu1 %vm322_vm0, %v585_v27 }
  0x80   : > { %2544 = vmatmul.msk.bf16.gmra.mxu2 %vm322_vm0, %v1323_v28 }
  0x83   : > { %2580 = vmatmul.msk.bf16.gmra.mxu3 %vm322_vm0, %v1756_v31  ;;  %v291_v31 = vld [vmem:[%s2693_s8 + $0x108] sm:$0xff] }
  0x84   : > { %356 = vst.msk [vmem:[#allocation2 + $0x108] sm:$0xff] %vm322_vm0, %v291_v31  ;;  %v295_v31 = vld [vmem:[%s2693_s8 + $0x128] sm:$0xff] }
  0x85   : > { %360 = vst.msk [vmem:[#allocation2 + $0x128] sm:$0xff] %vm322_vm0, %v295_v31  ;;  %v299_v31 = vld [vmem:[%s2693_s8 + $0x148] sm:$0xff] }
  0x86   : > { %364 = vst.msk [vmem:[#allocation2 + $0x148] sm:$0xff] %vm322_vm0, %v299_v31  ;;  %v303_v31 = vld [vmem:[%s2693_s8 + $0x168] sm:$0xff] }
  0x87   : > { %368 = vst.msk [vmem:[#allocation2 + $0x168] sm:$0xff] %vm322_vm0, %v303_v31  ;;  %v307_v31 = vld [vmem:[%s2693_s8 + $0x188] sm:$0xff] }
  0x88   : > { %372 = vst.msk [vmem:[#allocation2 + $0x188] sm:$0xff] %vm322_vm0, %v307_v31  ;;  %v311_v31 = vld [vmem:[%s2693_s8 + $0x1a8] sm:$0xff] }
  0x89   : > { %376 = vst.msk [vmem:[#allocation2 + $0x1a8] sm:$0xff] %vm322_vm0, %v311_v31  ;;  %v315_v31 = vld [vmem:[%s2693_s8 + $0x1c8] sm:$0xff] }
  0x8a   : > { %380 = vst.msk [vmem:[#allocation2 + $0x1c8] sm:$0xff] %vm322_vm0, %v315_v31  ;;  %v319_v31 = vld [vmem:[%s2693_s8 + $0x1e8] sm:$0xff] }
  0x8b   : > { %384 = vst.msk [vmem:[#allocation2 + $0x1e8] sm:$0xff] %vm322_vm0, %v319_v31  ;;  %v388_v31 = vld [vmem:[%s3357_s27 + $0x8] sm:$0xff] }
  0x8c   : > { %2473 = vmatmul.msk.bf16.gmra.mxu0 %vm322_vm0, %v684_v32  ;;  %452 = vst.msk [vmem:[#allocation2 + $0x208] sm:$0xff] %vm322_vm0, %v388_v31  ;;  %v3418_v31 = vld [vmem:[#allocation2 + $0x1f0] sm:$0xff] }
  0x8e   : > { %2509 = vmatmul.msk.bf16.gmra.mxu1 %vm322_vm0, %v586_v37 }
  0x90   : > { %2545 = vmatmul.msk.bf16.gmra.mxu2 %vm322_vm0, %v1324_v38  ;;  %v589_v38 = vpack.c.bf16 %v2800_v46, %v2785_v36 }
  0x92   : > { %v3416_v30 = vld [vmem:[#allocation2 + $0x1e8] sm:$0xff] }
  0x93   : > { %2581 = vmatmul.msk.bf16.gmra.mxu3 %vm322_vm0, %v1757_v41 }
  0x99   : > { %v822_v45 = vpop.f32.mrf.mxu0 }
  0x9b   : > { %v1093_v49 = vpop.f32.mrf.mxu1 }
  0x9c   : > { %2474 = vmatmul.msk.bf16.gmra.mxu0 %vm322_vm0, %v685_v42  ;;  %v1094_v54 = vadd.f32 %v1093_v49, %v822_v45  ;;  %v2883_v45 = vld [vmem:[#allocation2 + $0xe4] sm:$0xff] }
  0x9d   : > { %v1760_v46 = vpack.c.bf16 %v2883_v45, %v2881_v44 }
  0x9e   : > { %2510 = vmatmul.msk.bf16.gmra.mxu1 %vm322_vm0, %v587_v48 }
  0xa0   : > { %2546 = vmatmul.msk.bf16.gmra.mxu2 %vm322_vm0, %v1325_v50 }
  0xa1   : > { %v824_v55 = vpop.f32.mrf.mxu0 }
  0xa3   : > { %2582 = vmatmul.msk.bf16.gmra.mxu3 %vm322_vm0, %v1758_v53  ;;  %v1462_v56 = vpop.f32.mrf.mxu2  ;;  %v1095_v57 = vpop.f32.mrf.mxu1 }
  0xa4   : > { %v1622_v58 = vadd.f32 %v1462_v56, %v1094_v54  ;;  %v1096_v6 = vadd.f32 %v1095_v57, %v824_v55 }
  0xa6   : > { %v1895_v60 = vpop.f32.mrf.mxu3 }
  0xa7   : > { %v2055_v61 = vadd.f32 %v1895_v60, %v1622_v58 }
  0xa9   : > { %v2123_v2 = vmul.f32 %v2823_v59, %v2055_v61  ;;  %v827_v3 = vpop.f32.mrf.mxu0 }
  0xab   : > { %v2191_v8 = vadd.f32 %v2828_v62, %v2123_v2  ;;  %v1464_v9 = vpop.f32.mrf.mxu2  ;;  %v1098_v10 = vpop.f32.mrf.mxu1 }
  0xac   : > { %v1623_v11 = vadd.f32 %v1464_v9, %v1096_v6  ;;  %2475 = vmatmul.msk.bf16.gmra.mxu0 %vm322_vm0, %v686_v63  ;;  %v1099_v19 = vadd.f32 %v1098_v10, %v827_v3  ;;  %v688_v63 = vpack.c.bf16 %v2851_v13, %v2811_v52  ;;  %v2899_v6 = vld [vmem:[#allocation2 + $0xd8] sm:$0xff]  ;;  %v590_v9 = vpack.c.bf16 %v2834_v4, %v2802_v47 }
  0xad   : > { %v2255_v15 = vmax.f32 %v2191_v8, 0.0 }
  0xae   : > { %v1897_v16 = vpop.f32.mrf.mxu3  ;;  %2511 = vmatmul.msk.bf16.gmra.mxu1 %vm322_vm0, %v588_v7  ;;  %v2901_v7 = vld [vmem:[#allocation2 + $0xe0] sm:$0xff] }
  0xaf   : > { %2319 = vst [vmem:[%s2846_s17] sm:$0xff] %v2255_v15  ;;  %v2056_v17 = vadd.f32 %v1897_v16, %v1623_v11  ;;  %v1328_v13 = vpack.c.bf16 %v2901_v7, %v2899_v6  ;;  %v2911_v15 = vld [vmem:[#allocation2 + $0xec] sm:$0xff]  ;;  %v2913_v16 = vld [vmem:[#allocation2 + $0xf4] sm:$0xff] }
  0xb0   : > { %2547 = vmatmul.msk.bf16.gmra.mxu2 %vm322_vm0, %v1326_v12  ;;  %v1761_v4 = vpack.c.bf16 %v2913_v16, %v2911_v15 }
  0xb1   : > { %v2124_v20 = vmul.f32 %v2823_v59, %v2056_v17  ;;  %v829_v21 = vpop.f32.mrf.mxu0 }
  0xb3   : > { %v2192_v22 = vadd.f32 %v2828_v62, %v2124_v20  ;;  %2583 = vmatmul.msk.bf16.gmra.mxu3 %vm322_vm0, %v1759_v18  ;;  %v1467_v23 = vpop.f32.mrf.mxu2  ;;  %v1100_v24 = vpop.f32.mrf.mxu1 }
  0xb4   : > { %v1624_v25 = vadd.f32 %v1467_v23, %v1099_v19  ;;  %v1101_v37 = vadd.f32 %v1100_v24, %v829_v21 }
  0xb5   : > { %v2256_v26 = vmax.f32 %v2192_v22, 0.0 }
  0xb6   : > { %v1900_v27 = vpop.f32.mrf.mxu3 }
  0xb7   : > { %2320 = vst [vmem:[%s2846_s17 + $0x8] sm:$0xff] %v2256_v26  ;;  %v2057_v28 = vadd.f32 %v1900_v27, %v1624_v25 }
  0xb9   : > { %v2125_v32 = vmul.f32 %v2823_v59, %v2057_v28  ;;  %v832_v33 = vpop.f32.mrf.mxu0 }
  0xbb   : > { %v2193_v39 = vadd.f32 %v2828_v62, %v2125_v32  ;;  %v1469_v40 = vpop.f32.mrf.mxu2  ;;  %v1103_v41 = vpop.f32.mrf.mxu1 }
  0xbc   : > { %v1625_v42 = vadd.f32 %v1469_v40, %v1101_v37  ;;  %2476 = vmatmul.msk.bf16.gmra.mxu0 %vm322_vm0, %v687_v29  ;;  %v1104_v50 = vadd.f32 %v1103_v41, %v832_v33  ;;  %v689_v29 = vpack.c.bf16 %v2881_v44, %v2853_v14  ;;  %v2929_v37 = vld [vmem:[#allocation2 + $0xe8] sm:$0xff]  ;;  %v591_v40 = vpack.c.bf16 %v2869_v34, %v2836_v5 }
  0xbd   : > { %v2257_v48 = vmax.f32 %v2193_v39, 0.0 }
  0xbe   : > { %v1902_v49 = vpop.f32.mrf.mxu3  ;;  %2512 = vmatmul.msk.bf16.gmra.mxu1 %vm322_vm0, %v589_v38  ;;  %v2931_v38 = vld [vmem:[#allocation2 + $0xf0] sm:$0xff] }
  0xbf   : > { %2321 = vst [vmem:[%s2846_s17 + $0x10] sm:$0xff] %v2257_v48  ;;  %v2058_v36 = vadd.f32 %v1902_v49, %v1625_v42  ;;  %v1329_v44 = vpack.c.bf16 %v2931_v38, %v2929_v37  ;;  %v2941_v48 = vld [vmem:[#allocation2 + $0xfc] sm:$0xff]  ;;  %v2943_v49 = vld [vmem:[#allocation2 + $0x104] sm:$0xff] }
  0xc0   : > { %2548 = vmatmul.msk.bf16.gmra.mxu2 %vm322_vm0, %v1327_v43  ;;  %v1762_v34 = vpack.c.bf16 %v2943_v49, %v2941_v48 }
  0xc1   : > { %v2126_v51 = vmul.f32 %v2823_v59, %v2058_v36  ;;  %v834_v53 = vpop.f32.mrf.mxu0 }
  0xc3   : > { %v2194_v54 = vadd.f32 %v2828_v62, %v2126_v51  ;;  %2584 = vmatmul.msk.bf16.gmra.mxu3 %vm322_vm0, %v1760_v46  ;;  %v1472_v55 = vpop.f32.mrf.mxu2  ;;  %v1105_v56 = vpop.f32.mrf.mxu1 }
  0xc4   : > { %v1626_v57 = vadd.f32 %v1472_v55, %v1104_v50  ;;  %v1106_v8 = vadd.f32 %v1105_v56, %v834_v53 }
  0xc5   : > { %v2258_v58 = vmax.f32 %v2194_v54, 0.0 }
  0xc6   : > { %v1905_v60 = vpop.f32.mrf.mxu3 }
  0xc7   : > { %2322 = vst [vmem:[%s2846_s17 + $0x18] sm:$0xff] %v2258_v58  ;;  %v2059_v61 = vadd.f32 %v1905_v60, %v1626_v57 }
  0xc9   : > { %v2127_v2 = vmul.f32 %v2823_v59, %v2059_v61  ;;  %v837_v3 = vpop.f32.mrf.mxu0 }
  0xcb   : > { %v2195_v52 = vadd.f32 %v2828_v62, %v2127_v2  ;;  %v1474_v10 = vpop.f32.mrf.mxu2  ;;  %v1108_v11 = vpop.f32.mrf.mxu1 }
  0xcc   : > { %v1627_v12 = vadd.f32 %v1474_v10, %v1106_v8  ;;  %2477 = vmatmul.msk.bf16.gmra.mxu0 %vm322_vm0, %v688_v63  ;;  %v1109_v19 = vadd.f32 %v1108_v11, %v837_v3  ;;  %v690_v63 = vpack.c.bf16 %v2911_v15, %v2883_v45  ;;  %v2959_v8 = vld [vmem:[#allocation2 + $0xf8] sm:$0xff]  ;;  %v592_v10 = vpack.c.bf16 %v2899_v6, %v2871_v35 }
  0xcd   : > { %v2259_v17 = vmax.f32 %v2195_v52, 0.0 }
  0xce   : > { %v1907_v18 = vpop.f32.mrf.mxu3  ;;  %2513 = vmatmul.msk.bf16.gmra.mxu1 %vm322_vm0, %v590_v9  ;;  %v2961_v9 = vld [vmem:[#allocation2 + $0x100] sm:$0xff] }
  0xcf   : > { %2323 = vst [vmem:[%s2846_s17 + $0x20] sm:$0xff] %v2259_v17  ;;  %v2060_v47 = vadd.f32 %v1907_v18, %v1627_v12  ;;  %v1330_v15 = vpack.c.bf16 %v2961_v9, %v2959_v8  ;;  %v2971_v17 = vld [vmem:[#allocation2 + $0x10c] sm:$0xff]  ;;  %v2973_v18 = vld [vmem:[#allocation2 + $0x114] sm:$0xff] }
  0xd0   : > { %2549 = vmatmul.msk.bf16.gmra.mxu2 %vm322_vm0, %v1328_v13  ;;  %v1763_v6 = vpack.c.bf16 %v2973_v18, %v2971_v17 }
  0xd1   : > { %v2128_v20 = vmul.f32 %v2823_v59, %v2060_v47  ;;  %v839_v21 = vpop.f32.mrf.mxu0 }
  0xd3   : > { %v2196_v22 = vadd.f32 %v2828_v62, %v2128_v20  ;;  %2585 = vmatmul.msk.bf16.gmra.mxu3 %vm322_vm0, %v1761_v4  ;;  %v1477_v23 = vpop.f32.mrf.mxu2  ;;  %v1110_v24 = vpop.f32.mrf.mxu1 }
  0xd4   : > { %v1628_v25 = vadd.f32 %v1477_v23, %v1109_v19  ;;  %v1111_v39 = vadd.f32 %v1110_v24, %v839_v21 }
  0xd5   : > { %v2260_v26 = vmax.f32 %v2196_v22, 0.0 }
  0xd6   : > { %v1910_v27 = vpop.f32.mrf.mxu3 }
  0xd7   : > { %2324 = vst [vmem:[%s2846_s17 + $0x28] sm:$0xff] %v2260_v26  ;;  %v2061_v28 = vadd.f32 %v1910_v27, %v1628_v25 }
  0xd9   : > { %v2129_v32 = vmul.f32 %v2823_v59, %v2061_v28  ;;  %v842_v33 = vpop.f32.mrf.mxu0 }
  0xdb   : > { %v2197_v14 = vadd.f32 %v2828_v62, %v2129_v32  ;;  %v1479_v41 = vpop.f32.mrf.mxu2  ;;  %v1113_v42 = vpop.f32.mrf.mxu1 }
  0xdc   : > { %v1629_v43 = vadd.f32 %v1479_v41, %v1111_v39  ;;  %2478 = vmatmul.msk.bf16.gmra.mxu0 %vm322_vm0, %v689_v29  ;;  %v1114_v50 = vadd.f32 %v1113_v42, %v842_v33  ;;  %v691_v29 = vpack.c.bf16 %v2941_v48, %v2913_v16  ;;  %v2989_v39 = vld [vmem:[#allocation2 + $0x108] sm:$0xff]  ;;  %v593_v41 = vpack.c.bf16 %v2929_v37, %v2901_v7 }
  0xdd   : > { %v2261_v36 = vmax.f32 %v2197_v14, 0.0 }
  0xde   : > { %v1912_v46 = vpop.f32.mrf.mxu3  ;;  %2514 = vmatmul.msk.bf16.gmra.mxu1 %vm322_vm0, %v591_v40  ;;  %v2991_v40 = vld [vmem:[#allocation2 + $0x110] sm:$0xff] }
  0xdf   : > { %2325 = vst [vmem:[%s2846_s17 + $0x30] sm:$0xff] %v2261_v36  ;;  %v2062_v5 = vadd.f32 %v1912_v46, %v1629_v43  ;;  %v1331_v48 = vpack.c.bf16 %v2991_v40, %v2989_v39  ;;  %v3001_v36 = vld [vmem:[#allocation2 + $0x11c] sm:$0xff]  ;;  %v3003_v46 = vld [vmem:[#allocation2 + $0x124] sm:$0xff] }
  0xe0   : > { %2550 = vmatmul.msk.bf16.gmra.mxu2 %vm322_vm0, %v1329_v44  ;;  %v1764_v37 = vpack.c.bf16 %v3003_v46, %v3001_v36 }
  0xe1   : > { %v2130_v51 = vmul.f32 %v2823_v59, %v2062_v5  ;;  %v844_v53 = vpop.f32.mrf.mxu0 }
  0xe3   : > { %v2198_v54 = vadd.f32 %v2828_v62, %v2130_v51  ;;  %2586 = vmatmul.msk.bf16.gmra.mxu3 %vm322_vm0, %v1762_v34  ;;  %v1482_v55 = vpop.f32.mrf.mxu2  ;;  %v1115_v56 = vpop.f32.mrf.mxu1 }
  0xe4   : > { %v1630_v57 = vadd.f32 %v1482_v55, %v1114_v50  ;;  %v1116_v52 = vadd.f32 %v1115_v56, %v844_v53 }
  0xe5   : > { %v2262_v58 = vmax.f32 %v2198_v54, 0.0 }
  0xe6   : > { %v1915_v60 = vpop.f32.mrf.mxu3 }
  0xe7   : > { %2326 = vst [vmem:[%s2846_s17 + $0x38] sm:$0xff] %v2262_v58  ;;  %v2063_v61 = vadd.f32 %v1915_v60, %v1630_v57 }
  0xe9   : > { %v2131_v2 = vmul.f32 %v2823_v59, %v2063_v61  ;;  %v847_v3 = vpop.f32.mrf.mxu0 }
  0xeb   : > { %v2199_v45 = vadd.f32 %v2828_v62, %v2131_v2  ;;  %v1484_v11 = vpop.f32.mrf.mxu2  ;;  %v1118_v12 = vpop.f32.mrf.mxu1 }
  0xec   : > { %v1631_v13 = vadd.f32 %v1484_v11, %v1116_v52  ;;  %2479 = vmatmul.msk.bf16.gmra.mxu0 %vm322_vm0, %v690_v63  ;;  %v1119_v19 = vadd.f32 %v1118_v12, %v847_v3  ;;  %v692_v63 = vpack.c.bf16 %v2971_v17, %v2943_v49  ;;  %v3019_v52 = vld [vmem:[#allocation2 + $0x118] sm:$0xff]  ;;  %v594_v11 = vpack.c.bf16 %v2959_v8, %v2931_v38 }
  0xed   : > { %v2263_v47 = vmax.f32 %v2199_v45, 0.0 }
  0xee   : > { %v1917_v4 = vpop.f32.mrf.mxu3  ;;  %2515 = vmatmul.msk.bf16.gmra.mxu1 %vm322_vm0, %v592_v10  ;;  %v3021_v10 = vld [vmem:[#allocation2 + $0x120] sm:$0xff] }
  0xef   : > { %2327 = vst [vmem:[%s2846_s17 + $0x40] sm:$0xff] %v2263_v47  ;;  %v2064_v35 = vadd.f32 %v1917_v4, %v1631_v13  ;;  %v1332_v17 = vpack.c.bf16 %v3021_v10, %v3019_v52  ;;  %v3031_v47 = vld [vmem:[#allocation2 + $0x12c] sm:$0xff]  ;;  %v3033_v4 = vld [vmem:[#allocation2 + $0x134] sm:$0xff] }
  0xf0   : > { %2551 = vmatmul.msk.bf16.gmra.mxu2 %vm322_vm0, %v1330_v15  ;;  %v1765_v8 = vpack.c.bf16 %v3033_v4, %v3031_v47 }
  0xf1   : > { %v2132_v20 = vmul.f32 %v2823_v59, %v2064_v35  ;;  %v849_v21 = vpop.f32.mrf.mxu0 }
  0xf3   : > { %v2200_v22 = vadd.f32 %v2828_v62, %v2132_v20  ;;  %2587 = vmatmul.msk.bf16.gmra.mxu3 %vm322_vm0, %v1763_v6  ;;  %v1487_v23 = vpop.f32.mrf.mxu2  ;;  %v1120_v24 = vpop.f32.mrf.mxu1 }
  0xf4   : > { %v1632_v25 = vadd.f32 %v1487_v23, %v1119_v19  ;;  %v1121_v14 = vadd.f32 %v1120_v24, %v849_v21 }
  0xf5   : > { %v2264_v26 = vmax.f32 %v2200_v22, 0.0 }
  0xf6   : > { %v1920_v27 = vpop.f32.mrf.mxu3 }
  0xf7   : > { %2328 = vst [vmem:[%s2846_s17 + $0x48] sm:$0xff] %v2264_v26  ;;  %v2065_v28 = vadd.f32 %v1920_v27, %v1632_v25 }
  0xf9   : > { %v2133_v32 = vmul.f32 %v2823_v59, %v2065_v28  ;;  %v852_v33 = vpop.f32.mrf.mxu0 }
  0xfb   : > { %v2201_v16 = vadd.f32 %v2828_v62, %v2133_v32  ;;  %v1489_v42 = vpop.f32.mrf.mxu2  ;;  %v1123_v43 = vpop.f32.mrf.mxu1 }
  0xfc   : > { %v1633_v44 = vadd.f32 %v1489_v42, %v1121_v14  ;;  %2480 = vmatmul.msk.bf16.gmra.mxu0 %vm322_vm0, %v691_v29  ;;  %v1124_v50 = vadd.f32 %v1123_v43, %v852_v33  ;;  %v693_v29 = vpack.c.bf16 %v3001_v36, %v2973_v18  ;;  %v3049_v14 = vld [vmem:[#allocation2 + $0x128] sm:$0xff]  ;;  %v595_v42 = vpack.c.bf16 %v2989_v39, %v2961_v9 }
  0xfd   : > { %v2265_v5 = vmax.f32 %v2201_v16, 0.0 }
  0xfe   : > { %v1922_v34 = vpop.f32.mrf.mxu3  ;;  %2516 = vmatmul.msk.bf16.gmra.mxu1 %vm322_vm0, %v593_v41  ;;  %v3051_v41 = vld [vmem:[#allocation2 + $0x130] sm:$0xff] }
  0xff   : > { %2329 = vst [vmem:[%s2846_s17 + $0x50] sm:$0xff] %v2265_v5  ;;  %v2066_v7 = vadd.f32 %v1922_v34, %v1633_v44  ;;  %v1333_v36 = vpack.c.bf16 %v3051_v41, %v3049_v14  ;;  %v3061_v5 = vld [vmem:[#allocation2 + $0x13c] sm:$0xff]  ;;  %v3063_v34 = vld [vmem:[#allocation2 + $0x144] sm:$0xff] }
 0x100   : > { %2552 = vmatmul.msk.bf16.gmra.mxu2 %vm322_vm0, %v1331_v48  ;;  %v1766_v39 = vpack.c.bf16 %v3063_v34, %v3061_v5 }
 0x101   : > { %v2134_v51 = vmul.f32 %v2823_v59, %v2066_v7  ;;  %v854_v53 = vpop.f32.mrf.mxu0 }
 0x103   : > { %v2202_v54 = vadd.f32 %v2828_v62, %v2134_v51  ;;  %2588 = vmatmul.msk.bf16.gmra.mxu3 %vm322_vm0, %v1764_v37  ;;  %v1492_v55 = vpop.f32.mrf.mxu2  ;;  %v1125_v56 = vpop.f32.mrf.mxu1 }
 0x104   : > { %v1634_v57 = vadd.f32 %v1492_v55, %v1124_v50  ;;  %v1126_v45 = vadd.f32 %v1125_v56, %v854_v53 }
 0x105   : > { %v2266_v58 = vmax.f32 %v2202_v54, 0.0 }
 0x106   : > { %v1925_v60 = vpop.f32.mrf.mxu3 }
 0x107   : > { %2330 = vst [vmem:[%s2846_s17 + $0x58] sm:$0xff] %v2266_v58  ;;  %v2067_v61 = vadd.f32 %v1925_v60, %v1634_v57 }
 0x109   : > { %v2135_v2 = vmul.f32 %v2823_v59, %v2067_v61  ;;  %v857_v3 = vpop.f32.mrf.mxu0 }
 0x10b   : > { %v2203_v49 = vadd.f32 %v2828_v62, %v2135_v2  ;;  %v1494_v12 = vpop.f32.mrf.mxu2  ;;  %v1128_v13 = vpop.f32.mrf.mxu1 }
 0x10c   : > { %v1635_v15 = vadd.f32 %v1494_v12, %v1126_v45  ;;  %2481 = vmatmul.msk.bf16.gmra.mxu0 %vm322_vm0, %v692_v63  ;;  %v1129_v19 = vadd.f32 %v1128_v13, %v857_v3  ;;  %v694_v63 = vpack.c.bf16 %v3031_v47, %v3003_v46  ;;  %v3079_v45 = vld [vmem:[#allocation2 + $0x138] sm:$0xff]  ;;  %v596_v12 = vpack.c.bf16 %v3019_v52, %v2991_v40 }
 0x10d   : > { %v2267_v35 = vmax.f32 %v2203_v49, 0.0 }
 0x10e   : > { %v1927_v6 = vpop.f32.mrf.mxu3  ;;  %2517 = vmatmul.msk.bf16.gmra.mxu1 %vm322_vm0, %v594_v11  ;;  %v3081_v11 = vld [vmem:[#allocation2 + $0x140] sm:$0xff] }
 0x10f   : > { %2331 = vst [vmem:[%s2846_s17 + $0x60] sm:$0xff] %v2267_v35  ;;  %v2068_v38 = vadd.f32 %v1927_v6, %v1635_v15  ;;  %v1334_v47 = vpack.c.bf16 %v3081_v11, %v3079_v45  ;;  %v3091_v35 = vld [vmem:[#allocation2 + $0x14c] sm:$0xff]  ;;  %v3093_v6 = vld [vmem:[#allocation2 + $0x154] sm:$0xff] }
 0x110   : > { %2553 = vmatmul.msk.bf16.gmra.mxu2 %vm322_vm0, %v1332_v17  ;;  %v1767_v52 = vpack.c.bf16 %v3093_v6, %v3091_v35 }
 0x111   : > { %v2136_v20 = vmul.f32 %v2823_v59, %v2068_v38  ;;  %v859_v21 = vpop.f32.mrf.mxu0 }
 0x113   : > { %v2204_v22 = vadd.f32 %v2828_v62, %v2136_v20  ;;  %2589 = vmatmul.msk.bf16.gmra.mxu3 %vm322_vm0, %v1765_v8  ;;  %v1497_v23 = vpop.f32.mrf.mxu2  ;;  %v1130_v24 = vpop.f32.mrf.mxu1 }
 0x114   : > { %v1636_v25 = vadd.f32 %v1497_v23, %v1129_v19  ;;  %v1131_v16 = vadd.f32 %v1130_v24, %v859_v21 }
 0x115   : > { %v2268_v26 = vmax.f32 %v2204_v22, 0.0 }
 0x116   : > { %v1930_v27 = vpop.f32.mrf.mxu3 }
 0x117   : > { %2332 = vst [vmem:[%s2846_s17 + $0x68] sm:$0xff] %v2268_v26  ;;  %v2069_v28 = vadd.f32 %v1930_v27, %v1636_v25 }
 0x119   : > { %v2137_v32 = vmul.f32 %v2823_v59, %v2069_v28  ;;  %v862_v33 = vpop.f32.mrf.mxu0 }
 0x11b   : > { %v2205_v18 = vadd.f32 %v2828_v62, %v2137_v32  ;;  %v1499_v43 = vpop.f32.mrf.mxu2  ;;  %v1133_v44 = vpop.f32.mrf.mxu1 }
 0x11c   : > { %v1637_v48 = vadd.f32 %v1499_v43, %v1131_v16  ;;  %2482 = vmatmul.msk.bf16.gmra.mxu0 %vm322_vm0, %v693_v29  ;;  %v1134_v50 = vadd.f32 %v1133_v44, %v862_v33  ;;  %v695_v29 = vpack.c.bf16 %v3061_v5, %v3033_v4  ;;  %v3109_v16 = vld [vmem:[#allocation2 + $0x148] sm:$0xff]  ;;  %v597_v43 = vpack.c.bf16 %v3049_v14, %v3021_v10 }
 0x11d   : > { %v2269_v7 = vmax.f32 %v2205_v18, 0.0 }
 0x11e   : > { %v1932_v37 = vpop.f32.mrf.mxu3  ;;  %2518 = vmatmul.msk.bf16.gmra.mxu1 %vm322_vm0, %v595_v42  ;;  %v3111_v42 = vld [vmem:[#allocation2 + $0x150] sm:$0xff] }
 0x11f   : > { %2333 = vst [vmem:[%s2846_s17 + $0x70] sm:$0xff] %v2269_v7  ;;  %v2070_v9 = vadd.f32 %v1932_v37, %v1637_v48  ;;  %v1335_v5 = vpack.c.bf16 %v3111_v42, %v3109_v16  ;;  %v3121_v7 = vld [vmem:[#allocation2 + $0x15c] sm:$0xff]  ;;  %v3123_v37 = vld [vmem:[#allocation2 + $0x164] sm:$0xff] }
 0x120   : > { %2554 = vmatmul.msk.bf16.gmra.mxu2 %vm322_vm0, %v1333_v36  ;;  %v1768_v14 = vpack.c.bf16 %v3123_v37, %v3121_v7 }
 0x121   : > { %v2138_v51 = vmul.f32 %v2823_v59, %v2070_v9  ;;  %v864_v53 = vpop.f32.mrf.mxu0 }
 0x123   : > { %v2206_v54 = vadd.f32 %v2828_v62, %v2138_v51  ;;  %2590 = vmatmul.msk.bf16.gmra.mxu3 %vm322_vm0, %v1766_v39  ;;  %v1502_v55 = vpop.f32.mrf.mxu2  ;;  %v1135_v56 = vpop.f32.mrf.mxu1 }
 0x124   : > { %v1638_v57 = vadd.f32 %v1502_v55, %v1134_v50  ;;  %v1136_v49 = vadd.f32 %v1135_v56, %v864_v53 }
 0x125   : > { %v2270_v58 = vmax.f32 %v2206_v54, 0.0 }
 0x126   : > { %v1935_v60 = vpop.f32.mrf.mxu3 }
 0x127   : > { %2334 = vst [vmem:[%s2846_s17 + $0x78] sm:$0xff] %v2270_v58  ;;  %v2071_v61 = vadd.f32 %v1935_v60, %v1638_v57 }
 0x129   : > { %v2139_v2 = vmul.f32 %v2823_v59, %v2071_v61  ;;  %v867_v3 = vpop.f32.mrf.mxu0 }
 0x12b   : > { %v2207_v46 = vadd.f32 %v2828_v62, %v2139_v2  ;;  %v1504_v13 = vpop.f32.mrf.mxu2  ;;  %v1138_v15 = vpop.f32.mrf.mxu1 }
 0x12c   : > { %v1639_v17 = vadd.f32 %v1504_v13, %v1136_v49  ;;  %2483 = vmatmul.msk.bf16.gmra.mxu0 %vm322_vm0, %v694_v63  ;;  %v1139_v19 = vadd.f32 %v1138_v15, %v867_v3  ;;  %v696_v63 = vpack.c.bf16 %v3091_v35, %v3063_v34  ;;  %v3139_v49 = vld [vmem:[#allocation2 + $0x158] sm:$0xff]  ;;  %v598_v13 = vpack.c.bf16 %v3079_v45, %v3051_v41 }
 0x12d   : > { %v2271_v38 = vmax.f32 %v2207_v46, 0.0 }
 0x12e   : > { %v1937_v8 = vpop.f32.mrf.mxu3  ;;  %2519 = vmatmul.msk.bf16.gmra.mxu1 %vm322_vm0, %v596_v12  ;;  %v3141_v12 = vld [vmem:[#allocation2 + $0x160] sm:$0xff] }
 0x12f   : > { %2335 = vst [vmem:[%s2846_s17 + $0x80] sm:$0xff] %v2271_v38  ;;  %v2072_v40 = vadd.f32 %v1937_v8, %v1639_v17  ;;  %v1336_v35 = vpack.c.bf16 %v3141_v12, %v3139_v49  ;;  %v3151_v38 = vld [vmem:[#allocation2 + $0x16c] sm:$0xff]  ;;  %v3153_v8 = vld [vmem:[#allocation2 + $0x174] sm:$0xff] }
 0x130   : > { %2555 = vmatmul.msk.bf16.gmra.mxu2 %vm322_vm0, %v1334_v47  ;;  %v1769_v45 = vpack.c.bf16 %v3153_v8, %v3151_v38 }
 0x131   : > { %v2140_v20 = vmul.f32 %v2823_v59, %v2072_v40  ;;  %v869_v21 = vpop.f32.mrf.mxu0 }
 0x133   : > { %v2208_v22 = vadd.f32 %v2828_v62, %v2140_v20  ;;  %2591 = vmatmul.msk.bf16.gmra.mxu3 %vm322_vm0, %v1767_v52  ;;  %v1507_v23 = vpop.f32.mrf.mxu2  ;;  %v1140_v24 = vpop.f32.mrf.mxu1 }
 0x134   : > { %v1640_v25 = vadd.f32 %v1507_v23, %v1139_v19  ;;  %v1141_v18 = vadd.f32 %v1140_v24, %v869_v21 }
 0x135   : > { %v2272_v26 = vmax.f32 %v2208_v22, 0.0 }
 0x136   : > { %v1940_v27 = vpop.f32.mrf.mxu3 }
 0x137   : > { %2336 = vst [vmem:[%s2846_s17 + $0x88] sm:$0xff] %v2272_v26  ;;  %v2073_v28 = vadd.f32 %v1940_v27, %v1640_v25 }
 0x139   : > { %v2141_v32 = vmul.f32 %v2823_v59, %v2073_v28  ;;  %v872_v33 = vpop.f32.mrf.mxu0 }
 0x13b   : > { %v2209_v4 = vadd.f32 %v2828_v62, %v2141_v32  ;;  %v1509_v44 = vpop.f32.mrf.mxu2  ;;  %v1143_v48 = vpop.f32.mrf.mxu1 }
 0x13c   : > { %v1641_v36 = vadd.f32 %v1509_v44, %v1141_v18  ;;  %2484 = vmatmul.msk.bf16.gmra.mxu0 %vm322_vm0, %v695_v29  ;;  %v1144_v50 = vadd.f32 %v1143_v48, %v872_v33  ;;  %v697_v29 = vpack.c.bf16 %v3121_v7, %v3093_v6  ;;  %v3169_v18 = vld [vmem:[#allocation2 + $0x168] sm:$0xff]  ;;  %v599_v44 = vpack.c.bf16 %v3109_v16, %v3081_v11 }
 0x13d   : > { %v2273_v9 = vmax.f32 %v2209_v4, 0.0 }
 0x13e   : > { %v1942_v39 = vpop.f32.mrf.mxu3  ;;  %2520 = vmatmul.msk.bf16.gmra.mxu1 %vm322_vm0, %v597_v43  ;;  %v3171_v43 = vld [vmem:[#allocation2 + $0x170] sm:$0xff] }
 0x13f   : > { %2337 = vst [vmem:[%s2846_s17 + $0x90] sm:$0xff] %v2273_v9  ;;  %v2074_v10 = vadd.f32 %v1942_v39, %v1641_v36  ;;  %v1337_v7 = vpack.c.bf16 %v3171_v43, %v3169_v18  ;;  %v3181_v9 = vld [vmem:[#allocation2 + $0x17c] sm:$0xff]  ;;  %v3183_v39 = vld [vmem:[#allocation2 + $0x184] sm:$0xff] }
 0x140   : > { %2556 = vmatmul.msk.bf16.gmra.mxu2 %vm322_vm0, %v1335_v5  ;;  %v1770_v16 = vpack.c.bf16 %v3183_v39, %v3181_v9 }
 0x141   : > { %v2142_v51 = vmul.f32 %v2823_v59, %v2074_v10  ;;  %v874_v53 = vpop.f32.mrf.mxu0 }
 0x143   : > { %v2210_v54 = vadd.f32 %v2828_v62, %v2142_v51  ;;  %2592 = vmatmul.msk.bf16.gmra.mxu3 %vm322_vm0, %v1768_v14  ;;  %v1512_v55 = vpop.f32.mrf.mxu2  ;;  %v1145_v56 = vpop.f32.mrf.mxu1 }
 0x144   : > { %v1642_v57 = vadd.f32 %v1512_v55, %v1144_v50  ;;  %v1146_v46 = vadd.f32 %v1145_v56, %v874_v53 }
 0x145   : > { %v2274_v58 = vmax.f32 %v2210_v54, 0.0 }
 0x146   : > { %v1945_v60 = vpop.f32.mrf.mxu3 }
 0x147   : > { %2338 = vst [vmem:[%s2846_s17 + $0x98] sm:$0xff] %v2274_v58  ;;  %v2075_v61 = vadd.f32 %v1945_v60, %v1642_v57 }
 0x149   : > { %v2143_v2 = vmul.f32 %v2823_v59, %v2075_v61  ;;  %v877_v3 = vpop.f32.mrf.mxu0 }
 0x14b   : > { %v2211_v34 = vadd.f32 %v2828_v62, %v2143_v2  ;;  %v1514_v15 = vpop.f32.mrf.mxu2  ;;  %v1148_v17 = vpop.f32.mrf.mxu1 }
 0x14c   : > { %v1643_v47 = vadd.f32 %v1514_v15, %v1146_v46  ;;  %2485 = vmatmul.msk.bf16.gmra.mxu0 %vm322_vm0, %v696_v63  ;;  %v1149_v19 = vadd.f32 %v1148_v17, %v877_v3  ;;  %v698_v63 = vpack.c.bf16 %v3151_v38, %v3123_v37  ;;  %v3199_v46 = vld [vmem:[#allocation2 + $0x178] sm:$0xff]  ;;  %v600_v15 = vpack.c.bf16 %v3139_v49, %v3111_v42 }
 0x14d   : > { %v2275_v40 = vmax.f32 %v2211_v34, 0.0 }
 0x14e   : > { %v1947_v52 = vpop.f32.mrf.mxu3  ;;  %2521 = vmatmul.msk.bf16.gmra.mxu1 %vm322_vm0, %v598_v13  ;;  %v3201_v13 = vld [vmem:[#allocation2 + $0x180] sm:$0xff] }
 0x14f   : > { %2339 = vst [vmem:[%s2846_s17 + $0xa0] sm:$0xff] %v2275_v40  ;;  %v2076_v41 = vadd.f32 %v1947_v52, %v1643_v47  ;;  %v1338_v38 = vpack.c.bf16 %v3201_v13, %v3199_v46  ;;  %v3211_v40 = vld [vmem:[#allocation2 + $0x18c] sm:$0xff]  ;;  %v3213_v52 = vld [vmem:[#allocation2 + $0x194] sm:$0xff] }
 0x150   : > { %2557 = vmatmul.msk.bf16.gmra.mxu2 %vm322_vm0, %v1336_v35  ;;  %v1771_v49 = vpack.c.bf16 %v3213_v52, %v3211_v40 }
 0x151   : > { %v2144_v20 = vmul.f32 %v2823_v59, %v2076_v41  ;;  %v879_v21 = vpop.f32.mrf.mxu0 }
 0x153   : > { %v2212_v22 = vadd.f32 %v2828_v62, %v2144_v20  ;;  %2593 = vmatmul.msk.bf16.gmra.mxu3 %vm322_vm0, %v1769_v45  ;;  %v1517_v23 = vpop.f32.mrf.mxu2  ;;  %v1150_v24 = vpop.f32.mrf.mxu1 }
 0x154   : > { %v1644_v25 = vadd.f32 %v1517_v23, %v1149_v19  ;;  %v1151_v4 = vadd.f32 %v1150_v24, %v879_v21 }
 0x155   : > { %v2276_v26 = vmax.f32 %v2212_v22, 0.0 }
 0x156   : > { %v1950_v27 = vpop.f32.mrf.mxu3 }
 0x157   : > { %2340 = vst [vmem:[%s2846_s17 + $0xa8] sm:$0xff] %v2276_v26  ;;  %v2077_v28 = vadd.f32 %v1950_v27, %v1644_v25 }
 0x159   : > { %v2145_v32 = vmul.f32 %v2823_v59, %v2077_v28  ;;  %v882_v33 = vpop.f32.mrf.mxu0 }
 0x15b   : > { %v2213_v6 = vadd.f32 %v2828_v62, %v2145_v32  ;;  %v1519_v48 = vpop.f32.mrf.mxu2  ;;  %v1153_v36 = vpop.f32.mrf.mxu1 }
 0x15c   : > { %v1645_v5 = vadd.f32 %v1519_v48, %v1151_v4  ;;  %2486 = vmatmul.msk.bf16.gmra.mxu0 %vm322_vm0, %v697_v29  ;;  %v1154_v50 = vadd.f32 %v1153_v36, %v882_v33  ;;  %v699_v29 = vpack.c.bf16 %v3181_v9, %v3153_v8  ;;  %v3229_v4 = vld [vmem:[#allocation2 + $0x188] sm:$0xff]  ;;  %v601_v48 = vpack.c.bf16 %v3169_v18, %v3141_v12  ;;  %v3241_v9 = vld [vmem:[#allocation2 + $0x19c] sm:$0xff] }
 0x15d   : > { %v2277_v10 = vmax.f32 %v2213_v6, 0.0 }
 0x15e   : > { %v1952_v14 = vpop.f32.mrf.mxu3  ;;  %2522 = vmatmul.msk.bf16.gmra.mxu1 %vm322_vm0, %v599_v44  ;;  %v3231_v44 = vld [vmem:[#allocation2 + $0x190] sm:$0xff] }
 0x15f   : > { %2341 = vst [vmem:[%s2846_s17 + $0xb0] sm:$0xff] %v2277_v10  ;;  %v2078_v11 = vadd.f32 %v1952_v14, %v1645_v5  ;;  %v3243_v10 = vld [vmem:[#allocation2 + $0x1a4] sm:$0xff] }
 0x160   : > { %2558 = vmatmul.msk.bf16.gmra.mxu2 %vm322_vm0, %v1337_v7 }
 0x161   : > { %v2146_v51 = vmul.f32 %v2823_v59, %v2078_v11  ;;  %v884_v53 = vpop.f32.mrf.mxu0 }
 0x163   : > { %v2214_v54 = vadd.f32 %v2828_v62, %v2146_v51  ;;  %2594 = vmatmul.msk.bf16.gmra.mxu3 %vm322_vm0, %v1770_v16  ;;  %v1522_v55 = vpop.f32.mrf.mxu2  ;;  %v1155_v56 = vpop.f32.mrf.mxu1  ;;  %v3253_v16 = vld [vmem:[%s3560_s3] ss:$0 sm:$0xff] }
 0x164   : > { %v1646_v57 = vadd.f32 %v1522_v55, %v1154_v50  ;;  %v1156_v34 = vadd.f32 %v1155_v56, %v884_v53  ;;  %v3259_v53 = vld [vmem:[%s3561_s4] ss:$0 sm:$0xff] }
 0x165   : > { %v2278_v58 = vmax.f32 %v2214_v54, 0.0 }
 0x166   : > { %v1955_v60 = vpop.f32.mrf.mxu3 }
 0x167   : > { %2342 = vst [vmem:[%s2846_s17 + $0xb8] sm:$0xff] %v2278_v58  ;;  %v2079_v61 = vadd.f32 %v1955_v60, %v1646_v57 }
 0x169   : > { %v2147_v2 = vmul.f32 %v2823_v59, %v2079_v61  ;;  %v887_v3 = vpop.f32.mrf.mxu0 }
 0x16b   : > { %v2215_v37 = vadd.f32 %v2828_v62, %v2147_v2  ;;  %v1524_v17 = vpop.f32.mrf.mxu2  ;;  %v1158_v47 = vpop.f32.mrf.mxu1 }
 0x16c   : > { %v1647_v35 = vadd.f32 %v1524_v17, %v1156_v34  ;;  %2487 = vmatmul.msk.bf16.gmra.mxu0 %vm322_vm0, %v698_v63  ;;  %v1159_v19 = vadd.f32 %v1158_v47, %v887_v3  ;;  %v700_v63 = vpack.c.bf16 %v3211_v40, %v3183_v39  ;;  %v3269_v34 = vld [vmem:[#allocation2 + $0x198] sm:$0xff]  ;;  %v602_v17 = vpack.c.bf16 %v3199_v46, %v3171_v43 }
 0x16d   : > { %v2279_v41 = vmax.f32 %v2215_v37, 0.0 }
 0x16e   : > { %v1957_v45 = vpop.f32.mrf.mxu3  ;;  %2523 = vmatmul.msk.bf16.gmra.mxu1 %vm322_vm0, %v600_v15  ;;  %v3271_v15 = vld [vmem:[#allocation2 + $0x1a0] sm:$0xff] }
 0x16f   : > { %2343 = vst [vmem:[%s2846_s17 + $0xc0] sm:$0xff] %v2279_v41  ;;  %v2080_v42 = vadd.f32 %v1957_v45, %v1647_v35  ;;  %v1340_v40 = vpack.c.bf16 %v3271_v15, %v3269_v34  ;;  %v3281_v41 = vld [vmem:[#allocation2 + $0x1ac] sm:$0xff]  ;;  %v3283_v45 = vld [vmem:[#allocation2 + $0x1b4] sm:$0xff] }
 0x170   : > { %2559 = vmatmul.msk.bf16.gmra.mxu2 %vm322_vm0, %v1338_v38  ;;  %v1773_v46 = vpack.c.bf16 %v3283_v45, %v3281_v41 }
 0x171   : > { %v2148_v20 = vmul.f32 %v2823_v59, %v2080_v42  ;;  %v889_v21 = vpop.f32.mrf.mxu0 }
 0x173   : > { %v2216_v22 = vadd.f32 %v2828_v62, %v2148_v20  ;;  %2595 = vmatmul.msk.bf16.gmra.mxu3 %vm322_vm0, %v1771_v49  ;;  %v1527_v23 = vpop.f32.mrf.mxu2  ;;  %v1160_v24 = vpop.f32.mrf.mxu1 }
 0x174   : > { %v1648_v25 = vadd.f32 %v1527_v23, %v1159_v19  ;;  %v1161_v6 = vadd.f32 %v1160_v24, %v889_v21 }
 0x175   : > { %v2280_v26 = vmax.f32 %v2216_v22, 0.0 }
 0x176   : > { %v1960_v27 = vpop.f32.mrf.mxu3 }
 0x177   : > { %2344 = vst [vmem:[%s2846_s17 + $0xc8] sm:$0xff] %v2280_v26  ;;  %v2081_v28 = vadd.f32 %v1960_v27, %v1648_v25 }
 0x179   : > { %v2149_v32 = vmul.f32 %v2823_v59, %v2081_v28  ;;  %v892_v33 = vpop.f32.mrf.mxu0  ;;  %v1339_v59 = vpack.c.bf16 %v3231_v44, %v3229_v4 }
 0x17b   : > { %v2217_v8 = vadd.f32 %v2828_v62, %v2149_v32  ;;  %v1529_v36 = vpop.f32.mrf.mxu2  ;;  %v1163_v5 = vpop.f32.mrf.mxu1  ;;  %v1772_v62 = vpack.c.bf16 %v3243_v10, %v3241_v9 }
 0x17c   : > { %v1649_v7 = vadd.f32 %v1529_v36, %v1161_v6  ;;  %2488 = vmatmul.msk.bf16.gmra.mxu0 %vm322_vm0, %v699_v29  ;;  %v1164_v18 = vadd.f32 %v1163_v5, %v892_v33  ;;  %v701_v29 = vpack.c.bf16 %v3241_v9, %v3213_v52  ;;  %v3299_v6 = vld [vmem:[#allocation2 + $0x1a8] sm:$0xff]  ;;  %v603_v36 = vpack.c.bf16 %v3229_v4, %v3201_v13 }
 0x17d   : > { %v2281_v14 = vmax.f32 %v2217_v8, 0.0 }
 0x17e   : > { %v1962_v11 = vpop.f32.mrf.mxu3  ;;  %2524 = vmatmul.msk.bf16.gmra.mxu1 %vm322_vm0, %v601_v48  ;;  %v3301_v48 = vld [vmem:[#allocation2 + $0x1b0] sm:$0xff] }
 0x17f   : > { %2345 = vst [vmem:[%s2846_s17 + $0xd0] sm:$0xff] %v2281_v14  ;;  %v2082_v12 = vadd.f32 %v1962_v11, %v1649_v7  ;;  %v1341_v9 = vpack.c.bf16 %v3301_v48, %v3299_v6  ;;  %v3311_v14 = vld [vmem:[#allocation2 + $0x1bc] sm:$0xff]  ;;  %v3313_v11 = vld [vmem:[#allocation2 + $0x1c4] sm:$0xff] }
 0x180   : > { %2560 = vmatmul.msk.bf16.gmra.mxu2 %vm322_vm0, %v1339_v59  ;;  %v1774_v4 = vpack.c.bf16 %v3313_v11, %v3311_v14 }
 0x181   : > { %v2150_v50 = vmul.f32 %v3253_v16, %v2082_v12  ;;  %v894_v51 = vpop.f32.mrf.mxu0 }
 0x183   : > { %v2218_v54 = vadd.f32 %v3259_v53, %v2150_v50  ;;  %2596 = vmatmul.msk.bf16.gmra.mxu3 %vm322_vm0, %v1772_v62  ;;  %v1532_v55 = vpop.f32.mrf.mxu2  ;;  %v1165_v56 = vpop.f32.mrf.mxu1 }
 0x184   : > { %v1650_v57 = vadd.f32 %v1532_v55, %v1164_v18  ;;  %v1166_v37 = vadd.f32 %v1165_v56, %v894_v51 }
 0x185   : > { %v2282_v58 = vmax.f32 %v2218_v54, 0.0 }
 0x186   : > { %v1965_v60 = vpop.f32.mrf.mxu3 }
 0x187   : > { %2346 = vst [vmem:[%s2846_s17 + $0xd8] sm:$0xff] %v2282_v58  ;;  %v2083_v61 = vadd.f32 %v1965_v60, %v1650_v57 }
 0x189   : > { %v2151_v2 = vmul.f32 %v3253_v16, %v2083_v61  ;;  %v897_v3 = vpop.f32.mrf.mxu0 }
 0x18b   : > { %v2219_v39 = vadd.f32 %v3259_v53, %v2151_v2  ;;  %v1534_v47 = vpop.f32.mrf.mxu2  ;;  %v1168_v35 = vpop.f32.mrf.mxu1 }
 0x18c   : > { %v1651_v38 = vadd.f32 %v1534_v47, %v1166_v37  ;;  %2489 = vmatmul.msk.bf16.gmra.mxu0 %vm322_vm0, %v700_v63  ;;  %v1169_v19 = vadd.f32 %v1168_v35, %v897_v3  ;;  %v702_v63 = vpack.c.bf16 %v3281_v41, %v3243_v10  ;;  %v3330_v37 = vld [vmem:[#allocation2 + $0x1b8] sm:$0xff]  ;;  %v604_v47 = vpack.c.bf16 %v3269_v34, %v3231_v44 }
 0x18d   : > { %v2283_v42 = vmax.f32 %v2219_v39, 0.0 }
 0x18e   : > { %v1967_v49 = vpop.f32.mrf.mxu3  ;;  %2525 = vmatmul.msk.bf16.gmra.mxu1 %vm322_vm0, %v602_v17  ;;  %v3332_v17 = vld [vmem:[#allocation2 + $0x1c0] sm:$0xff] }
 0x18f   : > { %2347 = vst [vmem:[%s2846_s17 + $0xe0] sm:$0xff] %v2283_v42  ;;  %v2084_v43 = vadd.f32 %v1967_v49, %v1651_v38  ;;  %v1342_v41 = vpack.c.bf16 %v3332_v17, %v3330_v37  ;;  %v3342_v42 = vld [vmem:[#allocation2 + $0x1cc] sm:$0xff]  ;;  %v3344_v49 = vld [vmem:[#allocation2 + $0x1d4] sm:$0xff] }
 0x190   : > { %2561 = vmatmul.msk.bf16.gmra.mxu2 %vm322_vm0, %v1340_v40  ;;  %v1775_v34 = vpack.c.bf16 %v3344_v49, %v3342_v42 }
 0x191   : > { %v2152_v20 = vmul.f32 %v3253_v16, %v2084_v43  ;;  %v899_v21 = vpop.f32.mrf.mxu0 }
 0x193   : > { %v2220_v22 = vadd.f32 %v3259_v53, %v2152_v20  ;;  %2597 = vmatmul.msk.bf16.gmra.mxu3 %vm322_vm0, %v1773_v46  ;;  %v1537_v23 = vpop.f32.mrf.mxu2  ;;  %v1170_v24 = vpop.f32.mrf.mxu1 }
 0x194   : > { %v1652_v25 = vadd.f32 %v1537_v23, %v1169_v19  ;;  %v1171_v8 = vadd.f32 %v1170_v24, %v899_v21 }
 0x195   : > { %v2284_v26 = vmax.f32 %v2220_v22, 0.0 }
 0x196   : > { %v1970_v27 = vpop.f32.mrf.mxu3 }
 0x197   : > { %2348 = vst [vmem:[%s2846_s17 + $0xe8] sm:$0xff] %v2284_v26  ;;  %v2085_v28 = vadd.f32 %v1970_v27, %v1652_v25 }
 0x199   : > { %v2153_v32 = vmul.f32 %v3253_v16, %v2085_v28  ;;  %v902_v33 = vpop.f32.mrf.mxu0 }
 0x19b   : > { %v2221_v52 = vadd.f32 %v3259_v53, %v2153_v32  ;;  %v1539_v5 = vpop.f32.mrf.mxu2  ;;  %v1173_v7 = vpop.f32.mrf.mxu1 }
 0x19c   : > { %v1653_v59 = vadd.f32 %v1539_v5, %v1171_v8  ;;  %2490 = vmatmul.msk.bf16.gmra.mxu0 %vm322_vm0, %v701_v29  ;;  %v1174_v18 = vadd.f32 %v1173_v7, %v902_v33  ;;  %v703_v29 = vpack.c.bf16 %v3311_v14, %v3283_v45  ;;  %v3365_v8 = vld [vmem:[#allocation2 + $0x1c8] sm:$0xff]  ;;  %v605_v5 = vpack.c.bf16 %v3299_v6, %v3271_v15 }
 0x19d   : > { %v2285_v12 = vmax.f32 %v2221_v52, 0.0 }
 0x19e   : > { %v1972_v62 = vpop.f32.mrf.mxu3  ;;  %2526 = vmatmul.msk.bf16.gmra.mxu1 %vm322_vm0, %v603_v36  ;;  %v3367_v36 = vld [vmem:[#allocation2 + $0x1d0] sm:$0xff] }
 0x19f   : > { %2349 = vst [vmem:[%s2846_s17 + $0xf0] sm:$0xff] %v2285_v12  ;;  %v2086_v13 = vadd.f32 %v1972_v62, %v1653_v59  ;;  %v1343_v14 = vpack.c.bf16 %v3367_v36, %v3365_v8  ;;  %v3377_v12 = vld [vmem:[#allocation2 + $0x1dc] sm:$0xff]  ;;  %v3379_v62 = vld [vmem:[#allocation2 + $0x1e4] sm:$0xff] }
 0x1a0   : > { %2562 = vmatmul.msk.bf16.gmra.mxu2 %vm322_vm0, %v1341_v9  ;;  %v1776_v6 = vpack.c.bf16 %v3379_v62, %v3377_v12 }
 0x1a1   : > { %v2154_v50 = vmul.f32 %v3253_v16, %v2086_v13  ;;  %v904_v51 = vpop.f32.mrf.mxu0 }
 0x1a3   : > { %v2222_v54 = vadd.f32 %v3259_v53, %v2154_v50  ;;  %2598 = vmatmul.msk.bf16.gmra.mxu3 %vm322_vm0, %v1774_v4  ;;  %v1542_v55 = vpop.f32.mrf.mxu2  ;;  %v1175_v56 = vpop.f32.mrf.mxu1 }
 0x1a4   : > { %v1654_v57 = vadd.f32 %v1542_v55, %v1174_v18  ;;  %v1176_v39 = vadd.f32 %v1175_v56, %v904_v51 }
 0x1a5   : > { %v2286_v58 = vmax.f32 %v2222_v54, 0.0 }
 0x1a6   : > { %v1975_v60 = vpop.f32.mrf.mxu3 }
 0x1a7   : > { %2350 = vst [vmem:[%s2846_s17 + $0xf8] sm:$0xff] %v2286_v58  ;;  %v2087_v61 = vadd.f32 %v1975_v60, %v1654_v57 }
 0x1a9   : > { %v2155_v2 = vmul.f32 %v3253_v16, %v2087_v61  ;;  %v907_v3 = vpop.f32.mrf.mxu0 }
 0x1ab   : > { %v2223_v10 = vadd.f32 %v3259_v53, %v2155_v2  ;;  %v1544_v35 = vpop.f32.mrf.mxu2  ;;  %v1178_v38 = vpop.f32.mrf.mxu1  ;;  %v3393_v2 = vld [vmem:[#allocation2 + $0x1d8] sm:$0xff] }
 0x1ac   : > { %v1655_v40 = vadd.f32 %v1544_v35, %v1176_v39  ;;  %2491 = vmatmul.msk.bf16.gmra.mxu0 %vm322_vm0, %v702_v63  ;;  %v1179_v19 = vadd.f32 %v1178_v38, %v907_v3  ;;  %v704_v63 = vpack.c.bf16 %v3342_v42, %v3313_v11  ;;  %v3395_v3 = vld [vmem:[#allocation2 + $0x1e0] sm:$0xff]  ;;  %v3403_v42 = vld [vmem:[#allocation2 + $0x1f4] sm:$0xff] }
 0x1ad   : > { %v2287_v43 = vmax.f32 %v2223_v10, 0.0  ;;  %v1344_v11 = vpack.c.bf16 %v3395_v3, %v3393_v2 }
 0x1ae   : > { %v1977_v46 = vpop.f32.mrf.mxu3  ;;  %2527 = vmatmul.msk.bf16.gmra.mxu1 %vm322_vm0, %v604_v47  ;;  %v606_v47 = vpack.c.bf16 %v3330_v37, %v3301_v48 }
 0x1af   : > { %2351 = vst [vmem:[%s2846_s17 + $0x100] sm:$0xff] %v2287_v43  ;;  %v2088_v44 = vadd.f32 %v1977_v46, %v1655_v40 }
 0x1b0   : > { %2563 = vmatmul.msk.bf16.gmra.mxu2 %vm322_vm0, %v1342_v41  ;;  %v1740_v41 = vld [vmem:[#allocation2 + $0x1ec] sm:$0xff] }
 0x1b1   : > { %v2156_v20 = vmul.f32 %v3253_v16, %v2088_v44  ;;  %v909_v21 = vpop.f32.mrf.mxu0  ;;  %v1777_v37 = vpack.c.bf16 %v3403_v42, %v1740_v41 }
 0x1b3   : > { %v2224_v22 = vadd.f32 %v3259_v53, %v2156_v20  ;;  %2599 = vmatmul.msk.bf16.gmra.mxu3 %vm322_vm0, %v1775_v34  ;;  %v1547_v23 = vpop.f32.mrf.mxu2  ;;  %v1180_v24 = vpop.f32.mrf.mxu1 }
 0x1b4   : > { %v1656_v25 = vadd.f32 %v1547_v23, %v1179_v19  ;;  %v1181_v52 = vadd.f32 %v1180_v24, %v909_v21 }
 0x1b5   : > { %v2288_v26 = vmax.f32 %v2224_v22, 0.0 }
 0x1b6   : > { %v1980_v27 = vpop.f32.mrf.mxu3 }
 0x1b7   : > { %2352 = vst [vmem:[%s2846_s17 + $0x108] sm:$0xff] %v2288_v26  ;;  %v2089_v28 = vadd.f32 %v1980_v27, %v1656_v25  ;;  %v705_v27 = vpack.c.bf16 %v3377_v12, %v3344_v49  ;;  %v1345_v49 = vpack.c.bf16 %v3418_v31, %v3416_v30 }
 0x1b9   : > { %v2157_v32 = vmul.f32 %v3253_v16, %v2089_v28  ;;  %v912_v33 = vpop.f32.mrf.mxu0 }
 0x1bb   : > { %v2225_v45 = vadd.f32 %v3259_v53, %v2157_v32  ;;  %v1549_v7 = vpop.f32.mrf.mxu2  ;;  %v1183_v59 = vpop.f32.mrf.mxu1 }
 0x1bc   : > { %v1657_v9 = vadd.f32 %v1549_v7, %v1181_v52  ;;  %2492 = vmatmul.msk.bf16.gmra.mxu0 %vm322_vm0, %v703_v29  ;;  %v1184_v18 = vadd.f32 %v1183_v59, %v912_v33  ;;  %v607_v33 = vpack.c.bf16 %v3365_v8, %v3332_v17  ;;  %v1742_v59 = vld [vmem:[#allocation2 + $0x1fc] sm:$0xff] }
 0x1bd   : > { %v2289_v13 = vmax.f32 %v2225_v45, 0.0 }
 0x1be   : > { %v1982_v4 = vpop.f32.mrf.mxu3  ;;  %2528 = vmatmul.msk.bf16.gmra.mxu1 %vm322_vm0, %v605_v5 }
 0x1bf   : > { %2353 = vst [vmem:[%s2846_s17 + $0x110] sm:$0xff] %v2289_v13  ;;  %v2090_v15 = vadd.f32 %v1982_v4, %v1657_v9  ;;  %v3426_v9 = vld [vmem:[#allocation2 + $0x204] sm:$0xff] }
 0x1c0   : > { %2564 = vmatmul.msk.bf16.gmra.mxu2 %vm322_vm0, %v1343_v14  ;;  %v1778_v8 = vpack.c.bf16 %v3426_v9, %v1742_v59 }
 0x1c1   : > { %v2158_v50 = vmul.f32 %v3253_v16, %v2090_v15  ;;  %v914_v51 = vpop.f32.mrf.mxu0 }
 0x1c3   : > { %v2226_v54 = vadd.f32 %v3259_v53, %v2158_v50  ;;  %2600 = vmatmul.msk.bf16.gmra.mxu3 %vm322_vm0, %v1776_v6  ;;  %v1552_v55 = vpop.f32.mrf.mxu2  ;;  %v1185_v56 = vpop.f32.mrf.mxu1 }
 0x1c4   : > { %v1658_v57 = vadd.f32 %v1552_v55, %v1184_v18  ;;  %v1186_v39 = vadd.f32 %v1185_v56, %v914_v51  ;;  %v3437_v56 = vld [vmem:[#allocation2 + $0x1f8] sm:$0xff] }
 0x1c5   : > { %v2290_v58 = vmax.f32 %v2226_v54, 0.0  ;;  %v706_v54 = vpack.c.bf16 %v1740_v41, %v3379_v62 }
 0x1c6   : > { %v1985_v60 = vpop.f32.mrf.mxu3 }
 0x1c7   : > { %2354 = vst [vmem:[%s2846_s17 + $0x118] sm:$0xff] %v2290_v58  ;;  %v2091_v61 = vadd.f32 %v1985_v60, %v1658_v57  ;;  %v1312_v57 = vld [vmem:[#allocation2 + $0x200] sm:$0xff]  ;;  %v608_v58 = vpack.c.bf16 %v3393_v2, %v3367_v36 }
 0x1c9   : > { %v2159_v0 = vmul.f32 %v3253_v16, %v2091_v61  ;;  %v917_v1 = vpop.f32.mrf.mxu0 }
 0x1cb   : > { %v2227_v10 = vadd.f32 %v3259_v53, %v2159_v0  ;;  %v1554_v35 = vpop.f32.mrf.mxu2  ;;  %v1188_v38 = vpop.f32.mrf.mxu1  ;;  %v1346_v0 = vpack.c.bf16 %v1312_v57, %v3437_v56 }
 0x1cc   : > { %v1659_v40 = vadd.f32 %v1554_v35, %v1186_v39  ;;  %2493 = vmatmul.msk.bf16.gmra.mxu0 %vm322_vm0, %v704_v63  ;;  %v1189_v44 = vadd.f32 %v1188_v38, %v917_v1 }
 0x1cd   : > { %v2291_v43 = vmax.f32 %v2227_v10, 0.0 }
 0x1ce   : > { %v1987_v46 = vpop.f32.mrf.mxu3  ;;  %2529 = vmatmul.msk.bf16.gmra.mxu1 %vm322_vm0, %v606_v47 }
 0x1cf   : > { %2355 = vst [vmem:[%s2846_s17 + $0x120] sm:$0xff] %v2291_v43  ;;  %v2092_v48 = vadd.f32 %v1987_v46, %v1659_v40 }
 0x1d0   : > { %2565 = vmatmul.msk.bf16.gmra.mxu2 %vm322_vm0, %v1344_v11 }
 0x1d1   : > { %v2160_v34 = vmul.f32 %v3253_v16, %v2092_v48  ;;  %v919_v19 = vpop.f32.mrf.mxu0  ;;  %v707_v48 = vpack.c.bf16 %v1742_v59, %v3403_v42 }
 0x1d3   : > { %v2228_v20 = vadd.f32 %v3259_v53, %v2160_v34  ;;  %2601 = vmatmul.msk.bf16.gmra.mxu3 %vm322_vm0, %v1777_v37  ;;  %v1557_v21 = vpop.f32.mrf.mxu2  ;;  %v1190_v22 = vpop.f32.mrf.mxu1 }
 0x1d4   : > { %v1660_v23 = vadd.f32 %v1557_v21, %v1189_v44  ;;  %v1191_v32 = vadd.f32 %v1190_v22, %v919_v19  ;;  %v609_v19 = vpack.c.bf16 %v3416_v30, %v3395_v3 }
 0x1d5   : > { %v2292_v24 = vmax.f32 %v2228_v20, 0.0 }
 0x1d6   : > { %v1990_v25 = vpop.f32.mrf.mxu3 }
 0x1d7   : > { %2356 = vst [vmem:[%s2846_s17 + $0x128] sm:$0xff] %v2292_v24  ;;  %v2093_v26 = vadd.f32 %v1990_v25, %v1660_v23 }
 0x1d9   : > { %v2161_v28 = vmul.f32 %v3253_v16, %v2093_v26  ;;  %v922_v29 = vpop.f32.mrf.mxu0 }
 0x1db   : > { %v2229_v52 = vadd.f32 %v3259_v53, %v2161_v28  ;;  %v1559_v5 = vpop.f32.mrf.mxu2  ;;  %v1193_v45 = vpop.f32.mrf.mxu1 }
 0x1dc   : > { %v1661_v7 = vadd.f32 %v1559_v5, %v1191_v32  ;;  %2494 = vmatmul.msk.bf16.gmra.mxu0 %vm322_vm0, %v705_v27  ;;  %v1194_v63 = vadd.f32 %v1193_v45, %v922_v29 }
 0x1dd   : > { %v2293_v14 = vmax.f32 %v2229_v52, 0.0 }
 0x1de   : > { %v1992_v12 = vpop.f32.mrf.mxu3  ;;  %2530 = vmatmul.msk.bf16.gmra.mxu1 %vm322_vm0, %v607_v33  ;;  %v389_v33 = vld [vmem:[%s3357_s27 + $0x10] sm:$0xff] }
 0x1df   : > { %2357 = vst [vmem:[%s2846_s17 + $0x130] sm:$0xff] %v2293_v14  ;;  %v2094_v17 = vadd.f32 %v1992_v12, %v1661_v7  ;;  %v390_v7 = vld [vmem:[%s3357_s27 + $0x18] sm:$0xff] }
 0x1e0   : > { %2566 = vmatmul.msk.bf16.gmra.mxu2 %vm322_vm0, %v1345_v49  ;;  %453 = vst.msk [vmem:[#allocation2 + $0x210] sm:$0xff] %vm322_vm0, %v389_v33 }
 0x1e1   : > { %v2162_v13 = vmul.f32 %v3253_v16, %v2094_v17  ;;  %v924_v4 = vpop.f32.mrf.mxu0  ;;  %454 = vst.msk [vmem:[#allocation2 + $0x218] sm:$0xff] %vm322_vm0, %v390_v7  ;;  %v391_v17 = vld [vmem:[%s3357_s27 + $0x20] sm:$0xff] }
 0x1e2   : > { %455 = vst.msk [vmem:[#allocation2 + $0x220] sm:$0xff] %vm322_vm0, %v391_v17 }
 0x1e3   : > { %v2230_v15 = vadd.f32 %v3259_v53, %v2162_v13  ;;  %2602 = vmatmul.msk.bf16.gmra.mxu3 %vm322_vm0, %v1778_v8  ;;  %v1562_v6 = vpop.f32.mrf.mxu2  ;;  %v1195_v18 = vpop.f32.mrf.mxu1  ;;  %v392_v13 = vld [vmem:[%s3357_s27 + $0x28] sm:$0xff] }
 0x1e4   : > { %v1196_v39 = vadd.f32 %v1195_v18, %v924_v4  ;;  %v1662_v47 = vadd.f32 %v1562_v6, %v1194_v63  ;;  %v393_v6 = vld [vmem:[%s3357_s27 + $0x30] sm:$0xff]  ;;  %456 = vst.msk [vmem:[#allocation2 + $0x228] sm:$0xff] %vm322_vm0, %v392_v13 }
 0x1e5   : > { %v2294_v50 = vmax.f32 %v2230_v15, 0.0  ;;  %457 = vst.msk [vmem:[#allocation2 + $0x230] sm:$0xff] %vm322_vm0, %v393_v6 }
 0x1e6   : > { %v1995_v51 = vpop.f32.mrf.mxu3 }
 0x1e7   : > { %2358 = vst [vmem:[%s2846_s17 + $0x138] sm:$0xff] %v2294_v50  ;;  %v2095_v36 = vadd.f32 %v1995_v51, %v1662_v47  ;;  %v610_v50 = vpack.c.bf16 %v3437_v56, %v3418_v31  ;;  %v394_v51 = vld [vmem:[%s3357_s27 + $0x38] sm:$0xff]  ;;  %v1314_v63 = vld [vmem:[#allocation2 + $0x210] sm:$0xff] }
 0x1e8   : > { %458 = vst.msk [vmem:[#allocation2 + $0x238] sm:$0xff] %vm322_vm0, %v394_v51 }
 0x1e9   : > { %v927_v55 = vpop.f32.mrf.mxu0  ;;  %v2163_v43 = vmul.f32 %v3253_v16, %v2095_v36 }
 0x1eb   : > { %v1564_v60 = vpop.f32.mrf.mxu2  ;;  %v1198_v61 = vpop.f32.mrf.mxu1  ;;  %v2231_v22 = vadd.f32 %v3259_v53, %v2163_v43 }
 0x1ec   : > { %2495 = vmatmul.msk.bf16.gmra.mxu0 %vm322_vm0, %v706_v54  ;;  %v1199_v62 = vadd.f32 %v1198_v61, %v927_v55  ;;  %v1663_v10 = vadd.f32 %v1564_v60, %v1196_v39  ;;  %v1313_v54 = vld [vmem:[#allocation2 + $0x208] sm:$0xff] }
 0x1ed   : > { %v2295_v3 = vmax.f32 %v2231_v22, 0.0  ;;  %v1744_v61 = vld [vmem:[#allocation2 + $0x20c] sm:$0xff]  ;;  %v1347_v39 = vpack.c.bf16 %v1314_v63, %v1313_v54 }
 0x1ee   : > { %v1997_v1 = vpop.f32.mrf.mxu3  ;;  %2531 = vmatmul.msk.bf16.gmra.mxu1 %vm322_vm0, %v608_v58  ;;  %v708_v56 = vpack.c.bf16 %v1744_v61, %v3426_v9 }
 0x1ef   : > { %v2096_v11 = vadd.f32 %v1997_v1, %v1663_v10  ;;  %2359 = vst [vmem:[%s2846_s17 + $0x140] sm:$0xff] %v2295_v3  ;;  %v1745_v1 = vld [vmem:[#allocation2 + $0x214] sm:$0xff] }
 0x1f0   : > { %2567 = vmatmul.msk.bf16.gmra.mxu2 %vm322_vm0, %v1346_v0  ;;  %v1779_v47 = vpack.c.bf16 %v1745_v1, %v1744_v61  ;;  %v1749_v17 = vld [vmem:[#allocation2 + $0x234] sm:$0xff] }
 0x1f1   : > { %v929_v35 = vpop.f32.mrf.mxu0  ;;  %v2164_v37 = vmul.f32 %v3253_v16, %v2096_v11 }
 0x1f3   : > { %v1567_v38 = vpop.f32.mrf.mxu2  ;;  %v1200_v40 = vpop.f32.mrf.mxu1  ;;  %v2232_v42 = vadd.f32 %v3259_v53, %v2164_v37  ;;  %2603 = vmatmul.msk.bf16.gmra.mxu3 %vm322_vm0, %v1779_v47 }
 0x1f4   : > { %v1664_v2 = vadd.f32 %v1567_v38, %v1199_v62  ;;  %v1201_v34 = vadd.f32 %v1200_v40, %v929_v35 }
 0x1f5   : > { %v2296_v29 = vmax.f32 %v2232_v42, 0.0 }
 0x1f6   : > { %v2000_v41 = vpop.f32.mrf.mxu3 }
 0x1f7   : > { %v2097_v46 = vadd.f32 %v2000_v41, %v1664_v2  ;;  %2360 = vst [vmem:[%s2846_s17 + $0x148] sm:$0xff] %v2296_v29 }
 0x1f9   : > { %v932_v44 = vpop.f32.mrf.mxu0  ;;  %v2165_v23 = vmul.f32 %v3253_v16, %v2097_v46  ;;  %v1315_v46 = vld [vmem:[#allocation2 + $0x218] sm:$0xff] }
 0x1fb   : > { %v1569_v20 = vpop.f32.mrf.mxu2  ;;  %v1203_v21 = vpop.f32.mrf.mxu1  ;;  %v2233_v27 = vadd.f32 %v3259_v53, %v2165_v23 }
 0x1fc   : > { %v1665_v24 = vadd.f32 %v1569_v20, %v1201_v34  ;;  %2496 = vmatmul.msk.bf16.gmra.mxu0 %vm322_vm0, %v707_v48  ;;  %v1204_v28 = vadd.f32 %v1203_v21, %v932_v44  ;;  %v1316_v48 = vld [vmem:[#allocation2 + $0x220] sm:$0xff] }
 0x1fd   : > { %v2297_v49 = vmax.f32 %v2233_v27, 0.0  ;;  %v1746_v34 = vld [vmem:[#allocation2 + $0x21c] sm:$0xff] }
 0x1fe   : > { %v2002_v25 = vpop.f32.mrf.mxu3  ;;  %2532 = vmatmul.msk.bf16.gmra.mxu1 %vm322_vm0, %v609_v19  ;;  %v1747_v19 = vld [vmem:[#allocation2 + $0x224] sm:$0xff] }
 0x1ff   : > { %v2098_v26 = vadd.f32 %v2002_v25, %v1665_v24  ;;  %2361 = vst [vmem:[%s2846_s17 + $0x150] sm:$0xff] %v2297_v49  ;;  %v1348_v24 = vpack.c.bf16 %v1316_v48, %v1315_v46  ;;  %v1780_v25 = vpack.c.bf16 %v1747_v19, %v1746_v34 }
 0x200   : > { %2568 = vmatmul.msk.bf16.gmra.mxu2 %vm322_vm0, %v1347_v39 }
 0x201   : > { %v2166_v30 = vmul.f32 %v3253_v16, %v2098_v26  ;;  %v934_v32 = vpop.f32.mrf.mxu0 }
 0x203   : > { %v2234_v52 = vadd.f32 %v3259_v53, %v2166_v30  ;;  %v1572_v5 = vpop.f32.mrf.mxu2  ;;  %v1205_v45 = vpop.f32.mrf.mxu1  ;;  %2604 = vmatmul.msk.bf16.gmra.mxu3 %vm322_vm0, %v1780_v25 }
 0x204   : > { %v1666_v59 = vadd.f32 %v1572_v5, %v1204_v28  ;;  %v1206_v18 = vadd.f32 %v1205_v45, %v934_v32 }
 0x205   : > { %v2298_v14 = vmax.f32 %v2234_v52, 0.0 }
 0x206   : > { %v2005_v12 = vpop.f32.mrf.mxu3 }
 0x207   : > { %v2099_v8 = vadd.f32 %v2005_v12, %v1666_v59  ;;  %2362 = vst [vmem:[%s2846_s17 + $0x158] sm:$0xff] %v2298_v14  ;;  %v1748_v12 = vld [vmem:[#allocation2 + $0x22c] sm:$0xff] }
 0x209   : > { %v2167_v4 = vmul.f32 %v3253_v16, %v2099_v8  ;;  %v937_v15 = vpop.f32.mrf.mxu0 }
 0x20b   : > { %v2235_v55 = vadd.f32 %v3259_v53, %v2167_v4  ;;  %v1574_v57 = vpop.f32.mrf.mxu2  ;;  %v1208_v58 = vpop.f32.mrf.mxu1 }
 0x20c   : > { %v1667_v60 = vadd.f32 %v1574_v57, %v1206_v18  ;;  %v1209_v10 = vadd.f32 %v1208_v58, %v937_v15  ;;  %2497 = vmatmul.msk.bf16.gmra.mxu0 %vm322_vm0, %v708_v56  ;;  %v1781_v18 = vpack.c.bf16 %v1749_v17, %v1748_v12 }
 0x20d   : > { %v2299_v0 = vmax.f32 %v2235_v55, 0.0 }
 0x20e   : > { %v2007_v31 = vpop.f32.mrf.mxu3  ;;  %2533 = vmatmul.msk.bf16.gmra.mxu1 %vm322_vm0, %v610_v50 }
 0x20f   : > { %2363 = vst [vmem:[%s2846_s17 + $0x160] sm:$0xff] %v2299_v0  ;;  %v2100_v62 = vadd.f32 %v2007_v31, %v1667_v60 }
 0x210   : > { %2569 = vmatmul.msk.bf16.gmra.mxu2 %vm322_vm0, %v1348_v24 }
 0x211   : > { %v2168_v35 = vmul.f32 %v3253_v16, %v2100_v62  ;;  %v939_v38 = vpop.f32.mrf.mxu0 }
 0x213   : > { %v2236_v40 = vadd.f32 %v3259_v53, %v2168_v35  ;;  %v1577_v36 = vpop.f32.mrf.mxu2  ;;  %v1210_v9 = vpop.f32.mrf.mxu1  ;;  %2605 = vmatmul.msk.bf16.gmra.mxu3 %vm322_vm0, %v1781_v18 }
 0x214   : > { %v1668_v2 = vadd.f32 %v1577_v36, %v1209_v10  ;;  %v1211_v20 = vadd.f32 %v1210_v9, %v939_v38 }
 0x215   : > { %v2300_v11 = vmax.f32 %v2236_v40, 0.0 }
 0x216   : > { %v2010_v41 = vpop.f32.mrf.mxu3 }
 0x217   : > { %2364 = vst [vmem:[%s2846_s17 + $0x168] sm:$0xff] %v2300_v11  ;;  %v2101_v43 = vadd.f32 %v2010_v41, %v1668_v2  ;;  %v3508_v41 = vld [vmem:[%s3560_s3] ss:$0 sm:$0xff] }
 0x219   : > { %v2169_v37 = vmul.f32 %v3253_v16, %v2101_v43  ;;  %v942_v44 = vpop.f32.mrf.mxu0 }
 0x21b   : > { %v2237_v21 = vadd.f32 %v3259_v53, %v2169_v37  ;;  %v1579_v22 = vpop.f32.mrf.mxu2  ;;  %v1213_v23 = vpop.f32.mrf.mxu1 }
 0x21c   : > { %v1669_v42 = vadd.f32 %v1579_v22, %v1211_v20  ;;  %v1214_v28 = vadd.f32 %v1213_v23, %v942_v44 }
 0x21d   : > { %v2301_v26 = vmax.f32 %v2237_v21, 0.0 }
 0x21e   : > { %v2012_v3 = vpop.f32.mrf.mxu3 }
 0x21f   : > { %2365 = vst [vmem:[%s2846_s17 + $0x170] sm:$0xff] %v2301_v26  ;;  %v2102_v27 = vadd.f32 %v2012_v3, %v1669_v42 }
 0x221   : > { %v2170_v29 = vmul.f32 %v3253_v16, %v2102_v27  ;;  %v944_v30 = vpop.f32.mrf.mxu0 }
 0x223   : > { %v2238_v32 = vadd.f32 %v3259_v53, %v2170_v29  ;;  %v1582_v33 = vpop.f32.mrf.mxu2  ;;  %v1215_v52 = vpop.f32.mrf.mxu1 }
 0x224   : > { %v1670_v5 = vadd.f32 %v1582_v33, %v1214_v28  ;;  %v1216_v8 = vadd.f32 %v1215_v52, %v944_v30 }
 0x225   : > { %v2302_v45 = vmax.f32 %v2238_v32, 0.0 }
 0x226   : > { %v2015_v7 = vpop.f32.mrf.mxu3 }
 0x227   : > { %2366 = vst [vmem:[%s2846_s17 + $0x178] sm:$0xff] %v2302_v45  ;;  %v2103_v49 = vadd.f32 %v2015_v7, %v1670_v5 }
 0x229   : > { %v2171_v59 = vmul.f32 %v3253_v16, %v2103_v49  ;;  %v947_v14 = vpop.f32.mrf.mxu0 }
 0x22b   : > { %v2239_v13 = vadd.f32 %v3259_v53, %v2171_v59  ;;  %v1584_v4 = vpop.f32.mrf.mxu2  ;;  %v1218_v15 = vpop.f32.mrf.mxu1 }
 0x22c   : > { %v1671_v6 = vadd.f32 %v1584_v4, %v1216_v8  ;;  %v1219_v55 = vadd.f32 %v1218_v15, %v947_v14 }
 0x22d   : > { %v2303_v50 = vmax.f32 %v2239_v13, 0.0 }
 0x22e   : > { %v2017_v51 = vpop.f32.mrf.mxu3 }
 0x22f   : > { %2367 = vst [vmem:[%s2846_s17 + $0x180] sm:$0xff] %v2303_v50  ;;  %v2104_v54 = vadd.f32 %v2017_v51, %v1671_v6 }
 0x231   : > { %v2172_v57 = vmul.f32 %v3253_v16, %v2104_v54  ;;  %v949_v58 = vpop.f32.mrf.mxu0 }
 0x233   : > { %v2240_v60 = vadd.f32 %v3259_v53, %v2172_v57  ;;  %v1587_v61 = vpop.f32.mrf.mxu2  ;;  %v1220_v63 = vpop.f32.mrf.mxu1 }
 0x234   : > { %v1672_v0 = vadd.f32 %v1587_v61, %v1219_v55  ;;  %v1221_v62 = vadd.f32 %v1220_v63, %v949_v58 }
 0x235   : > { %v2304_v1 = vmax.f32 %v2240_v60, 0.0 }
 0x236   : > { %v2020_v39 = vpop.f32.mrf.mxu3 }
 0x237   : > { %2368 = vst [vmem:[%s2846_s17 + $0x188] sm:$0xff] %v2304_v1  ;;  %v2105_v31 = vadd.f32 %v2020_v39, %v1672_v0 }
 0x239   : > { %v2173_v56 = vmul.f32 %v3253_v16, %v2105_v31  ;;  %v952_v47 = vpop.f32.mrf.mxu0 }
 0x23b   : > { %v2241_v10 = vadd.f32 %v3259_v53, %v2173_v56  ;;  %v1589_v35 = vpop.f32.mrf.mxu2  ;;  %v1223_v38 = vpop.f32.mrf.mxu1  ;;  %v3514_v53 = vld [vmem:[%s3561_s4] ss:$0 sm:$0xff] }
 0x23c   : > { %v1673_v40 = vadd.f32 %v1589_v35, %v1221_v62  ;;  %v1224_v11 = vadd.f32 %v1223_v38, %v952_v47 }
 0x23d   : > { %v2305_v36 = vmax.f32 %v2241_v10, 0.0 }
 0x23e   : > { %v2022_v9 = vpop.f32.mrf.mxu3 }
 0x23f   : > { %2369 = vst [vmem:[%s2846_s17 + $0x190] sm:$0xff] %v2305_v36  ;;  %v2106_v2 = vadd.f32 %v2022_v9, %v1673_v40 }
 0x241   : > { %v2174_v16 = vmul.f32 %v3508_v41, %v2106_v2  ;;  %v954_v43 = vpop.f32.mrf.mxu0 }
 0x243   : > { %v2242_v46 = vadd.f32 %v3514_v53, %v2174_v16  ;;  %v1592_v48 = vpop.f32.mrf.mxu2  ;;  %v1225_v37 = vpop.f32.mrf.mxu1 }
 0x244   : > { %v1674_v44 = vadd.f32 %v1592_v48, %v1224_v11  ;;  %v1226_v23 = vadd.f32 %v1225_v37, %v954_v43 }
 0x245   : > { %v2306_v34 = vmax.f32 %v2242_v46, 0.0 }
 0x246   : > { %v2025_v19 = vpop.f32.mrf.mxu3 }
 0x247   : > { %2370 = vst [vmem:[%s2846_s17 + $0x198] sm:$0xff] %v2306_v34  ;;  %v2107_v20 = vadd.f32 %v2025_v19, %v1674_v44 }
 0x249   : > { %v2175_v21 = vmul.f32 %v3508_v41, %v2107_v20  ;;  %v957_v22 = vpop.f32.mrf.mxu0 }
 0x24b   : > { %v2243_v24 = vadd.f32 %v3514_v53, %v2175_v21  ;;  %v1594_v42 = vpop.f32.mrf.mxu2  ;;  %v1228_v25 = vpop.f32.mrf.mxu1 }
 0x24c   : > { %v1675_v26 = vadd.f32 %v1594_v42, %v1226_v23  ;;  %v1229_v29 = vadd.f32 %v1228_v25, %v957_v22 }
 0x24d   : > { %v2307_v3 = vmax.f32 %v2243_v24, 0.0 }
 0x24e   : > { %v2027_v27 = vpop.f32.mrf.mxu3 }
 0x24f   : > { %2371 = vst [vmem:[%s2846_s17 + $0x1a0] sm:$0xff] %v2307_v3  ;;  %v2108_v28 = vadd.f32 %v2027_v27, %v1675_v26 }
 0x251   : > { %v2176_v30 = vmul.f32 %v3508_v41, %v2108_v28  ;;  %v959_v32 = vpop.f32.mrf.mxu0 }
 0x253   : > { %v2244_v33 = vadd.f32 %v3514_v53, %v2176_v30  ;;  %v1597_v52 = vpop.f32.mrf.mxu2  ;;  %v1230_v5 = vpop.f32.mrf.mxu1 }
 0x254   : > { %v1676_v45 = vadd.f32 %v1597_v52, %v1229_v29  ;;  %v1231_v12 = vadd.f32 %v1230_v5, %v959_v32 }
 0x255   : > { %v2308_v7 = vmax.f32 %v2244_v33, 0.0 }
 0x256   : > { %v2030_v49 = vpop.f32.mrf.mxu3 }
 0x257   : > { %2372 = vst [vmem:[%s2846_s17 + $0x1a8] sm:$0xff] %v2308_v7  ;;  %v2109_v59 = vadd.f32 %v2030_v49, %v1676_v45 }
 0x259   : > { %v2177_v14 = vmul.f32 %v3508_v41, %v2109_v59  ;;  %v962_v15 = vpop.f32.mrf.mxu0 }
 0x25b   : > { %v2245_v17 = vadd.f32 %v3514_v53, %v2177_v14  ;;  %v1599_v8 = vpop.f32.mrf.mxu2  ;;  %v1233_v6 = vpop.f32.mrf.mxu1 }
 0x25c   : > { %v1677_v13 = vadd.f32 %v1599_v8, %v1231_v12  ;;  %v1234_v51 = vadd.f32 %v1233_v6, %v962_v15 }
 0x25d   : > { %v2309_v4 = vmax.f32 %v2245_v17, 0.0 }
 0x25e   : > { %v2032_v18 = vpop.f32.mrf.mxu3 }
 0x25f   : > { %2373 = vst [vmem:[%s2846_s17 + $0x1b0] sm:$0xff] %v2309_v4  ;;  %v2110_v50 = vadd.f32 %v2032_v18, %v1677_v13 }
 0x261   : > { %v2178_v54 = vmul.f32 %v3508_v41, %v2110_v50  ;;  %v964_v0 = vpop.f32.mrf.mxu0 }
 0x263   : > { %v2246_v55 = vadd.f32 %v3514_v53, %v2178_v54  ;;  %v1602_v57 = vpop.f32.mrf.mxu2  ;;  %v1235_v1 = vpop.f32.mrf.mxu1 }
 0x264   : > { %v1678_v58 = vadd.f32 %v1602_v57, %v1234_v51  ;;  %v1236_v31 = vadd.f32 %v1235_v1, %v964_v0 }
 0x265   : > { %v2310_v60 = vmax.f32 %v2246_v55, 0.0 }
 0x266   : > { %v2035_v61 = vpop.f32.mrf.mxu3 }
 0x267   : > { %2374 = vst [vmem:[%s2846_s17 + $0x1b8] sm:$0xff] %v2310_v60  ;;  %v2111_v63 = vadd.f32 %v2035_v61, %v1678_v58 }
 0x269   : > { %v2179_v39 = vmul.f32 %v3508_v41, %v2111_v63  ;;  %v967_v2 = vpop.f32.mrf.mxu0 }
 0x26b   : > { %v2247_v56 = vadd.f32 %v3514_v53, %v2179_v39  ;;  %v1604_v47 = vpop.f32.mrf.mxu2  ;;  %v1238_v11 = vpop.f32.mrf.mxu1 }
 0x26c   : > { %v1679_v62 = vadd.f32 %v1604_v47, %v1236_v31  ;;  %v1239_v48 = vadd.f32 %v1238_v11, %v967_v2 }
 0x26d   : > { %v2311_v10 = vmax.f32 %v2247_v56, 0.0 }
 0x26e   : > { %v2037_v35 = vpop.f32.mrf.mxu3 }
 0x26f   : > { %2375 = vst [vmem:[%s2846_s17 + $0x1c0] sm:$0xff] %v2311_v10  ;;  %v2112_v38 = vadd.f32 %v2037_v35, %v1679_v62 }
 0x271   : > { %v2180_v40 = vmul.f32 %v3508_v41, %v2112_v38  ;;  %v969_v43 = vpop.f32.mrf.mxu0 }
 0x273   : > { %v2248_v36 = vadd.f32 %v3514_v53, %v2180_v40  ;;  %v1607_v16 = vpop.f32.mrf.mxu2  ;;  %v1240_v46 = vpop.f32.mrf.mxu1 }
 0x274   : > { %v1680_v44 = vadd.f32 %v1607_v16, %v1239_v48  ;;  %v1241_v23 = vadd.f32 %v1240_v46, %v969_v43 }
 0x275   : > { %v2312_v9 = vmax.f32 %v2248_v36, 0.0 }
 0x276   : > { %v2040_v34 = vpop.f32.mrf.mxu3 }
 0x277   : > { %2376 = vst [vmem:[%s2846_s17 + $0x1c8] sm:$0xff] %v2312_v9  ;;  %v2113_v19 = vadd.f32 %v2040_v34, %v1680_v44 }
 0x279   : > { %v972_v20 = vpop.f32.mrf.mxu0  ;;  %v2181_v22 = vmul.f32 %v3508_v41, %v2113_v19 }
 0x27b   : > { %v1609_v37 = vpop.f32.mrf.mxu2  ;;  %v1243_v21 = vpop.f32.mrf.mxu1  ;;  %v2249_v42 = vadd.f32 %v3514_v53, %v2181_v22 }
 0x27c   : > { %v1681_v25 = vadd.f32 %v1609_v37, %v1241_v23  ;;  %v1244_v28 = vadd.f32 %v1243_v21, %v972_v20 }
 0x27d   : > { %v2313_v26 = vmax.f32 %v2249_v42, 0.0 }
 0x27e   : > { %v2042_v3 = vpop.f32.mrf.mxu3 }
 0x27f   : > { %2377 = vst [vmem:[%s2846_s17 + $0x1d0] sm:$0xff] %v2313_v26  ;;  %v2114_v27 = vadd.f32 %v2042_v3, %v1681_v25 }
 0x281   : > { %v2182_v29 = vmul.f32 %v3508_v41, %v2114_v27  ;;  %v974_v30 = vpop.f32.mrf.mxu0 }
 0x283   : > { %v1612_v24 = vpop.f32.mrf.mxu2  ;;  %v1245_v32 = vpop.f32.mrf.mxu1  ;;  %v2250_v33 = vadd.f32 %v3514_v53, %v2182_v29 }
 0x284   : > { %v1682_v52 = vadd.f32 %v1612_v24, %v1244_v28  ;;  %v1246_v14 = vadd.f32 %v1245_v32, %v974_v30 }
 0x285   : > { %v2314_v45 = vmax.f32 %v2250_v33, 0.0 }
 0x286   : > { %v2045_v7 = vpop.f32.mrf.mxu3 }
 0x287   : > { %2378 = vst [vmem:[%s2846_s17 + $0x1d8] sm:$0xff] %v2314_v45  ;;  %v2115_v49 = vadd.f32 %v2045_v7, %v1682_v52 }
 0x289   : > { %v2183_v59 = vmul.f32 %v3508_v41, %v2115_v49  ;;  %v977_v8 = vpop.f32.mrf.mxu0 }
 0x28b   : > { %v1614_v5 = vpop.f32.mrf.mxu2  ;;  %v2251_v12 = vadd.f32 %v3514_v53, %v2183_v59  ;;  %v1248_v13 = vpop.f32.mrf.mxu1 }
 0x28c   : > { %v1683_v17 = vadd.f32 %v1614_v5, %v1246_v14  ;;  %v1249_v50 = vadd.f32 %v1248_v13, %v977_v8 }
 0x28d   : > { %v2315_v4 = vmax.f32 %v2251_v12, 0.0 }
 0x28e   : > { %v2047_v15 = vpop.f32.mrf.mxu3 }
 0x28f   : > { %2379 = vst [vmem:[%s2846_s17 + $0x1e0] sm:$0xff] %v2315_v4  ;;  %v2116_v18 = vadd.f32 %v2047_v15, %v1683_v17 }
 0x291   : > { %v2184_v51 = vmul.f32 %v3508_v41, %v2116_v18  ;;  %v979_v58 = vpop.f32.mrf.mxu0 }
 0x293   : > { %v1617_v6 = vpop.f32.mrf.mxu2  ;;  %v2252_v54 = vadd.f32 %v3514_v53, %v2184_v51  ;;  %v1250_v61 = vpop.f32.mrf.mxu1 }
 0x294   : > { %v1684_v55 = vadd.f32 %v1617_v6, %v1249_v50  ;;  %v1251_v39 = vadd.f32 %v1250_v61, %v979_v58 }
 0x295   : > { %v2316_v57 = vmax.f32 %v2252_v54, 0.0 }
 0x296   : > { %v2050_v60 = vpop.f32.mrf.mxu3 }
 0x297   : > { %2380 = vst [vmem:[%s2846_s17 + $0x1e8] sm:$0xff] %v2316_v57  ;;  %v2117_v63 = vadd.f32 %v2050_v60, %v1684_v55 }
 0x299   : > { %v2185_v1 = vmul.f32 %v3508_v41, %v2117_v63 }
 0x29b   : > { %v1619_v0 = vpop.f32.mrf.mxu2  ;;  %v2253_v31 = vadd.f32 %v3514_v53, %v2185_v1 }
 0x29c   : > { %v1685_v56 = vadd.f32 %v1619_v0, %v1251_v39 }
 0x29d   : > { %v2317_v47 = vmax.f32 %v2253_v31, 0.0 }
 0x29e   : > { %v2052_v62 = vpop.f32.mrf.mxu3 }
 0x29f   : > { %2381 = vst [vmem:[%s2846_s17 + $0x1f0] sm:$0xff] %v2317_v47  ;;  %v2118_v10 = vadd.f32 %v2052_v62, %v1685_v56 }
 0x2a1   : > { %v2186_v35 = vmul.f32 %v3508_v41, %v2118_v10 }
 0x2a3   : > { %v2254_v38 = vadd.f32 %v3514_v53, %v2186_v35 }
 0x2a5   : > { %v2318_v40 = vmax.f32 %v2254_v38, 0.0 }
 0x2a7   : > { %2382 = vst [vmem:[%s2846_s17 + $0x1f8] sm:$0xff] %v2318_v40 }
 0x2a8 PF: > { %s15_s18 = sadd.s32 1, %s2634_s18  }
 0x2a9   : > { %p12_p6 = scmp.ge.s32.totalorder %s15_s18, 4  }
 0x2ab   :  { %14 = sbr.rel (!%p12_p6) target bundleno = 1 (0x1), region = 73 }

// kernel: decnr2d_forward.2
= control target key start
LH: loop header
LB: loop body
LE: loop exit
PB: predicated region body
PF: predicated region fallthrough
CT: control target
= control target key end

     0   :  { %s3053_s15 = smov 0   ;;  %s3838_s0 = inlined_call_operand.vmem [shape: f32[1536,16], index: 0, kind: input, shape index: {}, may-alias: {0,1}]   ;;  %s3839_s1 = inlined_call_operand.vmem [shape: f32[1536,16], index: 1, kind: input, shape index: {}, may-alias: {0,1}]   ;;  %s3840_s2 = inlined_call_operand.vmem [shape: bf16[64,128], index: 2, kind: input, shape index: {}]   ;;  %s3841_s3 = inlined_call_operand.vmem [shape: f32[1024,1], index: 3, kind: input, shape index: {}]   ;;  %s3842_s4 = inlined_call_operand.vmem [shape: f32[2,8,128], index: 4, kind: output, shape index: {}]  }
   0x1 LB: > { %s3059_s16 = sadd.s32 4294967295, %s3025_s15   ;;  %p2847_p0 = scmp.ge.s32.totalorder %s3025_s15, 1  ;;  %s3025_s15 = sphi %s3053_s15, %s14_s15  }
   0x2   : > { %p189_p1 = scmp.lt.s32.totalorder %s3025_s15, 3 }
   0x4   : > { %p190_p2 = pnand %p2847_p0, %p189_p1 }
   0x5   : > { %s3073_s23 = sshll.u32 (!%p190_p2), %s3059_s16, 6  ;;  %p245_p6 = scmp.lt.s32.totalorder (!%p190_p2), %s3059_s16, 1 }
   0x6   : > { %193 = sbr.rel (%p190_p2) target bundleno = 694 (0x2b6), region = 36  ;;  %p226_p3 = scmp.lt.s32.totalorder (!%p190_p2), %s3073_s23, 191 }
   0x7   : > { %p240_p4 = scmp.lt.s32.totalorder (!%p190_p2), %s3073_s23, 127  ;;  %s3002_s10 = sadd.s32 (!%p190_p2), 64, %s3073_s23 }
   0x8   : > { %p3699_p5 = scmp.lt.s32.totalorder (!%p190_p2), %s3002_s10, 191 }
   0xb   : > { %v3004_v0 = vld [vmem:[%s3840_s2 + $0x8] sm:$0xff]  ;;  %v3003_v1 = vld [vmem:[%s3840_s2] sm:$0xff]  ;;  %v3005_v2 = vld [vmem:[%s3840_s2 + $0x10] sm:$0xff]  ;;  %s227_s26 = scalar_select %p226_p3, %s3073_s23, 191  ;;  %vm314_vm0 = vcmask 130048   ;;  %v3027_v13 = vmov 0  }
   0xc   : > { %v3006_v3 = vld [vmem:[%s3840_s2 + $0x18] sm:$0xff]  ;;  %812 = vmatpush.bf16.msra.mxu0 %v3004_v0  ;;  %1083 = vmatpush.bf16.msra.mxu1 %v3003_v1  ;;  %s241_s27 = scalar_select %p240_p4, %s3073_s23, 127  ;;  %vm2761_vm1 = vcmask 1040384   ;;  %vm2763_vm2 = vcmask 1041408  }
   0xd   : > { %1452 = vmatpush.bf16.msra.mxu2 %v3005_v2  ;;  %1885 = vmatpush.bf16.msra.mxu3 %v3006_v3  ;;  %s2849_s28 = sshll.u32 %s227_s26, 3  ;;  %s3845_s10 = smov (!%p3699_p5, %s3002_s10), 191 }
   0xe   : > { %s3085_s5 = scalar_lea.vmem %s3838_s0, %s2849_s28  ;;  %s2853_s6 = sshll.u32 %s241_s27, 3  ;;  %3016 = vset.pattern.permute.xlu0 %v3027_v13  ;;  %3017 = vset.pattern.permute.xlu1 %v3027_v13 }
   0xf   : > { %v252_v4 = vld [vmem:[%s3085_s5 + $0x10] sm:$0xff]  ;;  %v253_v5 = vld [vmem:[%s3085_s5 + $0x18] sm:$0xff]  ;;  %v254_v6 = vld [vmem:[%s3085_s5 + $0x20] sm:$0xff]  ;;  %s3095_s9 = scalar_lea.vmem %s3841_s3, %s2853_s6  ;;  %3018 = vset.pattern.permute.xlu2 %v3027_v13  ;;  %s2851_s12 = sshll.u32 %s3845_s10, 3 }
  0x10   : > { %317 = vst.msk [vmem:[#allocation2 + $0x10] sm:$0xff] %vm314_vm0, %v252_v4  ;;  %v250_v7 = vld [vmem:[%s3085_s5] sm:$0xff]  ;;  %v251_v8 = vld [vmem:[%s3085_s5 + $0x8] sm:$0xff]  ;;  %v256_v10 = vld [vmem:[%s3085_s5 + $0x30] sm:$0xff]  ;;  %s3720_s17 = scalar_lea.vmem %s3839_s1, %s2851_s12  ;;  %s3847_s16 = smov (!%p245_p6, %s3059_s16), 1 }
  0x11   : > { %318 = vst.msk [vmem:[#allocation2 + $0x18] sm:$0xff] %vm314_vm0, %v253_v5  ;;  %v255_v9 = vld [vmem:[%s3085_s5 + $0x28] sm:$0xff]  ;;  %v2111_v11 = vld [vmem:[%s3095_s9] sm:$0xff]  ;;  %v257_v12 = vld [vmem:[%s3085_s5 + $0x38] sm:$0xff]  ;;  %s2854_s18 = sshll.u32 %s3847_s16, 3 }
  0x12   : > { %319 = vst.msk [vmem:[#allocation2 + $0x20] sm:$0xff] %vm314_vm0, %v254_v6  ;;  %v258_v14 = vld [vmem:[%s3085_s5 + $0x40] sm:$0xff]  ;;  %2177 = vperm.xlu0 %3016, %v2111_v11   ;;  %v259_v15 = vld [vmem:[%s3085_s5 + $0x48] sm:$0xff]  ;;  %v260_v16 = vld [vmem:[%s3085_s5 + $0x50] sm:$0xff]  ;;  %s248_s21 = scalar_lea.vmem %s3842_s4, %s2854_s18 }
  0x13   : > { %315 = vst.msk [vmem:[#allocation2] sm:$0xff] %vm314_vm0, %v250_v7  ;;  %v261_v18 = vld [vmem:[%s3085_s5 + $0x58] sm:$0xff]  ;;  %v262_v20 = vld [vmem:[%s3085_s5 + $0x60] sm:$0xff]  ;;  %v2112_v23 = vld [vmem:[%s3095_s9 + $0x8] sm:$0xff] }
  0x14   : > { %316 = vst.msk [vmem:[#allocation2 + $0x8] sm:$0xff] %vm314_vm0, %v251_v8  ;;  %v263_v24 = vld [vmem:[%s3085_s5 + $0x68] sm:$0xff]  ;;  %v2113_v33 = vld [vmem:[%s3095_s9 + $0x10] sm:$0xff]  ;;  %v265_v40 = vld [vmem:[%s3085_s5 + $0x78] sm:$0xff] }
  0x15   : > { %320 = vst.msk [vmem:[#allocation2 + $0x28] sm:$0xff] %vm314_vm0, %v255_v9  ;;  %2187 = vperm.xlu1 %3017, %v2113_v33   ;;  %v264_v39 = vld [vmem:[%s3085_s5 + $0x70] sm:$0xff]  ;;  %v2114_v43 = vld [vmem:[%s3095_s9 + $0x18] sm:$0xff]  ;;  %v266_v52 = vld [vmem:[%s3085_s5 + $0x80] sm:$0xff] }
  0x16   : > { %321 = vst.msk [vmem:[#allocation2 + $0x30] sm:$0xff] %vm314_vm0, %v256_v10  ;;  %v267_v53 = vld [vmem:[%s3085_s5 + $0x88] sm:$0xff]  ;;  %v2117_v61 = vld [vmem:[%s3095_s9 + $0x30] sm:$0xff]  ;;  %v2115_v62 = vld [vmem:[%s3095_s9 + $0x20] sm:$0xff] }
  0x17   : > { %322 = vst.msk [vmem:[#allocation2 + $0x38] sm:$0xff] %vm314_vm0, %v257_v12  ;;  %v509_v36 = vld [vmem:[#allocation2 + $0x10] sm:$0xff]  ;;  %v2118_v63 = vld [vmem:[%s3095_s9 + $0x38] sm:$0xff]  ;;  %2197 = vperm.xlu2 %3018, %v2115_v62   ;;  %v2116_v10 = vld [vmem:[%s3095_s9 + $0x28] sm:$0xff] }
  0x18   : > { %v605_v17 = vld [vmem:[#allocation2 + $0x14] sm:$0xff]  ;;  %323 = vst.msk [vmem:[#allocation2 + $0x40] sm:$0xff] %vm314_vm0, %v258_v14  ;;  %v2120_v11 = vld [vmem:[%s3095_s9 + $0x48] sm:$0xff]  ;;  %v270_v13 = vld [vmem:[%s3085_s5 + $0xa0] sm:$0xff] }
  0x19   : > { %v606_v19 = vld [vmem:[#allocation2 + $0x1c] sm:$0xff]  ;;  %324 = vst.msk [vmem:[#allocation2 + $0x48] sm:$0xff] %vm314_vm0, %v259_v15  ;;  %v268_v1 = vld [vmem:[%s3085_s5 + $0x90] sm:$0xff]  ;;  %v271_v14 = vld [vmem:[%s3085_s5 + $0xa8] sm:$0xff] }
  0x1a   : > { %v669_v21 = vpack.c.bf16 %v606_v19, %v605_v17  ;;  %v507_v22 = vld [vmem:[#allocation2] sm:$0xff]  ;;  %325 = vst.msk [vmem:[#allocation2 + $0x50] sm:$0xff] %vm314_vm0, %v260_v16  ;;  %2182 = vperm.xlu0 %3016, %v2112_v23   ;;  %v510_v37 = vld [vmem:[#allocation2 + $0x18] sm:$0xff] }
  0x1b   : > { %v508_v25 = vld [vmem:[#allocation2 + $0x8] sm:$0xff]  ;;  %326 = vst.msk [vmem:[#allocation2 + $0x58] sm:$0xff] %vm314_vm0, %v261_v18  ;;  %v572_v44 = vpack.c.bf16 %v510_v37, %v509_v36  ;;  %v511_v50 = vld [vmem:[#allocation2 + $0x20] sm:$0xff]  ;;  %v269_v2 = vld [vmem:[%s3085_s5 + $0x98] sm:$0xff] }
  0x1c   : > { %2859 = vmatmul.msk.bf16.vlgmr.msra.gmra.mxu0 %vm314_vm0, %v669_v21  ;;  %v571_v26 = vpack.c.bf16 %v508_v25, %v507_v22  ;;  %v1245_v27 = vld [vmem:[#allocation2 + $0x28] sm:$0xff]  ;;  %327 = vst.msk [vmem:[#allocation2 + $0x60] sm:$0xff] %vm314_vm0, %v262_v20  ;;  %v2121_v22 = vld [vmem:[%s3095_s9 + $0x50] sm:$0xff]  ;;  %v2119_v23 = vld [vmem:[%s3095_s9 + $0x40] sm:$0xff] }
  0x1d   : > { %v3122_v28 = vld [vmem:[#allocation2 + $0x30] sm:$0xff]  ;;  %328 = vst.msk [vmem:[#allocation2 + $0x68] sm:$0xff] %vm314_vm0, %v263_v24  ;;  %v607_v34 = vld [vmem:[#allocation2 + $0x24] sm:$0xff]  ;;  %2192 = vperm.xlu1 %3017, %v2114_v43   ;;  %v573_v56 = vpack.c.bf16 %v1245_v27, %v511_v50 }
  0x1e   : > { %2895 = vmatmul.msk.bf16.vlgmr.msra.gmra.mxu1 %vm314_vm0, %v571_v26  ;;  %v1309_v29 = vpack.c.bf16 %v3122_v28, %v1245_v27  ;;  %v608_v35 = vld [vmem:[#allocation2 + $0x2c] sm:$0xff]  ;;  %v1247_v41 = vld [vmem:[#allocation2 + $0x38] sm:$0xff]  ;;  %329 = vst.msk [vmem:[#allocation2 + $0x70] sm:$0xff] %vm314_vm0, %v264_v39  ;;  %v274_v37 = vld [vmem:[%s3085_s5 + $0xc0] sm:$0xff] }
  0x1f   : > { %v1678_v30 = vld [vmem:[#allocation2 + $0x3c] sm:$0xff]  ;;  %v670_v38 = vpack.c.bf16 %v608_v35, %v607_v34  ;;  %330 = vst.msk [vmem:[#allocation2 + $0x78] sm:$0xff] %vm314_vm0, %v265_v40  ;;  %v609_v49 = vld [vmem:[#allocation2 + $0x34] sm:$0xff]  ;;  %v574_v5 = vpack.c.bf16 %v1247_v41, %v3122_v28  ;;  %2202 = vperm.xlu2 %3018, %v2116_v10   ;;  %v2124_v35 = vld [vmem:[%s3095_s9 + $0x68] sm:$0xff] }
  0x20   : > { %2931 = vmatmul.msk.bf16.vlgmr.msra.gmra.mxu2 %vm314_vm0, %v1309_v29  ;;  %v1679_v31 = vld [vmem:[#allocation2 + $0x44] sm:$0xff]  ;;  %v671_v51 = vpack.c.bf16 %v1678_v30, %v609_v49  ;;  %331 = vst.msk [vmem:[#allocation2 + $0x80] sm:$0xff] %vm314_vm0, %v266_v52  ;;  %v272_v25 = vld [vmem:[%s3085_s5 + $0xb0] sm:$0xff]  ;;  %v273_v26 = vld [vmem:[%s3085_s5 + $0xb8] sm:$0xff] }
  0x21   : > { %v1742_v32 = vpack.c.bf16 %v1679_v31, %v1678_v30  ;;  %v3132_v42 = vld [vmem:[#allocation2 + $0x40] sm:$0xff]  ;;  %v1680_v46 = vld [vmem:[#allocation2 + $0x4c] sm:$0xff]  ;;  %332 = vst.msk [vmem:[#allocation2 + $0x88] sm:$0xff] %vm314_vm0, %v267_v53  ;;  %v277_v49 = vld [vmem:[%s3085_s5 + $0xd8] sm:$0xff] }
  0x22   : > { %v1310_v45 = vpack.c.bf16 %v3132_v42, %v1247_v41  ;;  %v1681_v47 = vld [vmem:[#allocation2 + $0x54] sm:$0xff]  ;;  %v1249_v54 = vld [vmem:[#allocation2 + $0x48] sm:$0xff]  ;;  %2207 = vperm.xlu0 %3016, %v2117_v61   ;;  %v672_v0 = vpack.c.bf16 %v1680_v46, %v1679_v31  ;;  %333 = vst.msk [vmem:[#allocation2 + $0x90] sm:$0xff] %vm314_vm0, %v268_v1  ;;  %v2123_v34 = vld [vmem:[%s3095_s9 + $0x60] sm:$0xff] }
  0x23   : > { %2967 = vmatmul.msk.bf16.vlgmr.msra.gmra.mxu3 %vm314_vm0, %v1742_v32  ;;  %v1743_v48 = vpack.c.bf16 %v1681_v47, %v1680_v46  ;;  %v3144_v55 = vld [vmem:[#allocation2 + $0x50] sm:$0xff]  ;;  %v1682_v58 = vld [vmem:[#allocation2 + $0x5c] sm:$0xff]  ;;  %334 = vst.msk [vmem:[#allocation2 + $0x98] sm:$0xff] %vm314_vm0, %v269_v2  ;;  %v575_v17 = vpack.c.bf16 %v1249_v54, %v3132_v42  ;;  %v279_v61 = vld [vmem:[%s3085_s5 + $0xe8] sm:$0xff] }
  0x24   : > { %v1311_v57 = vpack.c.bf16 %v3144_v55, %v1249_v54  ;;  %v1683_v59 = vld [vmem:[#allocation2 + $0x64] sm:$0xff]  ;;  %v1251_v3 = vld [vmem:[#allocation2 + $0x58] sm:$0xff]  ;;  %v673_v12 = vpack.c.bf16 %v1682_v58, %v1681_v47  ;;  %335 = vst.msk [vmem:[#allocation2 + $0xa0] sm:$0xff] %vm314_vm0, %v270_v13 }
  0x25   : > { %v1744_v60 = vpack.c.bf16 %v1683_v59, %v1682_v58  ;;  %2212 = vperm.xlu1 %3017, %v2118_v63   ;;  %v3158_v4 = vld [vmem:[#allocation2 + $0x60] sm:$0xff]  ;;  %v1684_v7 = vld [vmem:[#allocation2 + $0x6c] sm:$0xff]  ;;  %336 = vst.msk [vmem:[#allocation2 + $0xa8] sm:$0xff] %vm314_vm0, %v271_v14  ;;  %v576_v29 = vpack.c.bf16 %v1251_v3, %v3144_v55  ;;  %v2122_v46 = vld [vmem:[%s3095_s9 + $0x58] sm:$0xff] }
  0x26   : > { %v1312_v6 = vpack.c.bf16 %v3158_v4, %v1251_v3  ;;  %v1685_v8 = vld [vmem:[#allocation2 + $0x74] sm:$0xff]  ;;  %v1253_v15 = vld [vmem:[#allocation2 + $0x68] sm:$0xff]  ;;  %v674_v24 = vpack.c.bf16 %v1684_v7, %v1683_v59  ;;  %337 = vst.msk [vmem:[#allocation2 + $0xb0] sm:$0xff] %vm314_vm0, %v272_v25  ;;  %v2127_v58 = vld [vmem:[%s3095_s9 + $0x80] sm:$0xff] }
  0x27   : > { %v1745_v9 = vpack.c.bf16 %v1685_v8, %v1684_v7  ;;  %v3172_v16 = vld [vmem:[#allocation2 + $0x70] sm:$0xff]  ;;  %v1686_v19 = vld [vmem:[#allocation2 + $0x7c] sm:$0xff]  ;;  %2217 = vperm.xlu2 %3018, %v2119_v23   ;;  %338 = vst.msk [vmem:[#allocation2 + $0xb8] sm:$0xff] %vm314_vm0, %v273_v26  ;;  %v577_v41 = vpack.c.bf16 %v1253_v15, %v3158_v4 }
  0x28   : > { %v1313_v18 = vpack.c.bf16 %v3172_v16, %v1253_v15  ;;  %v1687_v20 = vld [vmem:[#allocation2 + $0x84] sm:$0xff]  ;;  %v1255_v27 = vld [vmem:[#allocation2 + $0x78] sm:$0xff]  ;;  %v675_v36 = vpack.c.bf16 %v1686_v19, %v1685_v8  ;;  %339 = vst.msk [vmem:[#allocation2 + $0xc0] sm:$0xff] %vm314_vm0, %v274_v37  ;;  %v2125_v8 = vld [vmem:[%s3095_s9 + $0x70] sm:$0xff] }
  0x29   : > { %v1746_v21 = vpack.c.bf16 %v1687_v20, %v1686_v19  ;;  %v3186_v28 = vld [vmem:[#allocation2 + $0x80] sm:$0xff]  ;;  %v1688_v31 = vld [vmem:[#allocation2 + $0x8c] sm:$0xff]  ;;  %v578_v52 = vpack.c.bf16 %v1255_v27, %v3172_v16  ;;  %342 = vst.msk [vmem:[#allocation2 + $0xd8] sm:$0xff] %vm314_vm0, %v277_v49  ;;  %v2130_v37 = vld [vmem:[%s3095_s9 + $0x98] sm:$0xff] }
  0x2a   : > { %2222 = vperm.xlu0 %3016, %v2120_v11   ;;  %v1314_v30 = vpack.c.bf16 %v3186_v28, %v1255_v27  ;;  %v1689_v32 = vld [vmem:[#allocation2 + $0x94] sm:$0xff]  ;;  %v1257_v39 = vld [vmem:[#allocation2 + $0x88] sm:$0xff]  ;;  %v676_v47 = vpack.c.bf16 %v1688_v31, %v1687_v20  ;;  %344 = vst.msk [vmem:[#allocation2 + $0xe8] sm:$0xff] %vm314_vm0, %v279_v61 }
  0x2b   : > { %v1747_v33 = vpack.c.bf16 %v1689_v32, %v1688_v31  ;;  %v3200_v40 = vld [vmem:[#allocation2 + $0x90] sm:$0xff]  ;;  %v1690_v43 = vld [vmem:[#allocation2 + $0x9c] sm:$0xff]  ;;  %v579_v1 = vpack.c.bf16 %v1257_v39, %v3186_v28 }
  0x2c   : > { %2860 = vmatmul.msk.bf16.gmra.mxu0 %vm314_vm0, %v670_v38  ;;  %v275_v38 = vld [vmem:[%s3085_s5 + $0xc8] sm:$0xff]  ;;  %v1315_v42 = vpack.c.bf16 %v3200_v40, %v1257_v39  ;;  %v3216_v50 = vld [vmem:[#allocation2 + $0x98] sm:$0xff]  ;;  %v677_v59 = vpack.c.bf16 %v1690_v43, %v1689_v32  ;;  %v280_v19 = vld [vmem:[%s3085_s5 + $0xf0] sm:$0xff] }
  0x2d   : > { %2227 = vperm.xlu1 %3017, %v2121_v22   ;;  %340 = vst.msk [vmem:[#allocation2 + $0xc8] sm:$0xff] %vm314_vm0, %v275_v38  ;;  %v1692_v54 = vld [vmem:[#allocation2 + $0xac] sm:$0xff]  ;;  %v281_v20 = vld [vmem:[%s3085_s5 + $0xf8] sm:$0xff] }
  0x2e   : > { %2896 = vmatmul.msk.bf16.gmra.mxu1 %vm314_vm0, %v572_v44  ;;  %v3207_v44 = vld [vmem:[#allocation2 + $0xa4] sm:$0xff]  ;;  %v3226_v55 = vld [vmem:[#allocation2 + $0xb4] sm:$0xff]  ;;  %345 = vst.msk [vmem:[#allocation2 + $0xf0] sm:$0xff] %vm314_vm0, %v280_v19 }
  0x2f   : > { %2232 = vperm.xlu2 %3018, %v2122_v46   ;;  %v3236_v63 = vld [vmem:[#allocation2 + $0xa8] sm:$0xff]  ;;  %v3260_v22 = vld [vmem:[#allocation2 + $0xb8] sm:$0xff]  ;;  %v3262_v23 = vld [vmem:[#allocation2 + $0xc0] sm:$0xff]  ;;  %346 = vst.msk [vmem:[#allocation2 + $0xf8] sm:$0xff] %vm314_vm0, %v281_v20 }
  0x30   : > { %2932 = vmatmul.msk.bf16.gmra.mxu2 %vm314_vm0, %v1310_v45  ;;  %v1748_v45 = vpack.c.bf16 %v3207_v44, %v1690_v43 }
  0x32   : > { %2237 = vperm.xlu0 %3016, %v2123_v34  }
  0x33   : > { %2968 = vmatmul.msk.bf16.gmra.mxu3 %vm314_vm0, %v1743_v48  ;;  %v276_v48 = vld [vmem:[%s3085_s5 + $0xd0] sm:$0xff] }
  0x34   : > { %341 = vst.msk [vmem:[#allocation2 + $0xd0] sm:$0xff] %vm314_vm0, %v276_v48 }
  0x35   : > { %2242 = vperm.xlu1 %3017, %v2124_v35  }
  0x37   : > { %2247 = vperm.xlu2 %3018, %v2125_v8  }
  0x3b   : > { %v3273_v31 = vld [vmem:[#allocation2 + $0xd4] sm:$0xff] }
  0x3c   : > { %2861 = vmatmul.msk.bf16.gmra.mxu0 %vm314_vm0, %v671_v51  ;;  %v3218_v51 = vld [vmem:[#allocation2 + $0xa0] sm:$0xff] }
  0x3d   : > { %v1316_v53 = vpack.c.bf16 %v3218_v51, %v3216_v50  ;;  %2257 = vperm.xlu1 %3017, %v2127_v58   ;;  %v581_v61 = vpack.c.bf16 %v3236_v63, %v3218_v51 }
  0x3e   : > { %2897 = vmatmul.msk.bf16.gmra.mxu1 %vm314_vm0, %v573_v56  ;;  %v1749_v56 = vpack.c.bf16 %v3226_v55, %v1692_v54 }
  0x40   : > { %2933 = vmatmul.msk.bf16.gmra.mxu2 %vm314_vm0, %v1311_v57  ;;  %v2126_v57 = vld [vmem:[%s3095_s9 + $0x78] sm:$0xff] }
  0x41   : > { %2252 = vperm.xlu0 %3016, %v2126_v57  }
  0x43   : > { %2969 = vmatmul.msk.bf16.gmra.mxu3 %vm314_vm0, %v1744_v60  ;;  %v278_v60 = vld [vmem:[%s3085_s5 + $0xe0] sm:$0xff] }
  0x44   : > { %343 = vst.msk [vmem:[#allocation2 + $0xe0] sm:$0xff] %vm314_vm0, %v278_v60  ;;  %v3288_v60 = vld [vmem:[#allocation2 + $0xd0] sm:$0xff] }
  0x45   : > { %2272 = vperm.xlu1 %3017, %v2130_v37  }
  0x4b   : > { %v3299_v8 = vld [vmem:[#allocation2 + $0xe4] sm:$0xff] }
  0x4c   : > { %2862 = vmatmul.msk.bf16.gmra.mxu0 %vm314_vm0, %v672_v0  ;;  %v3238_v0 = vld [vmem:[#allocation2 + $0xb0] sm:$0xff] }
  0x4d   : > { %v1317_v4 = vpack.c.bf16 %v3238_v0, %v3236_v63  ;;  %v582_v37 = vpack.c.bf16 %v3260_v22, %v3238_v0 }
  0x4e   : > { %2898 = vmatmul.msk.bf16.gmra.mxu1 %vm314_vm0, %v574_v5  ;;  %v3246_v5 = vld [vmem:[#allocation2 + $0xbc] sm:$0xff] }
  0x50   : > { %2934 = vmatmul.msk.bf16.gmra.mxu2 %vm314_vm0, %v1312_v6  ;;  %v3248_v6 = vld [vmem:[#allocation2 + $0xc4] sm:$0xff] }
  0x51   : > { %v1750_v7 = vpack.c.bf16 %v3248_v6, %v3246_v5 }
  0x53   : > { %2970 = vmatmul.msk.bf16.gmra.mxu3 %vm314_vm0, %v1745_v9 }
  0x5c   : > { %2863 = vmatmul.msk.bf16.gmra.mxu0 %vm314_vm0, %v673_v12 }
  0x5e   : > { %2899 = vmatmul.msk.bf16.gmra.mxu1 %vm314_vm0, %v575_v17  ;;  %v2129_v17 = vld [vmem:[%s3095_s9 + $0x90] sm:$0xff] }
  0x5f   : > { %2267 = vperm.xlu0 %3016, %v2129_v17  }
  0x60   : > { %2935 = vmatmul.msk.bf16.gmra.mxu2 %vm314_vm0, %v1313_v18  ;;  %v678_v18 = vpack.c.bf16 %v1692_v54, %v3207_v44  ;;  %v282_v54 = vld [vmem:[%s3085_s5 + $0x100] sm:$0xff] }
  0x61   : > { %347 = vst.msk [vmem:[#allocation2 + $0x100] sm:$0xff] %vm314_vm0, %v282_v54 }
  0x63   : > { %2971 = vmatmul.msk.bf16.gmra.mxu3 %vm314_vm0, %v1746_v21 }
  0x6c   : > { %2864 = vmatmul.msk.bf16.gmra.mxu0 %vm314_vm0, %v674_v24  ;;  %v580_v24 = vpack.c.bf16 %v3216_v50, %v3200_v40 }
  0x6e   : > { %2900 = vmatmul.msk.bf16.gmra.mxu1 %vm314_vm0, %v576_v29  ;;  %v1318_v29 = vpack.c.bf16 %v3262_v23, %v3260_v22 }
  0x70   : > { %2936 = vmatmul.msk.bf16.gmra.mxu2 %vm314_vm0, %v1314_v30  ;;  %v3271_v30 = vld [vmem:[#allocation2 + $0xcc] sm:$0xff] }
  0x73   : > { %2972 = vmatmul.msk.bf16.gmra.mxu3 %vm314_vm0, %v1747_v33 }
  0x7c   : > { %2865 = vmatmul.msk.bf16.gmra.mxu0 %vm314_vm0, %v675_v36  ;;  %v1751_v36 = vpack.c.bf16 %v3273_v31, %v3271_v30 }
  0x7e   : > { %2901 = vmatmul.msk.bf16.gmra.mxu1 %vm314_vm0, %v577_v41 }
  0x80   : > { %2937 = vmatmul.msk.bf16.gmra.mxu2 %vm314_vm0, %v1315_v42 }
  0x83   : > { %2973 = vmatmul.msk.bf16.gmra.mxu3 %vm314_vm0, %v1748_v45 }
  0x84   : > { %v2178_v14 = vpop.permute.xlu0 %2177 }
  0x8c   : > { %2866 = vmatmul.msk.bf16.gmra.mxu0 %vm314_vm0, %v676_v47  ;;  %v2183_v33 = vpop.permute.xlu0 %2182  ;;  %v2188_v47 = vpop.permute.xlu1 %2187 }
  0x8e   : > { %2902 = vmatmul.msk.bf16.gmra.mxu1 %vm314_vm0, %v578_v52  ;;  %v2128_v52 = vld [vmem:[%s3095_s9 + $0x88] sm:$0xff] }
  0x8f   : > { %2262 = vperm.xlu2 %3018, %v2128_v52  }
  0x90   : > { %2938 = vmatmul.msk.bf16.gmra.mxu2 %vm314_vm0, %v1316_v53  ;;  %v679_v53 = vpack.c.bf16 %v3246_v5, %v3226_v55 }
  0x93   : > { %2974 = vmatmul.msk.bf16.gmra.mxu3 %vm314_vm0, %v1749_v56  ;;  %v283_v56 = vld [vmem:[%s3085_s5 + $0x108] sm:$0xff] }
  0x94   : > { %348 = vst.msk [vmem:[#allocation2 + $0x108] sm:$0xff] %vm314_vm0, %v283_v56  ;;  %v2193_v63 = vpop.permute.xlu1 %2192 }
  0x99   : > { %v814_v62 = vpop.f32.mrf.mxu0 }
  0x9b   : > { %v1085_v2 = vpop.f32.mrf.mxu1 }
  0x9c   : > { %v1086_v3 = vadd.f32 %v1085_v2, %v814_v62  ;;  %2867 = vmatmul.msk.bf16.gmra.mxu0 %vm314_vm0, %v677_v59  ;;  %v3286_v59 = vld [vmem:[#allocation2 + $0xc8] sm:$0xff] }
  0x9d   : > { %v1319_v5 = vpack.c.bf16 %v3288_v60, %v3286_v59 }
  0x9e   : > { %2903 = vmatmul.msk.bf16.gmra.mxu1 %vm314_vm0, %v579_v1 }
  0xa0   : > { %2939 = vmatmul.msk.bf16.gmra.mxu2 %vm314_vm0, %v1317_v4 }
  0xa1   : > { %v816_v9 = vpop.f32.mrf.mxu0 }
  0xa3   : > { %2975 = vmatmul.msk.bf16.gmra.mxu3 %vm314_vm0, %v1750_v7  ;;  %v1454_v10 = vpop.f32.mrf.mxu2  ;;  %v1087_v11 = vpop.f32.mrf.mxu1  ;;  %v3297_v7 = vld [vmem:[#allocation2 + $0xdc] sm:$0xff] }
  0xa4   : > { %v1614_v12 = vadd.f32 %v1454_v10, %v1086_v3  ;;  %v1088_v13 = vadd.f32 %v1087_v11, %v816_v9  ;;  %v1752_v11 = vpack.c.bf16 %v3299_v8, %v3297_v7 }
  0xa6   : > { %v1887_v15 = vpop.f32.mrf.mxu3 }
  0xa7   : > { %v2047_v16 = vadd.f32 %v1887_v15, %v1614_v12  ;;  %v2132_v12 = vld [vmem:[%s3095_s9 + $0xa8] sm:$0xff] }
  0xa8   : > { %2282 = vperm.xlu0 %3016, %v2132_v12  }
  0xa9   : > { %v819_v21 = vpop.f32.mrf.mxu0  ;;  %v2495_v34 = vmul.f32 %v2178_v14, %v2047_v16 }
  0xab   : > { %v1456_v25 = vpop.f32.mrf.mxu2  ;;  %v1090_v26 = vpop.f32.mrf.mxu1  ;;  %v2628_v40 = vmul.f32 %v2495_v34, %v2047_v16 }
  0xac   : > { %v1615_v27 = vadd.f32 %v1456_v25, %v1088_v13  ;;  %v1091_v28 = vadd.f32 %v1090_v26, %v819_v21  ;;  %2868 = vmatmul.msk.bf16.gmra.mxu0 %vm314_vm0, %v678_v18  ;;  %v2198_v21 = vpop.permute.xlu2 %2197 }
  0xae   : > { %v1889_v32 = vpop.f32.mrf.mxu3  ;;  %2904 = vmatmul.msk.bf16.gmra.mxu1 %vm314_vm0, %v580_v24 }
  0xaf   : > { %v2048_v35 = vadd.f32 %v1889_v32, %v1615_v27  ;;  %v2133_v27 = vld [vmem:[%s3095_s9 + $0xb0] sm:$0xff]  ;;  %v285_v32 = vld [vmem:[%s3085_s5 + $0x118] sm:$0xff] }
  0xb0   : > { %2940 = vmatmul.msk.bf16.gmra.mxu2 %vm314_vm0, %v1318_v29  ;;  %2287 = vperm.xlu1 %3017, %v2133_v27   ;;  %v284_v29 = vld [vmem:[%s3085_s5 + $0x110] sm:$0xff]  ;;  %350 = vst.msk [vmem:[#allocation2 + $0x118] sm:$0xff] %vm314_vm0, %v285_v32 }
  0xb1   : > { %v2496_v38 = vmul.f32 %v2183_v33, %v2048_v35  ;;  %v821_v39 = vpop.f32.mrf.mxu0  ;;  %349 = vst.msk [vmem:[#allocation2 + $0x110] sm:$0xff] %vm314_vm0, %v284_v29 }
  0xb3   : > { %v2559_v41 = vadd.f32 %v2496_v38, %v2495_v34  ;;  %v2629_v42 = vmul.f32 %v2496_v38, %v2048_v35  ;;  %2976 = vmatmul.msk.bf16.gmra.mxu3 %vm314_vm0, %v1751_v36  ;;  %v1459_v43 = vpop.f32.mrf.mxu2  ;;  %v1092_v44 = vpop.f32.mrf.mxu1  ;;  %v3312_v35 = vld [vmem:[#allocation2 + $0xd8] sm:$0xff]  ;;  %v3314_v36 = vld [vmem:[#allocation2 + $0xe0] sm:$0xff] }
  0xb4   : > { %v1616_v45 = vadd.f32 %v1459_v43, %v1091_v28  ;;  %v1093_v46 = vadd.f32 %v1092_v44, %v821_v39  ;;  %v680_v28 = vpack.c.bf16 %v3271_v30, %v3248_v6  ;;  %v3323_v43 = vld [vmem:[#allocation2 + $0xec] sm:$0xff]  ;;  %v3325_v44 = vld [vmem:[#allocation2 + $0xf4] sm:$0xff]  ;;  %v2203_v22 = vpop.permute.xlu2 %2202 }
  0xb5   : > { %v2692_v48 = vadd.f32 %v2629_v42, %v2628_v40  ;;  %v1320_v42 = vpack.c.bf16 %v3314_v36, %v3312_v35 }
  0xb6   : > { %v1892_v49 = vpop.f32.mrf.mxu3 }
  0xb7   : > { %v2049_v50 = vadd.f32 %v1892_v49, %v1616_v45 }
  0xb9   : > { %v2497_v57 = vmul.f32 %v2188_v47, %v2049_v50  ;;  %v824_v58 = vpop.f32.mrf.mxu0  ;;  %v1753_v47 = vpack.c.bf16 %v3325_v44, %v3323_v43 }
  0xbb   : > { %v2560_v62 = vadd.f32 %v2559_v41, %v2497_v57  ;;  %v2630_v1 = vmul.f32 %v2497_v57, %v2049_v50  ;;  %v1461_v55 = vpop.f32.mrf.mxu2  ;;  %v1095_v2 = vpop.f32.mrf.mxu1 }
  0xbc   : > { %v1617_v3 = vadd.f32 %v1461_v55, %v1093_v46  ;;  %v1096_v4 = vadd.f32 %v1095_v2, %v824_v58  ;;  %2869 = vmatmul.msk.bf16.gmra.mxu0 %vm314_vm0, %v679_v53  ;;  %v2135_v2 = vld [vmem:[%s3095_s9 + $0xc0] sm:$0xff] }
  0xbd   : > { %v2693_v9 = vadd.f32 %v2692_v48, %v2630_v1  ;;  %v2131_v48 = vld [vmem:[%s3095_s9 + $0xa0] sm:$0xff]  ;;  %v2208_v1 = vpop.permute.xlu0 %2207  ;;  %2297 = vperm.xlu0 %3016, %v2135_v2  }
  0xbe   : > { %v1894_v51 = vpop.f32.mrf.mxu3  ;;  %2905 = vmatmul.msk.bf16.gmra.mxu1 %vm314_vm0, %v581_v61  ;;  %2277 = vperm.xlu2 %3018, %v2131_v48  }
  0xbf   : > { %v2050_v10 = vadd.f32 %v1894_v51, %v1617_v3  ;;  %v681_v3 = vpack.c.bf16 %v3297_v7, %v3273_v31 }
  0xc0   : > { %2941 = vmatmul.msk.bf16.gmra.mxu2 %vm314_vm0, %v1319_v5  ;;  %v287_v5 = vld [vmem:[%s3085_s5 + $0x128] sm:$0xff] }
  0xc1   : > { %v2498_v13 = vmul.f32 %v2193_v63, %v2050_v10  ;;  %v826_v14 = vpop.f32.mrf.mxu0  ;;  %v3338_v63 = vld [vmem:[#allocation2 + $0xe8] sm:$0xff]  ;;  %352 = vst.msk [vmem:[#allocation2 + $0x128] sm:$0xff] %vm314_vm0, %v287_v5 }
  0xc3   : > { %v2561_v15 = vadd.f32 %v2560_v62, %v2498_v13  ;;  %v2631_v16 = vmul.f32 %v2498_v13, %v2050_v10  ;;  %2977 = vmatmul.msk.bf16.gmra.mxu3 %vm314_vm0, %v1752_v11  ;;  %v1464_v17 = vpop.f32.mrf.mxu2  ;;  %v1097_v18 = vpop.f32.mrf.mxu1  ;;  %v3340_v10 = vld [vmem:[#allocation2 + $0xf0] sm:$0xff]  ;;  %v583_v11 = vpack.c.bf16 %v3286_v59, %v3262_v23 }
  0xc4   : > { %v1618_v19 = vadd.f32 %v1464_v17, %v1096_v4  ;;  %v1098_v20 = vadd.f32 %v1097_v18, %v826_v14  ;;  %v286_v4 = vld [vmem:[%s3085_s5 + $0x120] sm:$0xff]  ;;  %v2213_v59 = vpop.permute.xlu1 %2212 }
  0xc5   : > { %v2694_v24 = vadd.f32 %v2693_v9, %v2631_v16  ;;  %351 = vst.msk [vmem:[#allocation2 + $0x120] sm:$0xff] %vm314_vm0, %v286_v4  ;;  %v1321_v16 = vpack.c.bf16 %v3340_v10, %v3338_v63  ;;  %v3349_v17 = vld [vmem:[#allocation2 + $0xfc] sm:$0xff]  ;;  %v3351_v18 = vld [vmem:[#allocation2 + $0x104] sm:$0xff] }
  0xc6   : > { %v1897_v25 = vpop.f32.mrf.mxu3 }
  0xc7   : > { %v2051_v26 = vadd.f32 %v1897_v25, %v1618_v19 }
  0xc9   : > { %v2499_v33 = vmul.f32 %v2198_v21, %v2051_v26  ;;  %v829_v34 = vpop.f32.mrf.mxu0  ;;  %v1754_v21 = vpack.c.bf16 %v3351_v18, %v3349_v17 }
  0xcb   : > { %v2562_v38 = vadd.f32 %v2561_v15, %v2499_v33  ;;  %v2632_v39 = vmul.f32 %v2499_v33, %v2051_v26  ;;  %v1466_v6 = vpop.f32.mrf.mxu2  ;;  %v1100_v30 = vpop.f32.mrf.mxu1 }
  0xcc   : > { %v1619_v40 = vadd.f32 %v1466_v6, %v1098_v20  ;;  %v1101_v41 = vadd.f32 %v1100_v30, %v829_v34  ;;  %2870 = vmatmul.msk.bf16.gmra.mxu0 %vm314_vm0, %v680_v28  ;;  %v2134_v30 = vld [vmem:[%s3095_s9 + $0xb8] sm:$0xff] }
  0xcd   : > { %v2695_v45 = vadd.f32 %v2694_v24, %v2632_v39  ;;  %v2136_v24 = vld [vmem:[%s3095_s9 + $0xc8] sm:$0xff]  ;;  %v2218_v39 = vpop.permute.xlu2 %2217  ;;  %2292 = vperm.xlu2 %3018, %v2134_v30  }
  0xce   : > { %v1899_v0 = vpop.f32.mrf.mxu3  ;;  %2906 = vmatmul.msk.bf16.gmra.mxu1 %vm314_vm0, %v582_v37  ;;  %2302 = vperm.xlu1 %3017, %v2136_v24  }
  0xcf   : > { %v2052_v46 = vadd.f32 %v1899_v0, %v1619_v40  ;;  %v682_v40 = vpack.c.bf16 %v3323_v43, %v3299_v8 }
  0xd0   : > { %2942 = vmatmul.msk.bf16.gmra.mxu2 %vm314_vm0, %v1320_v42  ;;  %v289_v42 = vld [vmem:[%s3085_s5 + $0x138] sm:$0xff] }
  0xd1   : > { %v2500_v49 = vmul.f32 %v2203_v22, %v2052_v46  ;;  %v831_v50 = vpop.f32.mrf.mxu0  ;;  %v3364_v22 = vld [vmem:[#allocation2 + $0xf8] sm:$0xff]  ;;  %354 = vst.msk [vmem:[#allocation2 + $0x138] sm:$0xff] %vm314_vm0, %v289_v42 }
  0xd3   : > { %v2563_v52 = vadd.f32 %v2562_v38, %v2500_v49  ;;  %v2633_v53 = vmul.f32 %v2500_v49, %v2052_v46  ;;  %2978 = vmatmul.msk.bf16.gmra.mxu3 %vm314_vm0, %v1753_v47  ;;  %v1469_v54 = vpop.f32.mrf.mxu2  ;;  %v1102_v56 = vpop.f32.mrf.mxu1  ;;  %v3366_v46 = vld [vmem:[#allocation2 + $0x100] sm:$0xff]  ;;  %v584_v47 = vpack.c.bf16 %v3312_v35, %v3288_v60 }
  0xd4   : > { %v1620_v57 = vadd.f32 %v1469_v54, %v1101_v41  ;;  %v1103_v58 = vadd.f32 %v1102_v56, %v831_v50  ;;  %v288_v41 = vld [vmem:[%s3085_s5 + $0x130] sm:$0xff]  ;;  %v2223_v35 = vpop.permute.xlu0 %2222 }
  0xd5   : > { %v2696_v61 = vadd.f32 %v2695_v45, %v2633_v53  ;;  %353 = vst.msk [vmem:[#allocation2 + $0x130] sm:$0xff] %vm314_vm0, %v288_v41  ;;  %v1322_v53 = vpack.c.bf16 %v3366_v46, %v3364_v22  ;;  %v3375_v54 = vld [vmem:[#allocation2 + $0x10c] sm:$0xff]  ;;  %v3377_v56 = vld [vmem:[#allocation2 + $0x114] sm:$0xff] }
  0xd6   : > { %v1902_v62 = vpop.f32.mrf.mxu3 }
  0xd7   : > { %v2053_v55 = vadd.f32 %v1902_v62, %v1620_v57  ;;  %v2138_v62 = vld [vmem:[%s3095_s9 + $0xd8] sm:$0xff] }
  0xd8   : > { %2312 = vperm.xlu0 %3016, %v2138_v62  }
  0xd9   : > { %v2501_v9 = vmul.f32 %v2208_v1, %v2053_v55  ;;  %v834_v51 = vpop.f32.mrf.mxu0 }
  0xdb   : > { %v2564_v12 = vadd.f32 %v2563_v52, %v2501_v9  ;;  %v2634_v13 = vmul.f32 %v2501_v9, %v2053_v55  ;;  %v1471_v31 = vpop.f32.mrf.mxu2  ;;  %v1105_v7 = vpop.f32.mrf.mxu1 }
  0xdc   : > { %v1621_v14 = vadd.f32 %v1471_v31, %v1103_v58  ;;  %v1106_v15 = vadd.f32 %v1105_v7, %v834_v51  ;;  %2871 = vmatmul.msk.bf16.gmra.mxu0 %vm314_vm0, %v681_v3  ;;  %v2139_v7 = vld [vmem:[%s3095_s9 + $0xe0] sm:$0xff] }
  0xdd   : > { %v2697_v19 = vadd.f32 %v2696_v61, %v2634_v13  ;;  %v1755_v61 = vpack.c.bf16 %v3377_v56, %v3375_v54  ;;  %v2228_v13 = vpop.permute.xlu1 %2227  ;;  %2317 = vperm.xlu1 %3017, %v2139_v7  }
  0xde   : > { %v1904_v23 = vpop.f32.mrf.mxu3  ;;  %2907 = vmatmul.msk.bf16.gmra.mxu1 %vm314_vm0, %v583_v11 }
  0xdf   : > { %v2054_v20 = vadd.f32 %v1904_v23, %v1621_v14  ;;  %v683_v14 = vpack.c.bf16 %v3349_v17, %v3325_v44 }
  0xe0   : > { %2943 = vmatmul.msk.bf16.gmra.mxu2 %vm314_vm0, %v1321_v16  ;;  %v291_v16 = vld [vmem:[%s3085_s5 + $0x148] sm:$0xff] }
  0xe1   : > { %v2502_v25 = vmul.f32 %v2213_v59, %v2054_v20  ;;  %v836_v26 = vpop.f32.mrf.mxu0  ;;  %v3390_v59 = vld [vmem:[#allocation2 + $0x108] sm:$0xff]  ;;  %356 = vst.msk [vmem:[#allocation2 + $0x148] sm:$0xff] %vm314_vm0, %v291_v16 }
  0xe3   : > { %v2565_v27 = vadd.f32 %v2564_v12, %v2502_v25  ;;  %v2635_v28 = vmul.f32 %v2502_v25, %v2054_v20  ;;  %2979 = vmatmul.msk.bf16.gmra.mxu3 %vm314_vm0, %v1754_v21  ;;  %v1474_v29 = vpop.f32.mrf.mxu2  ;;  %v1107_v32 = vpop.f32.mrf.mxu1  ;;  %v3392_v20 = vld [vmem:[#allocation2 + $0x110] sm:$0xff]  ;;  %v585_v21 = vpack.c.bf16 %v3338_v63, %v3314_v36 }
  0xe4   : > { %v1622_v33 = vadd.f32 %v1474_v29, %v1106_v15  ;;  %v1108_v34 = vadd.f32 %v1107_v32, %v836_v26  ;;  %v290_v15 = vld [vmem:[%s3085_s5 + $0x140] sm:$0xff]  ;;  %v2233_v63 = vpop.permute.xlu2 %2232 }
  0xe5   : > { %v2698_v37 = vadd.f32 %v2697_v19, %v2635_v28  ;;  %355 = vst.msk [vmem:[#allocation2 + $0x140] sm:$0xff] %vm314_vm0, %v290_v15  ;;  %v1323_v28 = vpack.c.bf16 %v3392_v20, %v3390_v59  ;;  %v3401_v29 = vld [vmem:[#allocation2 + $0x11c] sm:$0xff]  ;;  %v3403_v32 = vld [vmem:[#allocation2 + $0x124] sm:$0xff] }
  0xe6   : > { %v1907_v38 = vpop.f32.mrf.mxu3 }
  0xe7   : > { %v2055_v6 = vadd.f32 %v1907_v38, %v1622_v33  ;;  %v2137_v38 = vld [vmem:[%s3095_s9 + $0xd0] sm:$0xff] }
  0xe8   : > { %2307 = vperm.xlu2 %3018, %v2137_v38   ;;  %v587_v38 = vpack.c.bf16 %v3390_v59, %v3366_v46 }
  0xe9   : > { %v2503_v45 = vmul.f32 %v2218_v39, %v2055_v6  ;;  %v839_v0 = vpop.f32.mrf.mxu0 }
  0xeb   : > { %v2566_v48 = vadd.f32 %v2565_v27, %v2503_v45  ;;  %v2636_v49 = vmul.f32 %v2503_v45, %v2055_v6  ;;  %v1476_v8 = vpop.f32.mrf.mxu2  ;;  %v1110_v43 = vpop.f32.mrf.mxu1 }
  0xec   : > { %v1623_v50 = vadd.f32 %v1476_v8, %v1108_v34  ;;  %v1111_v52 = vadd.f32 %v1110_v43, %v839_v0  ;;  %2872 = vmatmul.msk.bf16.gmra.mxu0 %vm314_vm0, %v682_v40  ;;  %v2141_v43 = vld [vmem:[%s3095_s9 + $0xf0] sm:$0xff] }
  0xed   : > { %v2699_v57 = vadd.f32 %v2698_v37, %v2636_v49  ;;  %v1756_v37 = vpack.c.bf16 %v3403_v32, %v3401_v29  ;;  %v2238_v49 = vpop.permute.xlu0 %2237  ;;  %2327 = vperm.xlu0 %3016, %v2141_v43  }
  0xee   : > { %v1909_v60 = vpop.f32.mrf.mxu3  ;;  %2908 = vmatmul.msk.bf16.gmra.mxu1 %vm314_vm0, %v584_v47 }
  0xef   : > { %v2056_v58 = vadd.f32 %v1909_v60, %v1623_v50  ;;  %v684_v50 = vpack.c.bf16 %v3375_v54, %v3351_v18 }
  0xf0   : > { %2944 = vmatmul.msk.bf16.gmra.mxu2 %vm314_vm0, %v1322_v53  ;;  %v293_v53 = vld [vmem:[%s3085_s5 + $0x158] sm:$0xff] }
  0xf1   : > { %v2504_v1 = vmul.f32 %v2223_v35, %v2056_v58  ;;  %v841_v55 = vpop.f32.mrf.mxu0  ;;  %v3416_v35 = vld [vmem:[#allocation2 + $0x118] sm:$0xff]  ;;  %358 = vst.msk [vmem:[#allocation2 + $0x158] sm:$0xff] %vm314_vm0, %v293_v53 }
  0xf3   : > { %v2567_v2 = vadd.f32 %v2566_v48, %v2504_v1  ;;  %v2637_v3 = vmul.f32 %v2504_v1, %v2056_v58  ;;  %2980 = vmatmul.msk.bf16.gmra.mxu3 %vm314_vm0, %v1755_v61  ;;  %v1479_v4 = vpop.f32.mrf.mxu2  ;;  %v1112_v5 = vpop.f32.mrf.mxu1  ;;  %v3418_v58 = vld [vmem:[#allocation2 + $0x120] sm:$0xff]  ;;  %v586_v61 = vpack.c.bf16 %v3364_v22, %v3340_v10 }
  0xf4   : > { %v1624_v9 = vadd.f32 %v1479_v4, %v1111_v52  ;;  %v1113_v51 = vadd.f32 %v1112_v5, %v841_v55  ;;  %v292_v52 = vld [vmem:[%s3085_s5 + $0x150] sm:$0xff]  ;;  %v2243_v22 = vpop.permute.xlu1 %2242 }
  0xf5   : > { %v2700_v11 = vadd.f32 %v2699_v57, %v2637_v3  ;;  %357 = vst.msk [vmem:[#allocation2 + $0x150] sm:$0xff] %vm314_vm0, %v292_v52  ;;  %v1324_v3 = vpack.c.bf16 %v3418_v58, %v3416_v35  ;;  %v3427_v4 = vld [vmem:[#allocation2 + $0x12c] sm:$0xff]  ;;  %v3429_v5 = vld [vmem:[#allocation2 + $0x134] sm:$0xff]  ;;  %v2253_v59 = vpop.permute.xlu0 %2252 }
  0xf6   : > { %v1912_v12 = vpop.f32.mrf.mxu3 }
  0xf7   : > { %v2057_v31 = vadd.f32 %v1912_v12, %v1624_v9  ;;  %v2142_v12 = vld [vmem:[%s3095_s9 + $0xf8] sm:$0xff] }
  0xf8   : > { %2332 = vperm.xlu1 %3017, %v2142_v12   ;;  %v3472_v12 = vld [vmem:[#allocation2 + $0x140] sm:$0xff] }
  0xf9   : > { %v2505_v19 = vmul.f32 %v2228_v13, %v2057_v31  ;;  %v844_v23 = vpop.f32.mrf.mxu0 }
  0xfb   : > { %v2568_v24 = vadd.f32 %v2567_v2, %v2505_v19  ;;  %v2638_v25 = vmul.f32 %v2505_v19, %v2057_v31  ;;  %v1481_v44 = vpop.f32.mrf.mxu2  ;;  %v1115_v17 = vpop.f32.mrf.mxu1 }
  0xfc   : > { %v1625_v26 = vadd.f32 %v1481_v44, %v1113_v51  ;;  %v1116_v27 = vadd.f32 %v1115_v17, %v844_v23  ;;  %2873 = vmatmul.msk.bf16.gmra.mxu0 %vm314_vm0, %v683_v14  ;;  %v2140_v17 = vld [vmem:[%s3095_s9 + $0xe8] sm:$0xff] }
  0xfd   : > { %v2701_v33 = vadd.f32 %v2700_v11, %v2638_v25  ;;  %v1757_v11 = vpack.c.bf16 %v3429_v5, %v3427_v4  ;;  %v2248_v25 = vpop.permute.xlu2 %2247  ;;  %2322 = vperm.xlu2 %3018, %v2140_v17   ;;  %v2143_v17 = vld [vmem:[%s3095_s9 + $0x100] sm:$0xff] }
  0xfe   : > { %v1914_v36 = vpop.f32.mrf.mxu3  ;;  %2909 = vmatmul.msk.bf16.gmra.mxu1 %vm314_vm0, %v585_v21 }
  0xff   : > { %v2058_v34 = vadd.f32 %v1914_v36, %v1625_v26  ;;  %v2144_v26 = vld [vmem:[%s3095_s9 + $0x108] sm:$0xff] }
 0x100   : > { %2945 = vmatmul.msk.bf16.gmra.mxu2 %vm314_vm0, %v1323_v28  ;;  %2342 = vperm.xlu0 %3016, %v2144_v26   ;;  %v294_v28 = vld [vmem:[%s3085_s5 + $0x160] sm:$0xff]  ;;  %v2153_v26 = vld [vmem:[%s3095_s9 + $0x150] sm:$0xff] }
 0x101   : > { %v2506_v39 = vmul.f32 %v2233_v63, %v2058_v34  ;;  %v846_v6 = vpop.f32.mrf.mxu0  ;;  %359 = vst.msk [vmem:[#allocation2 + $0x160] sm:$0xff] %vm314_vm0, %v294_v28 }
 0x103   : > { %v2569_v30 = vadd.f32 %v2568_v24, %v2506_v39  ;;  %v2639_v40 = vmul.f32 %v2506_v39, %v2058_v34  ;;  %2981 = vmatmul.msk.bf16.gmra.mxu3 %vm314_vm0, %v1756_v37  ;;  %v1484_v41 = vpop.f32.mrf.mxu2  ;;  %v1117_v42 = vpop.f32.mrf.mxu1  ;;  %v3443_v34 = vld [vmem:[#allocation2 + $0x128] sm:$0xff]  ;;  %v3445_v37 = vld [vmem:[#allocation2 + $0x130] sm:$0xff] }
 0x104   : > { %v1626_v45 = vadd.f32 %v1484_v41, %v1116_v27  ;;  %v1118_v0 = vadd.f32 %v1117_v42, %v846_v6  ;;  %v685_v27 = vpack.c.bf16 %v3401_v29, %v3377_v56  ;;  %v1325_v41 = vpack.c.bf16 %v3445_v37, %v3443_v34  ;;  %v3454_v42 = vld [vmem:[#allocation2 + $0x13c] sm:$0xff] }
 0x105   : > { %v2702_v47 = vadd.f32 %v2701_v33, %v2639_v40  ;;  %v295_v33 = vld [vmem:[%s3085_s5 + $0x168] sm:$0xff]  ;;  %2337 = vperm.xlu2 %3018, %v2143_v17   ;;  %v301_v17 = vld [vmem:[%s3085_s5 + $0x198] sm:$0xff] }
 0x106   : > { %v1917_v48 = vpop.f32.mrf.mxu3  ;;  %360 = vst.msk [vmem:[#allocation2 + $0x168] sm:$0xff] %vm314_vm0, %v295_v33 }
 0x107   : > { %v2059_v8 = vadd.f32 %v1917_v48, %v1626_v45  ;;  %v3456_v45 = vld [vmem:[#allocation2 + $0x144] sm:$0xff]  ;;  %366 = vst.msk [vmem:[#allocation2 + $0x198] sm:$0xff] %vm314_vm0, %v301_v17 }
 0x108   : > { %v1758_v48 = vpack.c.bf16 %v3456_v45, %v3454_v42  ;;  %v2171_v17 = vld [vmem:[%s3095_s9 + $0x1e0] sm:$0xff] }
 0x109   : > { %v2507_v57 = vmul.f32 %v2238_v49, %v2059_v8  ;;  %v849_v60 = vpop.f32.mrf.mxu0  ;;  %v2147_v49 = vld [vmem:[%s3095_s9 + $0x120] sm:$0xff] }
 0x10a   : > { %2357 = vperm.xlu0 %3016, %v2147_v49  }
 0x10b   : > { %v2570_v62 = vadd.f32 %v2569_v30, %v2507_v57  ;;  %v2640_v1 = vmul.f32 %v2507_v57, %v2059_v8  ;;  %v1486_v18 = vpop.f32.mrf.mxu2  ;;  %v1120_v54 = vpop.f32.mrf.mxu1 }
 0x10c   : > { %v1627_v55 = vadd.f32 %v1486_v18, %v1118_v0  ;;  %v1121_v2 = vadd.f32 %v1120_v54, %v849_v60  ;;  %2874 = vmatmul.msk.bf16.gmra.mxu0 %vm314_vm0, %v684_v50  ;;  %v2145_v60 = vld [vmem:[%s3095_s9 + $0x110] sm:$0xff]  ;;  %v2258_v54 = vpop.permute.xlu1 %2257 }
 0x10d   : > { %v2703_v9 = vadd.f32 %v2702_v47, %v2640_v1  ;;  %2347 = vperm.xlu1 %3017, %v2145_v60  }
 0x10e   : > { %v1919_v10 = vpop.f32.mrf.mxu3  ;;  %2910 = vmatmul.msk.bf16.gmra.mxu1 %vm314_vm0, %v586_v61 }
 0x10f   : > { %v2060_v51 = vadd.f32 %v1919_v10, %v1627_v55  ;;  %v297_v10 = vld [vmem:[%s3085_s5 + $0x178] sm:$0xff] }
 0x110   : > { %2946 = vmatmul.msk.bf16.gmra.mxu2 %vm314_vm0, %v1324_v3  ;;  %v686_v3 = vpack.c.bf16 %v3427_v4, %v3403_v32  ;;  %362 = vst.msk [vmem:[#allocation2 + $0x178] sm:$0xff] %vm314_vm0, %v297_v10  ;;  %v2148_v4 = vld [vmem:[%s3095_s9 + $0x128] sm:$0xff] }
 0x111   : > { %v2508_v13 = vmul.f32 %v2243_v22, %v2060_v51  ;;  %v851_v31 = vpop.f32.mrf.mxu0 }
 0x113   : > { %v2571_v7 = vadd.f32 %v2570_v62, %v2508_v13  ;;  %v2641_v14 = vmul.f32 %v2508_v13, %v2060_v51  ;;  %2982 = vmatmul.msk.bf16.gmra.mxu3 %vm314_vm0, %v1757_v11  ;;  %v1489_v15 = vpop.f32.mrf.mxu2  ;;  %v1122_v16 = vpop.f32.mrf.mxu1  ;;  %v3470_v11 = vld [vmem:[#allocation2 + $0x138] sm:$0xff]  ;;  %v588_v13 = vpack.c.bf16 %v3416_v35, %v3392_v20 }
 0x114   : > { %v1628_v19 = vadd.f32 %v1489_v15, %v1121_v2  ;;  %v1123_v23 = vadd.f32 %v1122_v16, %v851_v31  ;;  %v2150_v2 = vld [vmem:[%s3095_s9 + $0x138] sm:$0xff] }
 0x115   : > { %v2704_v21 = vadd.f32 %v2703_v9, %v2641_v14  ;;  %2372 = vperm.xlu0 %3016, %v2150_v2   ;;  %v296_v9 = vld [vmem:[%s3085_s5 + $0x170] sm:$0xff]  ;;  %2362 = vperm.xlu1 %3017, %v2148_v4  }
 0x116   : > { %v1922_v24 = vpop.f32.mrf.mxu3  ;;  %361 = vst.msk [vmem:[#allocation2 + $0x170] sm:$0xff] %vm314_vm0, %v296_v9  ;;  %v2159_v9 = vld [vmem:[%s3095_s9 + $0x180] sm:$0xff] }
 0x117   : > { %v2061_v44 = vadd.f32 %v1922_v24, %v1628_v19  ;;  %v1326_v19 = vpack.c.bf16 %v3472_v12, %v3470_v11  ;;  %v2263_v24 = vpop.permute.xlu2 %2262 }
 0x119   : > { %v2509_v36 = vmul.f32 %v2248_v25, %v2061_v44  ;;  %v854_v63 = vpop.f32.mrf.mxu0 }
 0x11b   : > { %v2572_v39 = vadd.f32 %v2571_v7, %v2509_v36  ;;  %v2642_v56 = vmul.f32 %v2509_v36, %v2061_v44  ;;  %v1491_v29 = vpop.f32.mrf.mxu2  ;;  %v1125_v6 = vpop.f32.mrf.mxu1 }
 0x11c   : > { %v1629_v30 = vadd.f32 %v1491_v29, %v1123_v23  ;;  %v1126_v40 = vadd.f32 %v1125_v6, %v854_v63  ;;  %2875 = vmatmul.msk.bf16.gmra.mxu0 %vm314_vm0, %v685_v27  ;;  %v3482_v23 = vld [vmem:[#allocation2 + $0x14c] sm:$0xff] }
 0x11d   : > { %v2705_v0 = vadd.f32 %v2704_v21, %v2642_v56  ;;  %v3484_v21 = vld [vmem:[#allocation2 + $0x154] sm:$0xff]  ;;  %2387 = vperm.xlu0 %3016, %v2153_v26  }
 0x11e   : > { %v1924_v46 = vpop.f32.mrf.mxu3  ;;  %2911 = vmatmul.msk.bf16.gmra.mxu1 %vm314_vm0, %v587_v38  ;;  %v1759_v44 = vpack.c.bf16 %v3484_v21, %v3482_v23 }
 0x11f   : > { %v2062_v47 = vadd.f32 %v1924_v46, %v1629_v30  ;;  %v687_v46 = vpack.c.bf16 %v3454_v42, %v3429_v5 }
 0x120   : > { %2947 = vmatmul.msk.bf16.gmra.mxu2 %vm314_vm0, %v1325_v41 }
 0x121   : > { %v2510_v8 = vmul.f32 %v2253_v59, %v2062_v47  ;;  %v856_v43 = vpop.f32.mrf.mxu0  ;;  %v298_v59 = vld [vmem:[%s3085_s5 + $0x180] sm:$0xff] }
 0x122   : > { %363 = vst.msk [vmem:[#allocation2 + $0x180] sm:$0xff] %vm314_vm0, %v298_v59 }
 0x123   : > { %v2573_v50 = vadd.f32 %v2572_v39, %v2510_v8  ;;  %v2643_v52 = vmul.f32 %v2510_v8, %v2062_v47  ;;  %2983 = vmatmul.msk.bf16.gmra.mxu3 %vm314_vm0, %v1758_v48  ;;  %v1494_v53 = vpop.f32.mrf.mxu2  ;;  %v1127_v57 = vpop.f32.mrf.mxu1  ;;  %v2151_v39 = vld [vmem:[%s3095_s9 + $0x140] sm:$0xff]  ;;  %v299_v47 = vld [vmem:[%s3085_s5 + $0x188] sm:$0xff] }
 0x124   : > { %v1630_v61 = vadd.f32 %v1494_v53, %v1126_v40  ;;  %v1128_v62 = vadd.f32 %v1127_v57, %v856_v43  ;;  %2377 = vperm.xlu1 %3017, %v2151_v39   ;;  %v2268_v40 = vpop.permute.xlu0 %2267  ;;  %v3499_v8 = vld [vmem:[#allocation2 + $0x148] sm:$0xff]  ;;  %v3501_v43 = vld [vmem:[#allocation2 + $0x150] sm:$0xff]  ;;  %364 = vst.msk [vmem:[#allocation2 + $0x188] sm:$0xff] %vm314_vm0, %v299_v47  ;;  %v2154_v57 = vld [vmem:[%s3095_s9 + $0x158] sm:$0xff] }
 0x125   : > { %v2706_v1 = vadd.f32 %v2705_v0, %v2643_v52  ;;  %v2156_v0 = vld [vmem:[%s3095_s9 + $0x168] sm:$0xff]  ;;  %v2165_v47 = vld [vmem:[%s3095_s9 + $0x1b0] sm:$0xff] }
 0x126   : > { %v1927_v18 = vpop.f32.mrf.mxu3  ;;  %2402 = vperm.xlu0 %3016, %v2156_v0   ;;  %v2160_v39 = vld [vmem:[%s3095_s9 + $0x188] sm:$0xff] }
 0x127   : > { %v2063_v55 = vadd.f32 %v1927_v18, %v1630_v61  ;;  %v3513_v18 = vld [vmem:[#allocation2 + $0x164] sm:$0xff] }
 0x129   : > { %v2511_v22 = vmul.f32 %v2258_v54, %v2063_v55  ;;  %v859_v51 = vpop.f32.mrf.mxu0 }
 0x12b   : > { %v2574_v31 = vadd.f32 %v2573_v50, %v2511_v22  ;;  %v2644_v7 = vmul.f32 %v2511_v22, %v2063_v55  ;;  %v1496_v14 = vpop.f32.mrf.mxu2  ;;  %v1130_v32 = vpop.f32.mrf.mxu1  ;;  %v589_v50 = vpack.c.bf16 %v3443_v34, %v3418_v58  ;;  %v2146_v34 = vld [vmem:[%s3095_s9 + $0x118] sm:$0xff] }
 0x12c   : > { %v1631_v15 = vadd.f32 %v1496_v14, %v1128_v62  ;;  %v1131_v16 = vadd.f32 %v1130_v32, %v859_v51  ;;  %2876 = vmatmul.msk.bf16.gmra.mxu0 %vm314_vm0, %v686_v3  ;;  %v1327_v62 = vpack.c.bf16 %v3501_v43, %v3499_v8  ;;  %2392 = vperm.xlu1 %3017, %v2154_v57   ;;  %v2273_v55 = vpop.permute.xlu1 %2272  ;;  %v2157_v14 = vld [vmem:[%s3095_s9 + $0x170] sm:$0xff]  ;;  %v2283_v0 = vpop.permute.xlu0 %2282 }
 0x12d   : > { %v2707_v20 = vadd.f32 %v2706_v1, %v2644_v7  ;;  %v3511_v1 = vld [vmem:[#allocation2 + $0x15c] sm:$0xff]  ;;  %2352 = vperm.xlu2 %3018, %v2146_v34  }
 0x12e   : > { %v1929_v35 = vpop.f32.mrf.mxu3  ;;  %2912 = vmatmul.msk.bf16.gmra.mxu1 %vm314_vm0, %v588_v13  ;;  %v1760_v3 = vpack.c.bf16 %v3513_v18, %v3511_v1  ;;  %2417 = vperm.xlu0 %3016, %v2159_v9   ;;  %v303_v9 = vld [vmem:[%s3085_s5 + $0x1a8] sm:$0xff] }
 0x12f   : > { %v2064_v25 = vadd.f32 %v1929_v35, %v1631_v15  ;;  %368 = vst.msk [vmem:[#allocation2 + $0x1a8] sm:$0xff] %vm314_vm0, %v303_v9 }
 0x130   : > { %2948 = vmatmul.msk.bf16.gmra.mxu2 %vm314_vm0, %v1326_v19 }
 0x131   : > { %v2512_v27 = vmul.f32 %v2263_v24, %v2064_v25  ;;  %v861_v28 = vpop.f32.mrf.mxu0  ;;  %v2162_v24 = vld [vmem:[%s3095_s9 + $0x198] sm:$0xff] }
 0x133   : > { %v2575_v33 = vadd.f32 %v2574_v31, %v2512_v27  ;;  %v2645_v36 = vmul.f32 %v2512_v27, %v2064_v25  ;;  %2984 = vmatmul.msk.bf16.gmra.mxu3 %vm314_vm0, %v1759_v44  ;;  %v1499_v63 = vpop.f32.mrf.mxu2  ;;  %v1132_v38 = vpop.f32.mrf.mxu1  ;;  %v688_v25 = vpack.c.bf16 %v3482_v23, %v3456_v45  ;;  %v300_v44 = vld [vmem:[%s3085_s5 + $0x190] sm:$0xff] }
 0x134   : > { %v1632_v56 = vadd.f32 %v1499_v63, %v1131_v16  ;;  %v1133_v29 = vadd.f32 %v1132_v38, %v861_v28  ;;  %2407 = vperm.xlu1 %3017, %v2157_v14   ;;  %v2149_v16 = vld [vmem:[%s3095_s9 + $0x130] sm:$0xff]  ;;  %v3529_v28 = vld [vmem:[#allocation2 + $0x158] sm:$0xff]  ;;  %365 = vst.msk [vmem:[#allocation2 + $0x190] sm:$0xff] %vm314_vm0, %v300_v44  ;;  %v2288_v34 = vpop.permute.xlu1 %2287 }
 0x135   : > { %v2708_v6 = vadd.f32 %v2707_v20, %v2645_v36  ;;  %v2278_v20 = vpop.permute.xlu2 %2277  ;;  %2367 = vperm.xlu2 %3018, %v2149_v16   ;;  %v590_v36 = vpack.c.bf16 %v3470_v11, %v3445_v37  ;;  %v2152_v11 = vld [vmem:[%s3095_s9 + $0x148] sm:$0xff] }
 0x136   : > { %v1932_v30 = vpop.f32.mrf.mxu3  ;;  %2432 = vperm.xlu0 %3016, %v2162_v24  }
 0x137   : > { %v2065_v41 = vadd.f32 %v1932_v30, %v1632_v56  ;;  %v3541_v30 = vld [vmem:[#allocation2 + $0x16c] sm:$0xff] }
 0x139   : > { %v2513_v48 = vmul.f32 %v2268_v40, %v2065_v41  ;;  %v864_v49 = vpop.f32.mrf.mxu0  ;;  %v3543_v40 = vld [vmem:[#allocation2 + $0x174] sm:$0xff] }
 0x13a   : > { %v1761_v59 = vpack.c.bf16 %v3543_v40, %v3541_v30 }
 0x13b   : > { %v2576_v52 = vadd.f32 %v2575_v33, %v2513_v48  ;;  %v2646_v53 = vmul.f32 %v2513_v48, %v2065_v41  ;;  %v1501_v5 = vpop.f32.mrf.mxu2  ;;  %v1135_v42 = vpop.f32.mrf.mxu1  ;;  %v3531_v33 = vld [vmem:[#allocation2 + $0x160] sm:$0xff] }
 0x13c   : > { %v1633_v60 = vadd.f32 %v1501_v5, %v1133_v29  ;;  %v1136_v61 = vadd.f32 %v1135_v42, %v864_v49  ;;  %2877 = vmatmul.msk.bf16.gmra.mxu0 %vm314_vm0, %v687_v46  ;;  %2422 = vperm.xlu1 %3017, %v2160_v39   ;;  %v2163_v42 = vld [vmem:[%s3095_s9 + $0x1a0] sm:$0xff] }
 0x13d   : > { %v2709_v58 = vadd.f32 %v2708_v6, %v2646_v53  ;;  %v1328_v6 = vpack.c.bf16 %v3531_v33, %v3529_v28  ;;  %2382 = vperm.xlu2 %3018, %v2152_v11   ;;  %v2293_v24 = vpop.permute.xlu2 %2292  ;;  %v2298_v11 = vpop.permute.xlu0 %2297 }
 0x13e   : > { %v1934_v54 = vpop.f32.mrf.mxu3  ;;  %2913 = vmatmul.msk.bf16.gmra.mxu1 %vm314_vm0, %v589_v50  ;;  %2447 = vperm.xlu0 %3016, %v2165_v47   ;;  %v305_v47 = vld [vmem:[%s3085_s5 + $0x1b8] sm:$0xff] }
 0x13f   : > { %v2066_v2 = vadd.f32 %v1934_v54, %v1633_v60  ;;  %370 = vst.msk [vmem:[#allocation2 + $0x1b8] sm:$0xff] %vm314_vm0, %v305_v47 }
 0x140   : > { %2949 = vmatmul.msk.bf16.gmra.mxu2 %vm314_vm0, %v1327_v62  ;;  %v2155_v62 = vld [vmem:[%s3095_s9 + $0x160] sm:$0xff] }
 0x141   : > { %v2514_v10 = vmul.f32 %v2273_v55, %v2066_v2  ;;  %v866_v22 = vpop.f32.mrf.mxu0  ;;  %v2168_v55 = vld [vmem:[%s3095_s9 + $0x1c8] sm:$0xff] }
 0x143   : > { %v2577_v51 = vadd.f32 %v2576_v52, %v2514_v10  ;;  %v2647_v13 = vmul.f32 %v2514_v10, %v2066_v2  ;;  %2985 = vmatmul.msk.bf16.gmra.mxu3 %vm314_vm0, %v1760_v3  ;;  %v1504_v31 = vpop.f32.mrf.mxu2  ;;  %v1137_v7 = vpop.f32.mrf.mxu1  ;;  %v689_v2 = vpack.c.bf16 %v3511_v1, %v3484_v21  ;;  %v302_v3 = vld [vmem:[%s3085_s5 + $0x1a0] sm:$0xff] }
 0x144   : > { %v1634_v32 = vadd.f32 %v1504_v31, %v1136_v61  ;;  %v1138_v4 = vadd.f32 %v1137_v7, %v866_v22  ;;  %2437 = vperm.xlu1 %3017, %v2163_v42   ;;  %367 = vst.msk [vmem:[#allocation2 + $0x1a0] sm:$0xff] %vm314_vm0, %v302_v3  ;;  %v591_v31 = vpack.c.bf16 %v3499_v8, %v3472_v12  ;;  %v2158_v8 = vld [vmem:[%s3095_s9 + $0x178] sm:$0xff] }
 0x145   : > { %v2710_v15 = vadd.f32 %v2709_v58, %v2647_v13  ;;  %2397 = vperm.xlu2 %3018, %v2155_v62   ;;  %v3561_v13 = vld [vmem:[#allocation2 + $0x170] sm:$0xff] }
 0x146   : > { %v1937_v19 = vpop.f32.mrf.mxu3  ;;  %2462 = vperm.xlu0 %3016, %v2168_v55   ;;  %v2303_v55 = vpop.permute.xlu1 %2302 }
 0x147   : > { %v2067_v35 = vadd.f32 %v1937_v19, %v1634_v32  ;;  %v2166_v32 = vld [vmem:[%s3095_s9 + $0x1b8] sm:$0xff] }
 0x148   : > { %v3571_v19 = vld [vmem:[#allocation2 + $0x17c] sm:$0xff] }
 0x149   : > { %v2515_v26 = vmul.f32 %v2278_v20, %v2067_v35  ;;  %v869_v27 = vpop.f32.mrf.mxu0  ;;  %v3573_v20 = vld [vmem:[#allocation2 + $0x184] sm:$0xff] }
 0x14a   : > { %v1762_v44 = vpack.c.bf16 %v3573_v20, %v3571_v19 }
 0x14b   : > { %v2578_v63 = vadd.f32 %v2577_v51, %v2515_v26  ;;  %v2648_v38 = vmul.f32 %v2515_v26, %v2067_v35  ;;  %v1506_v45 = vpop.f32.mrf.mxu2  ;;  %v1140_v23 = vpop.f32.mrf.mxu1  ;;  %v3559_v51 = vld [vmem:[#allocation2 + $0x168] sm:$0xff] }
 0x14c   : > { %v1635_v56 = vadd.f32 %v1506_v45, %v1138_v4  ;;  %v1141_v29 = vadd.f32 %v1140_v23, %v869_v27  ;;  %2878 = vmatmul.msk.bf16.gmra.mxu0 %vm314_vm0, %v688_v25  ;;  %v1329_v16 = vpack.c.bf16 %v3561_v13, %v3559_v51  ;;  %2452 = vperm.xlu1 %3017, %v2166_v32   ;;  %v2169_v23 = vld [vmem:[%s3095_s9 + $0x1d0] sm:$0xff] }
 0x14d   : > { %v2711_v37 = vadd.f32 %v2710_v15, %v2648_v38  ;;  %2412 = vperm.xlu2 %3018, %v2158_v8   ;;  %v691_v8 = vpack.c.bf16 %v3571_v19, %v3543_v40 }
 0x14e   : > { %v1939_v41 = vpop.f32.mrf.mxu3  ;;  %2914 = vmatmul.msk.bf16.gmra.mxu1 %vm314_vm0, %v590_v36  ;;  %2477 = vperm.xlu0 %3016, %v2171_v17   ;;  %v3616_v17 = vld [vmem:[#allocation2 + $0x188] sm:$0xff] }
 0x14f   : > { %v2068_v46 = vadd.f32 %v1939_v41, %v1635_v56 }
 0x150   : > { %2950 = vmatmul.msk.bf16.gmra.mxu2 %vm314_vm0, %v1328_v6  ;;  %v2161_v6 = vld [vmem:[%s3095_s9 + $0x190] sm:$0xff] }
 0x151   : > { %v2516_v48 = vmul.f32 %v2283_v0, %v2068_v46  ;;  %v871_v49 = vpop.f32.mrf.mxu0  ;;  %v2174_v0 = vld [vmem:[%s3095_s9 + $0x1f8] sm:$0xff] }
 0x153   : > { %v2579_v50 = vadd.f32 %v2578_v63, %v2516_v48  ;;  %v2649_v52 = vmul.f32 %v2516_v48, %v2068_v46  ;;  %2986 = vmatmul.msk.bf16.gmra.mxu3 %vm314_vm0, %v1761_v59  ;;  %v1509_v53 = vpop.f32.mrf.mxu2  ;;  %v1142_v5 = vpop.f32.mrf.mxu1  ;;  %v690_v46 = vpack.c.bf16 %v3541_v30, %v3513_v18  ;;  %v304_v59 = vld [vmem:[%s3085_s5 + $0x1b0] sm:$0xff] }
 0x154   : > { %v1636_v57 = vadd.f32 %v1509_v53, %v1141_v29  ;;  %v1143_v60 = vadd.f32 %v1142_v5, %v871_v49  ;;  %2467 = vperm.xlu1 %3017, %v2169_v23   ;;  %369 = vst.msk [vmem:[#allocation2 + $0x1b0] sm:$0xff] %vm314_vm0, %v304_v59  ;;  %v592_v53 = vpack.c.bf16 %v3529_v28, %v3501_v43  ;;  %v2164_v28 = vld [vmem:[%s3095_s9 + $0x1a8] sm:$0xff] }
 0x155   : > { %v2712_v61 = vadd.f32 %v2711_v37, %v2649_v52  ;;  %2427 = vperm.xlu2 %3018, %v2161_v6   ;;  %v3591_v52 = vld [vmem:[#allocation2 + $0x180] sm:$0xff]  ;;  %v2170_v6 = vld [vmem:[%s3095_s9 + $0x1d8] sm:$0xff] }
 0x156   : > { %v1942_v58 = vpop.f32.mrf.mxu3  ;;  %2492 = vperm.xlu0 %3016, %v2174_v0  }
 0x157   : > { %v2069_v54 = vadd.f32 %v1942_v58, %v1636_v57  ;;  %v2172_v57 = vld [vmem:[%s3095_s9 + $0x1e8] sm:$0xff] }
 0x158   : > { %v3601_v58 = vld [vmem:[#allocation2 + $0x18c] sm:$0xff] }
 0x159   : > { %v2517_v10 = vmul.f32 %v2288_v34, %v2069_v54  ;;  %v874_v22 = vpop.f32.mrf.mxu0  ;;  %v3603_v34 = vld [vmem:[#allocation2 + $0x194] sm:$0xff] }
 0x15a   : > { %v1763_v3 = vpack.c.bf16 %v3603_v34, %v3601_v58 }
 0x15b   : > { %v2580_v7 = vadd.f32 %v2579_v50, %v2517_v10  ;;  %v2650_v14 = vmul.f32 %v2517_v10, %v2069_v54  ;;  %v1511_v21 = vpop.f32.mrf.mxu2  ;;  %v1145_v1 = vpop.f32.mrf.mxu1  ;;  %v3589_v50 = vld [vmem:[#allocation2 + $0x178] sm:$0xff] }
 0x15c   : > { %v1637_v4 = vadd.f32 %v1511_v21, %v1143_v60  ;;  %v1146_v15 = vadd.f32 %v1145_v1, %v874_v22  ;;  %2879 = vmatmul.msk.bf16.gmra.mxu0 %vm314_vm0, %v689_v2  ;;  %v1330_v62 = vpack.c.bf16 %v3591_v52, %v3589_v50  ;;  %2482 = vperm.xlu1 %3017, %v2172_v57  }
 0x15d   : > { %v2713_v12 = vadd.f32 %v2712_v61, %v2650_v14  ;;  %2442 = vperm.xlu2 %3018, %v2164_v28  }
 0x15e   : > { %v1944_v35 = vpop.f32.mrf.mxu3  ;;  %2915 = vmatmul.msk.bf16.gmra.mxu1 %vm314_vm0, %v591_v31 }
 0x15f   : > { %v2070_v25 = vadd.f32 %v1944_v35, %v1637_v4  ;;  %v2167_v4 = vld [vmem:[%s3095_s9 + $0x1c0] sm:$0xff] }
 0x160   : > { %2951 = vmatmul.msk.bf16.gmra.mxu2 %vm314_vm0, %v1329_v16  ;;  %v2308_v16 = vpop.permute.xlu2 %2307  ;;  %v306_v35 = vld [vmem:[%s3085_s5 + $0x1c0] sm:$0xff] }
 0x161   : > { %v2518_v26 = vmul.f32 %v2293_v24, %v2070_v25  ;;  %v876_v27 = vpop.f32.mrf.mxu0  ;;  %v307_v24 = vld [vmem:[%s3085_s5 + $0x1c8] sm:$0xff]  ;;  %371 = vst.msk [vmem:[#allocation2 + $0x1c0] sm:$0xff] %vm314_vm0, %v306_v35 }
 0x162   : > { %372 = vst.msk [vmem:[#allocation2 + $0x1c8] sm:$0xff] %vm314_vm0, %v307_v24 }
 0x163   : > { %v2581_v36 = vadd.f32 %v2580_v7, %v2518_v26  ;;  %v2651_v63 = vmul.f32 %v2518_v26, %v2070_v25  ;;  %2987 = vmatmul.msk.bf16.gmra.mxu3 %vm314_vm0, %v1762_v44  ;;  %v1514_v38 = vpop.f32.mrf.mxu2  ;;  %v1147_v45 = vpop.f32.mrf.mxu1  ;;  %v3618_v26 = vld [vmem:[#allocation2 + $0x190] sm:$0xff] }
 0x164   : > { %v1638_v39 = vadd.f32 %v1514_v38, %v1146_v15  ;;  %v1148_v56 = vadd.f32 %v1147_v45, %v876_v27  ;;  %v593_v27 = vpack.c.bf16 %v3559_v51, %v3531_v33  ;;  %v1331_v23 = vpack.c.bf16 %v3618_v26, %v3616_v17  ;;  %v2313_v51 = vpop.permute.xlu0 %2312 }
 0x165   : > { %v2714_v29 = vadd.f32 %v2713_v12, %v2651_v63  ;;  %2457 = vperm.xlu2 %3018, %v2167_v4  }
 0x166   : > { %v1947_v37 = vpop.f32.mrf.mxu3 }
 0x167   : > { %v2071_v41 = vadd.f32 %v1947_v37, %v1638_v39  ;;  %v3627_v39 = vld [vmem:[#allocation2 + $0x19c] sm:$0xff] }
 0x169   : > { %v2519_v48 = vmul.f32 %v2298_v11, %v2071_v41  ;;  %v879_v49 = vpop.f32.mrf.mxu0 }
 0x16b   : > { %v2582_v5 = vadd.f32 %v2581_v36, %v2519_v48  ;;  %v2652_v42 = vmul.f32 %v2519_v48, %v2071_v41  ;;  %v1516_v18 = vpop.f32.mrf.mxu2  ;;  %v1150_v30 = vpop.f32.mrf.mxu1 }
 0x16c   : > { %v1639_v60 = vadd.f32 %v1516_v18, %v1148_v56  ;;  %v1151_v61 = vadd.f32 %v1150_v30, %v879_v49  ;;  %2880 = vmatmul.msk.bf16.gmra.mxu0 %vm314_vm0, %v690_v46  ;;  %v3629_v56 = vld [vmem:[#allocation2 + $0x1a4] sm:$0xff]  ;;  %v2318_v30 = vpop.permute.xlu1 %2317 }
 0x16d   : > { %v2715_v43 = vadd.f32 %v2714_v29, %v2652_v42  ;;  %2472 = vperm.xlu2 %3018, %v2170_v6   ;;  %v1764_v11 = vpack.c.bf16 %v3629_v56, %v3627_v39  ;;  %v2173_v42 = vld [vmem:[%s3095_s9 + $0x1f0] sm:$0xff] }
 0x16e   : > { %v1949_v54 = vpop.f32.mrf.mxu3  ;;  %2916 = vmatmul.msk.bf16.gmra.mxu1 %vm314_vm0, %v592_v53  ;;  %v3668_v6 = vld [vmem:[#allocation2 + $0x1b0] sm:$0xff] }
 0x16f   : > { %v2072_v2 = vadd.f32 %v1949_v54, %v1639_v60  ;;  %v692_v60 = vpack.c.bf16 %v3601_v58, %v3573_v20  ;;  %v3642_v54 = vld [vmem:[#allocation2 + $0x198] sm:$0xff] }
 0x170   : > { %2952 = vmatmul.msk.bf16.gmra.mxu2 %vm314_vm0, %v1330_v62  ;;  %v309_v62 = vld [vmem:[%s3085_s5 + $0x1d8] sm:$0xff] }
 0x171   : > { %v2520_v9 = vmul.f32 %v2303_v55, %v2072_v2  ;;  %v881_v10 = vpop.f32.mrf.mxu0  ;;  %v3644_v55 = vld [vmem:[#allocation2 + $0x1a0] sm:$0xff]  ;;  %374 = vst.msk [vmem:[#allocation2 + $0x1d8] sm:$0xff] %vm314_vm0, %v309_v62 }
 0x173   : > { %v2583_v22 = vadd.f32 %v2582_v5, %v2520_v9  ;;  %v2653_v31 = vmul.f32 %v2520_v9, %v2072_v2  ;;  %2988 = vmatmul.msk.bf16.gmra.mxu3 %vm314_vm0, %v1763_v3  ;;  %v1519_v7 = vpop.f32.mrf.mxu2  ;;  %v1152_v14 = vpop.f32.mrf.mxu1  ;;  %v594_v2 = vpack.c.bf16 %v3589_v50, %v3561_v13 }
 0x174   : > { %v1640_v21 = vadd.f32 %v1519_v7, %v1151_v61  ;;  %v1153_v1 = vadd.f32 %v1152_v14, %v881_v10  ;;  %v308_v61 = vld [vmem:[%s3085_s5 + $0x1d0] sm:$0xff]  ;;  %v2323_v13 = vpop.permute.xlu2 %2322 }
 0x175   : > { %v2716_v32 = vadd.f32 %v2715_v43, %v2653_v31  ;;  %2487 = vperm.xlu2 %3018, %v2173_v42   ;;  %373 = vst.msk [vmem:[#allocation2 + $0x1d0] sm:$0xff] %vm314_vm0, %v308_v61  ;;  %v1332_v31 = vpack.c.bf16 %v3644_v55, %v3642_v54  ;;  %v3653_v7 = vld [vmem:[#allocation2 + $0x1ac] sm:$0xff]  ;;  %v3655_v14 = vld [vmem:[#allocation2 + $0x1b4] sm:$0xff] }
 0x176   : > { %v1952_v15 = vpop.f32.mrf.mxu3 }
 0x177   : > { %v2073_v12 = vadd.f32 %v1952_v15, %v1640_v21 }
 0x179   : > { %v2521_v25 = vmul.f32 %v2308_v16, %v2073_v12  ;;  %v884_v44 = vpop.f32.mrf.mxu0 }
 0x17b   : > { %v2584_v36 = vadd.f32 %v2583_v22, %v2521_v25  ;;  %v2654_v63 = vmul.f32 %v2521_v25, %v2073_v12  ;;  %v1521_v38 = vpop.f32.mrf.mxu2  ;;  %v1155_v40 = vpop.f32.mrf.mxu1 }
 0x17c   : > { %v1641_v19 = vadd.f32 %v1521_v38, %v1153_v1  ;;  %v1156_v45 = vadd.f32 %v1155_v40, %v884_v44  ;;  %2881 = vmatmul.msk.bf16.gmra.mxu0 %vm314_vm0, %v691_v8  ;;  %v693_v38 = vpack.c.bf16 %v3627_v39, %v3603_v34  ;;  %v310_v40 = vld [vmem:[%s3085_s5 + $0x1e0] sm:$0xff] }
 0x17d   : > { %v2717_v29 = vadd.f32 %v2716_v32, %v2654_v63  ;;  %v1765_v32 = vpack.c.bf16 %v3655_v14, %v3653_v7  ;;  %375 = vst.msk [vmem:[#allocation2 + $0x1e0] sm:$0xff] %vm314_vm0, %v310_v40 }
 0x17e   : > { %v1954_v33 = vpop.f32.mrf.mxu3  ;;  %2917 = vmatmul.msk.bf16.gmra.mxu1 %vm314_vm0, %v593_v27 }
 0x17f   : > { %v2074_v37 = vadd.f32 %v1954_v33, %v1641_v19  ;;  %v311_v19 = vld [vmem:[%s3085_s5 + $0x1e8] sm:$0xff]  ;;  %v595_v33 = vpack.c.bf16 %v3616_v17, %v3591_v52  ;;  %v2333_v52 = vpop.permute.xlu1 %2332 }
 0x180   : > { %2953 = vmatmul.msk.bf16.gmra.mxu2 %vm314_vm0, %v1331_v23  ;;  %376 = vst.msk [vmem:[#allocation2 + $0x1e8] sm:$0xff] %vm314_vm0, %v311_v19 }
 0x181   : > { %v2522_v41 = vmul.f32 %v2313_v51, %v2074_v37  ;;  %v886_v0 = vpop.f32.mrf.mxu0 }
 0x183   : > { %v2585_v46 = vadd.f32 %v2584_v36, %v2522_v41  ;;  %v2655_v59 = vmul.f32 %v2522_v41, %v2074_v37  ;;  %2989 = vmatmul.msk.bf16.gmra.mxu3 %vm314_vm0, %v1764_v11  ;;  %v1524_v47 = vpop.f32.mrf.mxu2  ;;  %v1157_v48 = vpop.f32.mrf.mxu1 }
 0x184   : > { %v1642_v49 = vadd.f32 %v1524_v47, %v1156_v45  ;;  %v1158_v53 = vadd.f32 %v1157_v48, %v886_v0  ;;  %v2328_v36 = vpop.permute.xlu0 %2327 }
 0x185   : > { %v2718_v5 = vadd.f32 %v2717_v29, %v2655_v59  ;;  %v3666_v29 = vld [vmem:[#allocation2 + $0x1a8] sm:$0xff] }
 0x186   : > { %v1957_v18 = vpop.f32.mrf.mxu3  ;;  %v1333_v0 = vpack.c.bf16 %v3668_v6, %v3666_v29  ;;  %v3679_v59 = vld [vmem:[#allocation2 + $0x1c4] sm:$0xff] }
 0x187   : > { %v2075_v57 = vadd.f32 %v1957_v18, %v1642_v49 }
 0x189   : > { %v2523_v43 = vmul.f32 %v2318_v30, %v2075_v57  ;;  %v889_v28 = vpop.f32.mrf.mxu0 }
 0x18b   : > { %v2586_v3 = vadd.f32 %v2585_v46, %v2523_v43  ;;  %v2656_v9 = vmul.f32 %v2523_v43, %v2075_v57  ;;  %v1526_v10 = vpop.f32.mrf.mxu2  ;;  %v1160_v22 = vpop.f32.mrf.mxu1  ;;  %v3677_v46 = vld [vmem:[#allocation2 + $0x1bc] sm:$0xff] }
 0x18c   : > { %v1643_v20 = vadd.f32 %v1526_v10, %v1158_v53  ;;  %v1161_v58 = vadd.f32 %v1160_v22, %v889_v28  ;;  %2882 = vmatmul.msk.bf16.gmra.mxu0 %vm314_vm0, %v692_v60  ;;  %v1766_v49 = vpack.c.bf16 %v3679_v59, %v3677_v46  ;;  %v2338_v28 = vpop.permute.xlu2 %2337  ;;  %v313_v10 = vld [vmem:[%s3085_s5 + $0x1f8] sm:$0xff] }
 0x18d   : > { %v2719_v21 = vadd.f32 %v2718_v5, %v2656_v9  ;;  %v312_v9 = vld [vmem:[%s3085_s5 + $0x1f0] sm:$0xff]  ;;  %378 = vst.msk [vmem:[#allocation2 + $0x1f8] sm:$0xff] %vm314_vm0, %v313_v10 }
 0x18e   : > { %v1959_v1 = vpop.f32.mrf.mxu3  ;;  %2918 = vmatmul.msk.bf16.gmra.mxu1 %vm314_vm0, %v594_v2  ;;  %377 = vst.msk [vmem:[#allocation2 + $0x1f0] sm:$0xff] %vm314_vm0, %v312_v9 }
 0x18f   : > { %v2076_v50 = vadd.f32 %v1959_v1, %v1643_v20 }
 0x190   : > { %2954 = vmatmul.msk.bf16.gmra.mxu2 %vm314_vm0, %v1332_v31  ;;  %v3693_v31 = vld [vmem:[#allocation2 + $0x1c0] sm:$0xff] }
 0x191   : > { %v2524_v4 = vmul.f32 %v2323_v13, %v2076_v50  ;;  %v891_v15 = vpop.f32.mrf.mxu0 }
 0x193   : > { %v2587_v16 = vadd.f32 %v2586_v3, %v2524_v4  ;;  %v2657_v12 = vmul.f32 %v2524_v4, %v2076_v50  ;;  %2990 = vmatmul.msk.bf16.gmra.mxu3 %vm314_vm0, %v1765_v32  ;;  %v1529_v8 = vpop.f32.mrf.mxu2  ;;  %v1162_v35 = vpop.f32.mrf.mxu1  ;;  %v694_v3 = vpack.c.bf16 %v3653_v7, %v3629_v56 }
 0x194   : > { %v1644_v24 = vadd.f32 %v1529_v8, %v1161_v58  ;;  %v1163_v25 = vadd.f32 %v1162_v35, %v891_v15  ;;  %v3691_v58 = vld [vmem:[#allocation2 + $0x1b8] sm:$0xff]  ;;  %v3706_v15 = vld [vmem:[#allocation2 + $0x1cc] sm:$0xff]  ;;  %v2343_v35 = vpop.permute.xlu0 %2342 }
 0x195   : > { %v2720_v44 = vadd.f32 %v2719_v21, %v2657_v12  ;;  %v596_v21 = vpack.c.bf16 %v3642_v54, %v3618_v26  ;;  %v1334_v4 = vpack.c.bf16 %v3693_v31, %v3691_v58  ;;  %v3708_v26 = vld [vmem:[#allocation2 + $0x1d4] sm:$0xff] }
 0x196   : > { %v1962_v27 = vpop.f32.mrf.mxu3  ;;  %v1767_v8 = vpack.c.bf16 %v3708_v26, %v3706_v15 }
 0x197   : > { %v2077_v63 = vadd.f32 %v1962_v27, %v1644_v24 }
 0x199   : > { %v2525_v45 = vmul.f32 %v2328_v36, %v2077_v63  ;;  %v894_v23 = vpop.f32.mrf.mxu0 }
 0x19b   : > { %v2588_v51 = vadd.f32 %v2587_v16, %v2525_v45  ;;  %v2658_v37 = vmul.f32 %v2525_v45, %v2077_v63  ;;  %v1531_v11 = vpop.f32.mrf.mxu2  ;;  %v1165_v41 = vpop.f32.mrf.mxu1 }
 0x19c   : > { %v1645_v34 = vadd.f32 %v1531_v11, %v1163_v25  ;;  %v1166_v39 = vadd.f32 %v1165_v41, %v894_v23  ;;  %2883 = vmatmul.msk.bf16.gmra.mxu0 %vm314_vm0, %v693_v38  ;;  %v380_v11 = vld [vmem:[%s3720_s17 + $0x8] sm:$0xff] }
 0x19d   : > { %v2721_v47 = vadd.f32 %v2720_v44, %v2658_v37  ;;  %v379_v37 = vld [vmem:[%s3720_s17] sm:$0xff]  ;;  %444 = vst.msk [vmem:[#allocation2 + $0x208] sm:$0xff] %vm314_vm0, %v380_v11 }
 0x19e   : > { %v1964_v48 = vpop.f32.mrf.mxu3  ;;  %2919 = vmatmul.msk.bf16.gmra.mxu1 %vm314_vm0, %v595_v33  ;;  %v2348_v33 = vpop.permute.xlu1 %2347  ;;  %443 = vst.msk [vmem:[#allocation2 + $0x200] sm:$0xff] %vm314_vm0, %v379_v37 }
 0x19f   : > { %v2078_v17 = vadd.f32 %v1964_v48, %v1645_v34 }
 0x1a0   : > { %2955 = vmatmul.msk.bf16.gmra.mxu2 %vm314_vm0, %v1333_v0  ;;  %v3728_v0 = vld [vmem:[#allocation2 + $0x1d0] sm:$0xff] }
 0x1a1   : > { %v2526_v53 = vmul.f32 %v2333_v52, %v2078_v17  ;;  %v896_v5 = vpop.f32.mrf.mxu0 }
 0x1a3   : > { %v2589_v42 = vadd.f32 %v2588_v51, %v2526_v53  ;;  %v2659_v18 = vmul.f32 %v2526_v53, %v2078_v17  ;;  %2991 = vmatmul.msk.bf16.gmra.mxu3 %vm314_vm0, %v1766_v49  ;;  %v1534_v30 = vpop.f32.mrf.mxu2  ;;  %v1167_v57 = vpop.f32.mrf.mxu1  ;;  %v695_v51 = vpack.c.bf16 %v3677_v46, %v3655_v14 }
 0x1a4   : > { %v1646_v60 = vadd.f32 %v1534_v30, %v1166_v39  ;;  %v1168_v61 = vadd.f32 %v1167_v57, %v896_v5  ;;  %v3726_v39 = vld [vmem:[#allocation2 + $0x1c8] sm:$0xff]  ;;  %v3737_v5 = vld [vmem:[#allocation2 + $0x1dc] sm:$0xff]  ;;  %v2353_v57 = vpop.permute.xlu2 %2352 }
 0x1a5   : > { %v2722_v62 = vadd.f32 %v2721_v47, %v2659_v18  ;;  %v597_v47 = vpack.c.bf16 %v3666_v29, %v3644_v55  ;;  %v1335_v53 = vpack.c.bf16 %v3728_v0, %v3726_v39 }
 0x1a6   : > { %v1967_v43 = vpop.f32.mrf.mxu3 }
 0x1a7   : > { %v2079_v2 = vadd.f32 %v1967_v43, %v1646_v60 }
 0x1a9   : > { %v2527_v22 = vmul.f32 %v2338_v28, %v2079_v2  ;;  %v899_v20 = vpop.f32.mrf.mxu0 }
 0x1ab   : > { %v2590_v56 = vadd.f32 %v2589_v42, %v2527_v22  ;;  %v2660_v7 = vmul.f32 %v2527_v22, %v2079_v2  ;;  %v1536_v1 = vpop.f32.mrf.mxu2  ;;  %v1170_v13 = vpop.f32.mrf.mxu1  ;;  %v3739_v42 = vld [vmem:[#allocation2 + $0x1e4] sm:$0xff] }
 0x1ac   : > { %v1647_v50 = vadd.f32 %v1536_v1, %v1168_v61  ;;  %v1171_v32 = vadd.f32 %v1170_v13, %v899_v20  ;;  %2884 = vmatmul.msk.bf16.gmra.mxu0 %vm314_vm0, %v694_v3  ;;  %v1768_v29 = vpack.c.bf16 %v3739_v42, %v3737_v5  ;;  %v3748_v13 = vld [vmem:[#allocation2 + $0x1d8] sm:$0xff] }
 0x1ad   : > { %v2723_v54 = vadd.f32 %v2722_v62, %v2660_v7 }
 0x1ae   : > { %v1969_v16 = vpop.f32.mrf.mxu3  ;;  %2920 = vmatmul.msk.bf16.gmra.mxu1 %vm314_vm0, %v596_v21  ;;  %v2358_v21 = vpop.permute.xlu0 %2357 }
 0x1af   : > { %v2080_v12 = vadd.f32 %v1969_v16, %v1647_v50  ;;  %v3750_v50 = vld [vmem:[#allocation2 + $0x1e0] sm:$0xff] }
 0x1b0   : > { %2956 = vmatmul.msk.bf16.gmra.mxu2 %vm314_vm0, %v1334_v4 }
 0x1b1   : > { %v2528_v24 = vmul.f32 %v2343_v35, %v2080_v12  ;;  %v901_v25 = vpop.f32.mrf.mxu0 }
 0x1b3   : > { %v2591_v44 = vadd.f32 %v2590_v56, %v2528_v24  ;;  %v2661_v27 = vmul.f32 %v2528_v24, %v2080_v12  ;;  %2992 = vmatmul.msk.bf16.gmra.mxu3 %vm314_vm0, %v1767_v8  ;;  %v1539_v36 = vpop.f32.mrf.mxu2  ;;  %v1172_v63 = vpop.f32.mrf.mxu1  ;;  %v696_v56 = vpack.c.bf16 %v3706_v15, %v3679_v59  ;;  %v1336_v59 = vpack.c.bf16 %v3750_v50, %v3748_v13  ;;  %v3757_v15 = vld [vmem:[#allocation2 + $0x1ec] sm:$0xff]  ;;  %v3759_v24 = vld [vmem:[#allocation2 + $0x1f4] sm:$0xff] }
 0x1b4   : > { %v1648_v38 = vadd.f32 %v1539_v36, %v1171_v32  ;;  %v1173_v40 = vadd.f32 %v1172_v63, %v901_v25  ;;  %v598_v32 = vpack.c.bf16 %v3691_v58, %v3668_v6  ;;  %v1769_v58 = vpack.c.bf16 %v3759_v24, %v3757_v15 }
 0x1b5   : > { %v2724_v19 = vadd.f32 %v2723_v54, %v2661_v27  ;;  %v2363_v27 = vpop.permute.xlu1 %2362 }
 0x1b6   : > { %v1972_v45 = vpop.f32.mrf.mxu3 }
 0x1b7   : > { %v2081_v23 = vadd.f32 %v1972_v45, %v1648_v38 }
 0x1b9   : > { %v2529_v41 = vmul.f32 %v2348_v33, %v2081_v23  ;;  %v904_v34 = vpop.f32.mrf.mxu0 }
 0x1bb   : > { %v2592_v48 = vadd.f32 %v2591_v44, %v2529_v41  ;;  %v2662_v52 = vmul.f32 %v2529_v41, %v2081_v23  ;;  %v1541_v17 = vpop.f32.mrf.mxu2  ;;  %v1175_v49 = vpop.f32.mrf.mxu1 }
 0x1bc   : > { %v1649_v14 = vadd.f32 %v1541_v17, %v1173_v40  ;;  %v1176_v46 = vadd.f32 %v1175_v49, %v904_v34  ;;  %2885 = vmatmul.msk.bf16.gmra.mxu0 %vm314_vm0, %v695_v51  ;;  %v2368_v41 = vpop.permute.xlu2 %2367  ;;  %v697_v34 = vpack.c.bf16 %v3737_v5, %v3708_v26  ;;  %v3770_v17 = vld [vmem:[#allocation2 + $0x1f0] sm:$0xff]  ;;  %v599_v49 = vpack.c.bf16 %v3726_v39, %v3693_v31  ;;  %v3777_v5 = vld [vmem:[#allocation2 + $0x1fc] sm:$0xff] }
 0x1bd   : > { %v2725_v18 = vadd.f32 %v2724_v19, %v2662_v52  ;;  %v3768_v52 = vld [vmem:[#allocation2 + $0x1e8] sm:$0xff] }
 0x1be   : > { %v1974_v30 = vpop.f32.mrf.mxu3  ;;  %2921 = vmatmul.msk.bf16.gmra.mxu1 %vm314_vm0, %v597_v47  ;;  %v1337_v26 = vpack.c.bf16 %v3770_v17, %v3768_v52 }
 0x1bf   : > { %v2082_v55 = vadd.f32 %v1974_v30, %v1649_v14 }
 0x1c0   : > { %2957 = vmatmul.msk.bf16.gmra.mxu2 %vm314_vm0, %v1335_v53 }
 0x1c1   : > { %v2530_v60 = vmul.f32 %v2353_v57, %v2082_v55  ;;  %v906_v61 = vpop.f32.mrf.mxu0 }
 0x1c3   : > { %v2593_v62 = vadd.f32 %v2592_v48, %v2530_v60  ;;  %v2663_v43 = vmul.f32 %v2530_v60, %v2082_v55  ;;  %2993 = vmatmul.msk.bf16.gmra.mxu3 %vm314_vm0, %v1768_v29  ;;  %v1544_v28 = vpop.f32.mrf.mxu2  ;;  %v1177_v2 = vpop.f32.mrf.mxu1  ;;  %v3779_v29 = vld [vmem:[#allocation2 + $0x204] sm:$0xff] }
 0x1c4   : > { %v1650_v3 = vadd.f32 %v1544_v28, %v1176_v46  ;;  %v1178_v9 = vadd.f32 %v1177_v2, %v906_v61  ;;  %v1770_v39 = vpack.c.bf16 %v3779_v29, %v3777_v5  ;;  %v2373_v61 = vpop.permute.xlu0 %2372 }
 0x1c5   : > { %v2726_v10 = vadd.f32 %v2725_v18, %v2663_v43 }
 0x1c6   : > { %v1977_v22 = vpop.f32.mrf.mxu3 }
 0x1c7   : > { %v2083_v20 = vadd.f32 %v1977_v22, %v1650_v3 }
 0x1c9   : > { %v2531_v7 = vmul.f32 %v2358_v21, %v2083_v20  ;;  %v909_v1 = vpop.f32.mrf.mxu0 }
 0x1cb   : > { %v2594_v4 = vadd.f32 %v2593_v62, %v2531_v7  ;;  %v2664_v54 = vmul.f32 %v2531_v7, %v2083_v20  ;;  %v1546_v16 = vpop.f32.mrf.mxu2  ;;  %v1180_v12 = vpop.f32.mrf.mxu1 }
 0x1cc   : > { %v1651_v8 = vadd.f32 %v1546_v16, %v1178_v9  ;;  %v1181_v35 = vadd.f32 %v1180_v12, %v909_v1  ;;  %2886 = vmatmul.msk.bf16.gmra.mxu0 %vm314_vm0, %v696_v56  ;;  %v2378_v7 = vpop.permute.xlu1 %2377  ;;  %v698_v1 = vpack.c.bf16 %v3757_v15, %v3739_v42  ;;  %v1304_v16 = vld [vmem:[#allocation2 + $0x200] sm:$0xff]  ;;  %v600_v12 = vpack.c.bf16 %v3748_v13, %v3728_v0 }
 0x1cd   : > { %v2727_v25 = vadd.f32 %v2726_v10, %v2664_v54  ;;  %v3788_v54 = vld [vmem:[#allocation2 + $0x1f8] sm:$0xff] }
 0x1ce   : > { %v1979_v44 = vpop.f32.mrf.mxu3  ;;  %2922 = vmatmul.msk.bf16.gmra.mxu1 %vm314_vm0, %v598_v32 }
 0x1cf   : > { %v2084_v6 = vadd.f32 %v1979_v44, %v1651_v8 }
 0x1d0   : > { %2958 = vmatmul.msk.bf16.gmra.mxu2 %vm314_vm0, %v1336_v59 }
 0x1d1   : > { %v2532_v36 = vmul.f32 %v2363_v27, %v2084_v6  ;;  %v911_v63 = vpop.f32.mrf.mxu0 }
 0x1d3   : > { %v2595_v38 = vadd.f32 %v2594_v4, %v2532_v36  ;;  %v2665_v40 = vmul.f32 %v2532_v36, %v2084_v6  ;;  %2994 = vmatmul.msk.bf16.gmra.mxu3 %vm314_vm0, %v1769_v58  ;;  %v1549_v19 = vpop.f32.mrf.mxu2  ;;  %v1182_v45 = vpop.f32.mrf.mxu1  ;;  %v1338_v58 = vpack.c.bf16 %v1304_v16, %v3788_v54 }
 0x1d4   : > { %v1652_v23 = vadd.f32 %v1549_v19, %v1181_v35  ;;  %v1183_v33 = vadd.f32 %v1182_v45, %v911_v63  ;;  %v2383_v36 = vpop.permute.xlu2 %2382 }
 0x1d5   : > { %v2728_v51 = vadd.f32 %v2727_v25, %v2665_v40 }
 0x1d6   : > { %v1982_v37 = vpop.f32.mrf.mxu3 }
 0x1d7   : > { %v2085_v11 = vadd.f32 %v1982_v37, %v1652_v23 }
 0x1d9   : > { %v2533_v47 = vmul.f32 %v2368_v41, %v2085_v11  ;;  %v914_v48 = vpop.f32.mrf.mxu0  ;;  %v699_v41 = vpack.c.bf16 %v3777_v5, %v3759_v24  ;;  %v383_v24 = vld [vmem:[%s3720_s17 + $0x20] sm:$0xff] }
 0x1da   : > { %447 = vst.msk [vmem:[#allocation2 + $0x220] sm:$0xff] %vm314_vm0, %v383_v24 }
 0x1db   : > { %v2596_v14 = vadd.f32 %v2595_v38, %v2533_v47  ;;  %v2666_v46 = vmul.f32 %v2533_v47, %v2085_v11  ;;  %v1551_v53 = vpop.f32.mrf.mxu2  ;;  %v1185_v18 = vpop.f32.mrf.mxu1 }
 0x1dc   : > { %v1653_v30 = vadd.f32 %v1551_v53, %v1183_v33  ;;  %v1186_v55 = vadd.f32 %v1185_v18, %v914_v48  ;;  %2887 = vmatmul.msk.bf16.gmra.mxu0 %vm314_vm0, %v697_v34  ;;  %v2388_v11 = vpop.permute.xlu0 %2387  ;;  %v601_v48 = vpack.c.bf16 %v3768_v52, %v3750_v50  ;;  %v384_v50 = vld [vmem:[%s3720_s17 + $0x28] sm:$0xff] }
 0x1dd   : > { %v2729_v57 = vadd.f32 %v2728_v51, %v2666_v46  ;;  %448 = vst.msk [vmem:[#allocation2 + $0x228] sm:$0xff] %vm314_vm0, %v384_v50 }
 0x1de   : > { %v1984_v60 = vpop.f32.mrf.mxu3  ;;  %2923 = vmatmul.msk.bf16.gmra.mxu1 %vm314_vm0, %v599_v49  ;;  %v381_v49 = vld [vmem:[%s3720_s17 + $0x10] sm:$0xff] }
 0x1df   : > { %v2086_v31 = vadd.f32 %v1984_v60, %v1653_v30  ;;  %v382_v30 = vld [vmem:[%s3720_s17 + $0x18] sm:$0xff]  ;;  %445 = vst.msk [vmem:[#allocation2 + $0x210] sm:$0xff] %vm314_vm0, %v381_v49  ;;  %v385_v60 = vld [vmem:[%s3720_s17 + $0x30] sm:$0xff] }
 0x1e0   : > { %2959 = vmatmul.msk.bf16.gmra.mxu2 %vm314_vm0, %v1337_v26  ;;  %446 = vst.msk [vmem:[#allocation2 + $0x218] sm:$0xff] %vm314_vm0, %v382_v30 }
 0x1e1   : > { %v2534_v62 = vmul.f32 %v2373_v61, %v2086_v31  ;;  %v916_v43 = vpop.f32.mrf.mxu0  ;;  %449 = vst.msk [vmem:[#allocation2 + $0x230] sm:$0xff] %vm314_vm0, %v385_v60 }
 0x1e3   : > { %v2597_v28 = vadd.f32 %v2596_v14, %v2534_v62  ;;  %v2667_v2 = vmul.f32 %v2534_v62, %v2086_v31  ;;  %2995 = vmatmul.msk.bf16.gmra.mxu3 %vm314_vm0, %v1770_v39  ;;  %v1554_v3 = vpop.f32.mrf.mxu2  ;;  %v1187_v9 = vpop.f32.mrf.mxu1  ;;  %v386_v39 = vld [vmem:[%s3720_s17 + $0x38] sm:$0xff] }
 0x1e4   : > { %v1654_v10 = vadd.f32 %v1554_v3, %v1186_v55  ;;  %v1188_v22 = vadd.f32 %v1187_v9, %v916_v43  ;;  %v2393_v31 = vpop.permute.xlu1 %2392  ;;  %450 = vst.msk [vmem:[#allocation2 + $0x238] sm:$0xff] %vm314_vm0, %v386_v39 }
 0x1e5   : > { %v2730_v20 = vadd.f32 %v2729_v57, %v2667_v2  ;;  %v1305_v2 = vld [vmem:[#allocation2 + $0x208] sm:$0xff] }
 0x1e6   : > { %v1987_v21 = vpop.f32.mrf.mxu3 }
 0x1e7   : > { %v2087_v56 = vadd.f32 %v1987_v21, %v1654_v10 }
 0x1e9   : > { %v2535_v32 = vmul.f32 %v2378_v7, %v2087_v56  ;;  %v919_v4 = vpop.f32.mrf.mxu0  ;;  %v1737_v7 = vld [vmem:[#allocation2 + $0x214] sm:$0xff] }
 0x1eb   : > { %v2598_v8 = vadd.f32 %v2597_v28, %v2535_v32  ;;  %v2668_v35 = vmul.f32 %v2535_v32, %v2087_v56  ;;  %v1556_v59 = vpop.f32.mrf.mxu2  ;;  %v1190_v25 = vpop.f32.mrf.mxu1  ;;  %v1306_v56 = vld [vmem:[#allocation2 + $0x210] sm:$0xff] }
 0x1ec   : > { %v1655_v44 = vadd.f32 %v1556_v59, %v1188_v22  ;;  %v1191_v6 = vadd.f32 %v1190_v25, %v919_v4  ;;  %2888 = vmatmul.msk.bf16.gmra.mxu0 %vm314_vm0, %v698_v1  ;;  %v1339_v1 = vpack.c.bf16 %v1306_v56, %v1305_v2  ;;  %v602_v25 = vpack.c.bf16 %v3788_v54, %v3770_v17  ;;  %v1739_v17 = vld [vmem:[#allocation2 + $0x224] sm:$0xff] }
 0x1ed   : > { %v2731_v27 = vadd.f32 %v2730_v20, %v2668_v35  ;;  %v1736_v20 = vld [vmem:[#allocation2 + $0x20c] sm:$0xff] }
 0x1ee   : > { %v1989_v42 = vpop.f32.mrf.mxu3  ;;  %2924 = vmatmul.msk.bf16.gmra.mxu1 %vm314_vm0, %v600_v12  ;;  %v1771_v4 = vpack.c.bf16 %v1737_v7, %v1736_v20  ;;  %v2398_v12 = vpop.permute.xlu2 %2397 }
 0x1ef   : > { %v2088_v15 = vadd.f32 %v1989_v42, %v1655_v44 }
 0x1f0   : > { %2960 = vmatmul.msk.bf16.gmra.mxu2 %vm314_vm0, %v1338_v58 }
 0x1f1   : > { %v2536_v63 = vmul.f32 %v2383_v36, %v2088_v15  ;;  %v921_v0 = vpop.f32.mrf.mxu0 }
 0x1f3   : > { %v2599_v13 = vadd.f32 %v2598_v8, %v2536_v63  ;;  %v2669_v38 = vmul.f32 %v2536_v63, %v2088_v15  ;;  %v1559_v40 = vpop.f32.mrf.mxu2  ;;  %v1192_v19 = vpop.f32.mrf.mxu1  ;;  %v700_v8 = vpack.c.bf16 %v1736_v20, %v3779_v29  ;;  %2996 = vmatmul.msk.bf16.gmra.mxu3 %vm314_vm0, %v1771_v4 }
 0x1f4   : > { %v1656_v45 = vadd.f32 %v1559_v40, %v1191_v6  ;;  %v1193_v23 = vadd.f32 %v1192_v19, %v921_v0  ;;  %v2403_v0 = vpop.permute.xlu0 %2402  ;;  %v1308_v40 = vld [vmem:[#allocation2 + $0x220] sm:$0xff] }
 0x1f5   : > { %v2732_v33 = vadd.f32 %v2731_v27, %v2669_v38  ;;  %v1307_v38 = vld [vmem:[#allocation2 + $0x218] sm:$0xff] }
 0x1f6   : > { %v1992_v51 = vpop.f32.mrf.mxu3  ;;  %v2413_v60 = vpop.permute.xlu2 %2412 }
 0x1f7   : > { %v2089_v37 = vadd.f32 %v1992_v51, %v1656_v45  ;;  %v1738_v45 = vld [vmem:[#allocation2 + $0x21c] sm:$0xff] }
 0x1f9   : > { %v2537_v34 = vmul.f32 %v2388_v11, %v2089_v37  ;;  %v924_v47 = vpop.f32.mrf.mxu0 }
 0x1fb   : > { %v2600_v14 = vadd.f32 %v2599_v13, %v2537_v34  ;;  %v2670_v46 = vmul.f32 %v2537_v34, %v2089_v37  ;;  %v1561_v53 = vpop.f32.mrf.mxu2  ;;  %v1195_v18 = vpop.f32.mrf.mxu1  ;;  %v1340_v37 = vpack.c.bf16 %v1308_v40, %v1307_v38  ;;  %v1772_v34 = vpack.c.bf16 %v1739_v17, %v1738_v45 }
 0x1fc   : > { %v1657_v55 = vadd.f32 %v1561_v53, %v1193_v23  ;;  %v1196_v26 = vadd.f32 %v1195_v18, %v924_v47  ;;  %2889 = vmatmul.msk.bf16.gmra.mxu0 %vm314_vm0, %v699_v41  ;;  %v2418_v7 = vpop.permute.xlu0 %2417 }
 0x1fd   : > { %v2733_v57 = vadd.f32 %v2732_v33, %v2670_v46 }
 0x1fe   : > { %v1994_v5 = vpop.f32.mrf.mxu3  ;;  %2925 = vmatmul.msk.bf16.gmra.mxu1 %vm314_vm0, %v601_v48  ;;  %v2428_v45 = vpop.permute.xlu2 %2427 }
 0x1ff   : > { %v2090_v52 = vadd.f32 %v1994_v5, %v1657_v55 }
 0x200   : > { %2961 = vmatmul.msk.bf16.gmra.mxu2 %vm314_vm0, %v1339_v1 }
 0x201   : > { %v2538_v61 = vmul.f32 %v2393_v31, %v2090_v52  ;;  %v926_v62 = vpop.f32.mrf.mxu0 }
 0x203   : > { %v2601_v43 = vadd.f32 %v2600_v14, %v2538_v61  ;;  %v2671_v28 = vmul.f32 %v2538_v61, %v2090_v52  ;;  %v1564_v3 = vpop.f32.mrf.mxu2  ;;  %v1197_v9 = vpop.f32.mrf.mxu1  ;;  %2997 = vmatmul.msk.bf16.gmra.mxu3 %vm314_vm0, %v1772_v34  ;;  %v1740_v61 = vld [vmem:[#allocation2 + $0x22c] sm:$0xff] }
 0x204   : > { %v1658_v10 = vadd.f32 %v1564_v3, %v1196_v26  ;;  %v1198_v22 = vadd.f32 %v1197_v9, %v926_v62  ;;  %v2408_v14 = vpop.permute.xlu1 %2407  ;;  %v1741_v62 = vld [vmem:[#allocation2 + $0x234] sm:$0xff] }
 0x205   : > { %v2734_v21 = vadd.f32 %v2733_v57, %v2671_v28 }
 0x206   : > { %v1997_v32 = vpop.f32.mrf.mxu3 }
 0x207   : > { %v2091_v16 = vadd.f32 %v1997_v32, %v1658_v10 }
 0x209   : > { %v2539_v35 = vmul.f32 %v2398_v12, %v2091_v16  ;;  %v929_v59 = vpop.f32.mrf.mxu0 }
 0x20b   : > { %v2602_v44 = vadd.f32 %v2601_v43, %v2539_v35  ;;  %v2672_v6 = vmul.f32 %v2539_v35, %v2091_v16  ;;  %v1566_v58 = vpop.f32.mrf.mxu2  ;;  %v1200_v27 = vpop.f32.mrf.mxu1 }
 0x20c   : > { %v1659_v42 = vadd.f32 %v1566_v58, %v1198_v22  ;;  %v1201_v15 = vadd.f32 %v1200_v27, %v929_v59  ;;  %2890 = vmatmul.msk.bf16.gmra.mxu0 %vm314_vm0, %v700_v8  ;;  %v1773_v22 = vpack.c.bf16 %v1741_v62, %v1740_v61  ;;  %v2423_v58 = vpop.permute.xlu1 %2422 }
 0x20d   : > { %v2735_v36 = vadd.f32 %v2734_v21, %v2672_v6 }
 0x20e   : > { %v1999_v63 = vpop.f32.mrf.mxu3  ;;  %2926 = vmatmul.msk.bf16.gmra.mxu1 %vm314_vm0, %v602_v25 }
 0x20f   : > { %v2092_v29 = vadd.f32 %v1999_v63, %v1659_v42 }
 0x210   : > { %2962 = vmatmul.msk.bf16.gmra.mxu2 %vm314_vm0, %v1340_v37 }
 0x211   : > { %v2540_v13 = vmul.f32 %v2403_v0, %v2092_v29  ;;  %v931_v19 = vpop.f32.mrf.mxu0 }
 0x213   : > { %v2603_v54 = vadd.f32 %v2602_v44, %v2540_v13  ;;  %v2673_v23 = vmul.f32 %v2540_v13, %v2092_v29  ;;  %v1569_v33 = vpop.f32.mrf.mxu2  ;;  %v1202_v51 = vpop.f32.mrf.mxu1  ;;  %2998 = vmatmul.msk.bf16.gmra.mxu3 %vm314_vm0, %v1773_v22 }
 0x214   : > { %v1660_v11 = vadd.f32 %v1569_v33, %v1201_v15  ;;  %v1203_v41 = vadd.f32 %v1202_v51, %v931_v19 }
 0x215   : > { %v2736_v47 = vadd.f32 %v2735_v36, %v2673_v23 }
 0x216   : > { %v2002_v48 = vpop.f32.mrf.mxu3 }
 0x217   : > { %v2093_v49 = vadd.f32 %v2002_v48, %v1660_v11 }
 0x219   : > { %v2541_v46 = vmul.f32 %v2408_v14, %v2093_v49  ;;  %v934_v53 = vpop.f32.mrf.mxu0 }
 0x21b   : > { %v2604_v18 = vadd.f32 %v2603_v54, %v2541_v46  ;;  %v2674_v30 = vmul.f32 %v2541_v46, %v2093_v49  ;;  %v1571_v55 = vpop.f32.mrf.mxu2  ;;  %v1205_v26 = vpop.f32.mrf.mxu1 }
 0x21c   : > { %v1661_v57 = vadd.f32 %v1571_v55, %v1203_v41  ;;  %v1206_v24 = vadd.f32 %v1205_v26, %v934_v53  ;;  %v2433_v49 = vpop.permute.xlu0 %2432 }
 0x21d   : > { %v2737_v5 = vadd.f32 %v2736_v47, %v2674_v30 }
 0x21e   : > { %v2004_v50 = vpop.f32.mrf.mxu3 }
 0x21f   : > { %v2094_v52 = vadd.f32 %v2004_v50, %v1661_v57 }
 0x221   : > { %v2542_v31 = vmul.f32 %v2413_v60, %v2094_v52  ;;  %v936_v39 = vpop.f32.mrf.mxu0 }
 0x223   : > { %v2605_v43 = vadd.f32 %v2604_v18, %v2542_v31  ;;  %v2675_v28 = vmul.f32 %v2542_v31, %v2094_v52  ;;  %v1574_v2 = vpop.f32.mrf.mxu2  ;;  %v1207_v3 = vpop.f32.mrf.mxu1 }
 0x224   : > { %v1662_v9 = vadd.f32 %v1574_v2, %v1206_v24  ;;  %v1208_v10 = vadd.f32 %v1207_v3, %v936_v39 }
 0x225   : > { %v2738_v20 = vadd.f32 %v2737_v5, %v2675_v28  ;;  %v2438_v5 = vpop.permute.xlu1 %2437 }
 0x226   : > { %v2007_v21 = vpop.f32.mrf.mxu3 }
 0x227   : > { %v2095_v56 = vadd.f32 %v2007_v21, %v1662_v9 }
 0x229   : > { %v2543_v1 = vmul.f32 %v2418_v7, %v2095_v56  ;;  %v939_v32 = vpop.f32.mrf.mxu0 }
 0x22b   : > { %v2606_v4 = vadd.f32 %v2605_v43, %v2543_v1  ;;  %v2676_v16 = vmul.f32 %v2543_v1, %v2095_v56  ;;  %v1576_v12 = vpop.f32.mrf.mxu2  ;;  %v1210_v8 = vpop.f32.mrf.mxu1 }
 0x22c   : > { %v1663_v35 = vadd.f32 %v1576_v12, %v1208_v10  ;;  %v1211_v59 = vadd.f32 %v1210_v8, %v939_v32 }
 0x22d   : > { %v2739_v25 = vadd.f32 %v2738_v20, %v2676_v16 }
 0x22e   : > { %v2009_v44 = vpop.f32.mrf.mxu3 }
 0x22f   : > { %v2096_v6 = vadd.f32 %v2009_v44, %v1663_v35 }
 0x231   : > { %v2544_v27 = vmul.f32 %v2423_v58, %v2096_v6  ;;  %v941_v42 = vpop.f32.mrf.mxu0 }
 0x233   : > { %v2607_v15 = vadd.f32 %v2606_v4, %v2544_v27  ;;  %v2677_v36 = vmul.f32 %v2544_v27, %v2096_v6  ;;  %v1579_v63 = vpop.f32.mrf.mxu2  ;;  %v1212_v29 = vpop.f32.mrf.mxu1 }
 0x234   : > { %v1664_v0 = vadd.f32 %v1579_v63, %v1211_v59  ;;  %v1213_v13 = vadd.f32 %v1212_v29, %v941_v42 }
 0x235   : > { %v2740_v38 = vadd.f32 %v2739_v25, %v2677_v36  ;;  %v2443_v36 = vpop.permute.xlu2 %2442 }
 0x236   : > { %v2012_v40 = vpop.f32.mrf.mxu3 }
 0x237   : > { %v2097_v19 = vadd.f32 %v2012_v40, %v1664_v0 }
 0x239   : > { %v2545_v17 = vmul.f32 %v2428_v45, %v2097_v19  ;;  %v944_v54 = vpop.f32.mrf.mxu0 }
 0x23b   : > { %v2608_v23 = vadd.f32 %v2607_v15, %v2545_v17  ;;  %v2678_v33 = vmul.f32 %v2545_v17, %v2097_v19  ;;  %v1581_v51 = vpop.f32.mrf.mxu2  ;;  %v1215_v37 = vpop.f32.mrf.mxu1 }
 0x23c   : > { %v1665_v11 = vadd.f32 %v1581_v51, %v1213_v13  ;;  %v1216_v41 = vadd.f32 %v1215_v37, %v944_v54 }
 0x23d   : > { %v2741_v34 = vadd.f32 %v2740_v38, %v2678_v33  ;;  %v2448_v38 = vpop.permute.xlu0 %2447 }
 0x23e   : > { %v2014_v47 = vpop.f32.mrf.mxu3 }
 0x23f   : > { %v2098_v48 = vadd.f32 %v2014_v47, %v1665_v11  ;;  %v2458_v11 = vpop.permute.xlu2 %2457 }
 0x241   : > { %v2546_v14 = vmul.f32 %v2433_v49, %v2098_v48  ;;  %v946_v24 = vpop.f32.mrf.mxu0 }
 0x243   : > { %v2609_v46 = vadd.f32 %v2608_v23, %v2546_v14  ;;  %v2679_v53 = vmul.f32 %v2546_v14, %v2098_v48  ;;  %v1584_v18 = vpop.f32.mrf.mxu2  ;;  %v1217_v50 = vpop.f32.mrf.mxu1 }
 0x244   : > { %v1666_v30 = vadd.f32 %v1584_v18, %v1216_v41  ;;  %v1218_v63 = vadd.f32 %v1217_v50, %v946_v24  ;;  %v2453_v23 = vpop.permute.xlu1 %2452 }
 0x245   : > { %v2742_v55 = vadd.f32 %v2741_v34, %v2679_v53 }
 0x246   : > { %v2017_v26 = vpop.f32.mrf.mxu3 }
 0x247   : > { %v2099_v57 = vadd.f32 %v2017_v26, %v1666_v30  ;;  %v2463_v26 = vpop.permute.xlu0 %2462 }
 0x249   : > { %v2547_v52 = vmul.f32 %v2438_v5, %v2099_v57  ;;  %v949_v62 = vpop.f32.mrf.mxu0 }
 0x24b   : > { %v3824_v60 = vadd.f32 %v2609_v46, %v2547_v52  ;;  %v2680_v31 = vmul.f32 %v2547_v52, %v2099_v57  ;;  %v1586_v39 = vpop.f32.mrf.mxu2  ;;  %v1220_v43 = vpop.f32.mrf.mxu1 }
 0x24c   : > { %v1221_v29 = vadd.f32 %v1220_v43, %v949_v62  ;;  %v1667_v13 = vadd.f32 %v1586_v39, %v1218_v63  ;;  %v2468_v62 = vpop.permute.xlu1 %2467 }
 0x24d   : > { %v3826_v61 = vadd.f32 %v2742_v55, %v2680_v31 }
 0x24e   : > { %v2019_v2 = vpop.f32.mrf.mxu3 }
 0x24f   : > { %v2100_v33 = vadd.f32 %v2019_v2, %v1667_v13 }
 0x251   : > { %v951_v3 = vpop.f32.mrf.mxu0  ;;  %v2548_v14 = vmul.f32 %v2443_v36, %v2100_v33 }
 0x253   : > { %v1589_v28 = vpop.f32.mrf.mxu2  ;;  %v1222_v9 = vpop.f32.mrf.mxu1  ;;  %v2681_v50 = vmul.f32 %v2548_v14, %v2100_v33 }
 0x254   : > { %v1668_v19 = vadd.f32 %v1589_v28, %v1221_v29  ;;  %v1223_v45 = vadd.f32 %v1222_v9, %v951_v3 }
 0x256   : > { %v2022_v22 = vpop.f32.mrf.mxu3 }
 0x257   : > { %v2101_v41 = vadd.f32 %v2022_v22, %v1668_v19  ;;  %v2611_v22 = vadd.f32 %v3824_v60, %v2548_v14  ;;  %v2478_v60 = vpop.permute.xlu0 %2477 }
 0x259   : > { %v954_v20 = vpop.f32.mrf.mxu0  ;;  %v2549_v18 = vmul.f32 %v2448_v38, %v2101_v41 }
 0x25b   : > { %v1591_v10 = vpop.f32.mrf.mxu2  ;;  %v1225_v21 = vpop.f32.mrf.mxu1  ;;  %v2682_v28 = vmul.f32 %v2549_v18, %v2101_v41 }
 0x25c   : > { %v1226_v17 = vadd.f32 %v1225_v21, %v954_v20  ;;  %v1669_v51 = vadd.f32 %v1591_v10, %v1223_v45 }
 0x25e   : > { %v2024_v7 = vpop.f32.mrf.mxu3 }
 0x25f   : > { %v2102_v46 = vadd.f32 %v2024_v7, %v1669_v51  ;;  %v2473_v7 = vpop.permute.xlu2 %2472 }
 0x261   : > { %v956_v1 = vpop.f32.mrf.mxu0  ;;  %v2550_v52 = vmul.f32 %v2453_v23, %v2102_v46 }
 0x263   : > { %v1594_v56 = vpop.f32.mrf.mxu2  ;;  %v1227_v32 = vpop.f32.mrf.mxu1 }
 0x264   : > { %v1670_v34 = vadd.f32 %v1594_v56, %v1226_v17  ;;  %v1228_v47 = vadd.f32 %v1227_v32, %v956_v1  ;;  %v2744_v1 = vadd.f32 %v3826_v61, %v2681_v50  ;;  %v2683_v32 = vmul.f32 %v2550_v52, %v2102_v46  ;;  %v2483_v17 = vpop.permute.xlu1 %2482 }
 0x266   : > { %v2027_v16 = vpop.f32.mrf.mxu3 }
 0x267   : > { %v2103_v30 = vadd.f32 %v2027_v16, %v1670_v34  ;;  %v2612_v16 = vadd.f32 %v2611_v22, %v2549_v18  ;;  %v2488_v41 = vpop.permute.xlu2 %2487 }
 0x269   : > { %v959_v12 = vpop.f32.mrf.mxu0  ;;  %v2551_v2 = vmul.f32 %v2458_v11, %v2103_v30 }
 0x26b   : > { %v1596_v4 = vpop.f32.mrf.mxu2  ;;  %v1230_v8 = vpop.f32.mrf.mxu1 }
 0x26c   : > { %v1231_v48 = vadd.f32 %v1230_v8, %v959_v12  ;;  %v1671_v53 = vadd.f32 %v1596_v4, %v1228_v47 }
 0x26e   : > { %v2029_v59 = vpop.f32.mrf.mxu3 }
 0x26f   : > { %v2104_v31 = vadd.f32 %v2029_v59, %v1671_v53  ;;  %v2684_v59 = vmul.f32 %v2551_v2, %v2103_v30 }
 0x271   : > { %v961_v25 = vpop.f32.mrf.mxu0  ;;  %v2552_v4 = vmul.f32 %v2463_v26, %v2104_v31 }
 0x273   : > { %v1599_v35 = vpop.f32.mrf.mxu2  ;;  %v1232_v44 = vpop.f32.mrf.mxu1 }
 0x274   : > { %v1672_v55 = vadd.f32 %v1599_v35, %v1231_v48  ;;  %v1233_v57 = vadd.f32 %v1232_v44, %v961_v25  ;;  %v2745_v35 = vadd.f32 %v2744_v1, %v2682_v28  ;;  %v2613_v44 = vadd.f32 %v2612_v16, %v2550_v52 }
 0x276   : > { %v2032_v58 = vpop.f32.mrf.mxu3 }
 0x277   : > { %v2105_v3 = vadd.f32 %v2032_v58, %v1672_v55 }
 0x279   : > { %v964_v27 = vpop.f32.mrf.mxu0  ;;  %v2553_v25 = vmul.f32 %v2468_v62, %v2105_v3 }
 0x27b   : > { %v1601_v6 = vpop.f32.mrf.mxu2  ;;  %v1235_v42 = vpop.f32.mrf.mxu1  ;;  %v2686_v61 = vmul.f32 %v2553_v25, %v2105_v3 }
 0x27c   : > { %v1236_v24 = vadd.f32 %v1235_v42, %v964_v27  ;;  %v1673_v43 = vadd.f32 %v1601_v6, %v1233_v57  ;;  %v2746_v27 = vadd.f32 %v2745_v35, %v2683_v32  ;;  %v2685_v42 = vmul.f32 %v2552_v4, %v2104_v31 }
 0x27e   : > { %v2034_v0 = vpop.f32.mrf.mxu3  ;;  %v2747_v13 = vadd.f32 %v2746_v27, %v2684_v59 }
 0x27f   : > { %v2106_v12 = vadd.f32 %v2034_v0, %v1673_v43 }
 0x281   : > { %v966_v40 = vpop.f32.mrf.mxu0  ;;  %v2554_v36 = vmul.f32 %v2473_v7, %v2106_v12 }
 0x283   : > { %v1604_v15 = vpop.f32.mrf.mxu2  ;;  %v1237_v54 = vpop.f32.mrf.mxu1  ;;  %v2687_v51 = vmul.f32 %v2554_v36, %v2106_v12 }
 0x284   : > { %v1674_v20 = vadd.f32 %v1604_v15, %v1236_v24  ;;  %v1238_v21 = vadd.f32 %v1237_v54, %v966_v40  ;;  %v2614_v15 = vadd.f32 %v2613_v44, %v2551_v2  ;;  %v2748_v54 = vadd.f32 %v2747_v13, %v2685_v42 }
 0x286   : > { %v2037_v49 = vpop.f32.mrf.mxu3  ;;  %v2615_v19 = vadd.f32 %v2614_v15, %v2552_v4  ;;  %v2749_v34 = vadd.f32 %v2748_v54, %v2686_v61 }
 0x287   : > { %v2107_v6 = vadd.f32 %v2037_v49, %v1674_v20 }
 0x288   : > { %v2616_v33 = vadd.f32 %v2615_v19, %v2553_v25  ;;  %v2750_v46 = vadd.f32 %v2749_v34, %v2687_v51 }
 0x289   : > { %v969_v5 = vpop.f32.mrf.mxu0  ;;  %v2555_v0 = vmul.f32 %v2478_v60, %v2107_v6 }
 0x28a   : > { %v2617_v47 = vadd.f32 %v2616_v33, %v2554_v36 }
 0x28b   : > { %v1606_v37 = vpop.f32.mrf.mxu2  ;;  %v1240_v39 = vpop.f32.mrf.mxu1  ;;  %v2688_v48 = vmul.f32 %v2555_v0, %v2107_v6 }
 0x28c   : > { %v1241_v56 = vadd.f32 %v1240_v39, %v969_v5  ;;  %v1675_v8 = vadd.f32 %v1606_v37, %v1238_v21  ;;  %v2618_v53 = vadd.f32 %v2617_v47, %v2555_v0  ;;  %v2493_v5 = vpop.permute.xlu0 %2492 }
 0x28d   : > { %v2751_v55 = vadd.f32 %v2750_v46, %v2688_v48 }
 0x28e   : > { %v2039_v9 = vpop.f32.mrf.mxu3 }
 0x28f   : > { %v2108_v63 = vadd.f32 %v2039_v9, %v1675_v8 }
 0x291   : > { %v971_v29 = vpop.f32.mrf.mxu0  ;;  %v2556_v37 = vmul.f32 %v2483_v17, %v2108_v63 }
 0x293   : > { %v1609_v10 = vpop.f32.mrf.mxu2  ;;  %v1242_v40 = vpop.f32.mrf.mxu1  ;;  %v2689_v18 = vmul.f32 %v2556_v37, %v2108_v63  ;;  %v2619_v26 = vadd.f32 %v2618_v53, %v2556_v37 }
 0x294   : > { %v1676_v58 = vadd.f32 %v1609_v10, %v1241_v56  ;;  %v1243_v11 = vadd.f32 %v1242_v40, %v971_v29 }
 0x295   : > { %v2752_v50 = vadd.f32 %v2751_v55, %v2689_v18 }
 0x296   : > { %v2042_v38 = vpop.f32.mrf.mxu3 }
 0x297   : > { %v2109_v45 = vadd.f32 %v2042_v38, %v1676_v58 }
 0x299   : > { %v2557_v49 = vmul.f32 %v2488_v41, %v2109_v45 }
 0x29b   : > { %v1611_v23 = vpop.f32.mrf.mxu2  ;;  %v2690_v57 = vmul.f32 %v2557_v49, %v2109_v45  ;;  %v2620_v52 = vadd.f32 %v2619_v26, %v2557_v49 }
 0x29c   : > { %v1677_v14 = vadd.f32 %v1611_v23, %v1243_v11 }
 0x29d   : > { %v2753_v39 = vadd.f32 %v2752_v50, %v2690_v57 }
 0x29e   : > { %v2044_v30 = vpop.f32.mrf.mxu3 }
 0x29f   : > { %v2110_v24 = vadd.f32 %v2044_v30, %v1677_v14 }
 0x2a1   : > { %v2558_v31 = vmul.f32 %v2493_v5, %v2110_v24 }
 0x2a3   : > { %v2621_v62 = vadd.f32 %v2620_v52, %v2558_v31  ;;  %v2691_v43 = vmul.f32 %v2558_v31, %v2110_v24 }
 0x2a5   : > { %v2622_v28 = vrot.slane %v2621_v62, 4  ;;  %v2754_v2 = vadd.f32 %v2753_v39, %v2691_v43 }
 0x2a7   : > { %v2623_v3 = vadd.f32 %v2622_v28, %v2621_v62  ;;  %v2755_v9 = vrot.slane %v2754_v2, 4 }
 0x2a9   : > { %v2624_v10 = vrot.slane %v2623_v3, 2  ;;  %v2756_v22 = vadd.f32 %v2755_v9, %v2754_v2 }
 0x2ab   : > { %v2625_v20 = vadd.f32 %v2624_v10, %v2623_v3  ;;  %v2757_v21 = vrot.slane %v2756_v22, 2 }
 0x2ad   : > { %v2626_v56 = vrot.slane %v2625_v20, 1  ;;  %v2758_v7 = vadd.f32 %v2757_v21, %v2756_v22 }
 0x2af   : > { %v2759_v1 = vrot.slane %v2758_v7, 1  ;;  %v2627_v32 = vadd.f32 %v2626_v56, %v2625_v20 }
 0x2b1   : > { %v2760_v4 = vadd.f32 %v2759_v1, %v2758_v7 }
 0x2b3   : > { %v2762_v16 = vsel %vm2761_vm1, %v2627_v32, %v2760_v4 }
 0x2b4   : > { %v2764_v12 = vsel %vm2763_vm2, %v2762_v16, 0.0 }
 0x2b5   : > { %2765 = vst [vmem:[%s248_s21] sm:$0xff] %v2764_v12 }
 0x2b6 PF: > { %s14_s15 = sadd.s32 1, %s3025_s15  }
 0x2b7   : > { %p11_p7 = scmp.ge.s32.totalorder %s14_s15, 4  }
 0x2b9   :  { %13 = sbr.rel (!%p11_p7) target bundleno = 1 (0x1), region = 72 }

</bundles_post_ra>
